<compile_context>
chip_gen: v7x
topology: tpu7x:2x2x1
jax: 0.10.0
libtpu: 0.0.40
codegen_flags: <defaults>
</compile_context>

<pallas_src>
import functools

import jax
import jax.numpy as jnp
from jax.experimental import pallas as pl
from jax.experimental.pallas import tpu as pltpu


def _round_up(x, m):
    return (x + m - 1) // m * m


# -----------------------------------------------------------------------------
# Pallas kernel: full CVAE forward (encoder -> reparametrize -> decoder)
# All refs are padded to lane-dense (multiples of 128) feature widths.
# -----------------------------------------------------------------------------
def _cvae_kernel(
    x_ref, c_ref, eps_ref,
    w1x_ref, w1c_ref, b1_ref,
    w2_ref, b2_ref, w3_ref, b3_ref,
    wh_ref, bh_ref,
    wd1z_ref, wd1c_ref, bd1_ref,
    wd2_ref, bd2_ref, wd3_ref, bd3_ref,
    wd4_ref, bd4_ref,
    xhat_ref, mu_ref, logvar_ref,
):
    f32 = jnp.float32
    bf16 = jnp.bfloat16

    def mm(a, w_ref):
        # bf16 x bf16 on the MXU, f32 accumulation.
        return jnp.dot(a, w_ref[...], preferred_element_type=f32)

    def relu_bf16(acc_f32):
        return jnp.maximum(acc_f32, 0.0).astype(bf16)

    x = x_ref[...]          # (TM, IN_PAD)  bf16
    c = c_ref[...]          # (TM, C_PAD)   bf16

    # ---- encoder: cat(x, c) @ W1 rewritten as x@W1x + c@W1c ----
    h = relu_bf16(mm(x, w1x_ref) + mm(c, w1c_ref) + b1_ref[...])
    h = relu_bf16(mm(h, w2_ref) + b2_ref[...])
    h = relu_bf16(mm(h, w3_ref) + b3_ref[...])

    # ---- fused latent heads: [mu | logvar] in one matmul ----
    lat_pad = mu_ref.shape[-1]                       # 128
    head = mm(h, wh_ref) + bh_ref[...]               # (TM, 2*lat_pad) f32
    mu = head[:, :lat_pad]
    logvar = head[:, lat_pad:]

    # ---- reparametrize (f32): z = eps * exp(0.5*logvar) + mu ----
    # Padded lanes: eps=0, mu=0, logvar=0 -> z=0, so padding stays inert.
    z = eps_ref[...] * jnp.exp(0.5 * logvar) + mu

    # ---- decoder: cat(z, c) @ Wd1 rewritten as z@Wd1z + c@Wd1c ----
    d = relu_bf16(mm(z.astype(bf16), wd1z_ref) + mm(c, wd1c_ref) + bd1_ref[...])
    d = relu_bf16(mm(d, wd2_ref) + bd2_ref[...])
    d = relu_bf16(mm(d, wd3_ref) + bd3_ref[...])
    logits = mm(d, wd4_ref) + bd4_ref[...]           # (TM, OUT_PAD) f32

    # Sigmoid via EUP exp + reciprocal (exact).
    xhat_ref[...] = pl.reciprocal(1.0 + jnp.exp(-logits), approx=False)
    mu_ref[...] = mu
    logvar_ref[...] = logvar


# -----------------------------------------------------------------------------
# Parameter construction (deterministic, mirrors the shapes in CVAE.__init__).
# Weights stored (in_features, out_features); biases (1, out_features).
# -----------------------------------------------------------------------------
def init_cvae_params(key, input_size=784, num_classes=10, latent_size=15,
                     hidden_dim=400):
    dims = [
        ("enc1", input_size + num_classes, hidden_dim),
        ("enc2", hidden_dim, hidden_dim),
        ("enc3", hidden_dim, hidden_dim),
        ("mu", hidden_dim, latent_size),
        ("logvar", hidden_dim, latent_size),
        ("dec1", latent_size + num_classes, hidden_dim),
        ("dec2", hidden_dim, hidden_dim),
        ("dec3", hidden_dim, hidden_dim),
        ("dec4", hidden_dim, input_size),
    ]
    params = {}
    keys = jax.random.split(key, len(dims))
    for k, (name, fan_in, fan_out) in zip(keys, dims):
        wkey, bkey = jax.random.split(k)
        scale = 1.0 / jnp.sqrt(jnp.float32(fan_in))
        params[name] = {
            "w": jax.random.normal(wkey, (fan_in, fan_out), jnp.float32) * scale,
            "b": jax.random.normal(bkey, (1, fan_out), jnp.float32) * scale,
        }
    return params


# -----------------------------------------------------------------------------
# One-time packing: split cat-weights, fuse mu|logvar head, zero-pad feature
# dims to 128 multiples, cast weights to bf16 (biases stay f32).
# -----------------------------------------------------------------------------
def pack_cvae_params(params, input_size=784, num_classes=10, latent_size=15,
                     hidden_dim=400):
    in_pad = _round_up(input_size, 128)      # 896
    h_pad = _round_up(hidden_dim, 128)       # 512
    c_pad = _round_up(num_classes, 128)      # 128
    lat_pad = _round_up(latent_size, 128)    # 128
    out_pad = _round_up(input_size, 128)     # 896

    def pad2(a, shape, dtype):
        out = jnp.zeros(shape, jnp.float32)
        out = out.at[: a.shape[0], : a.shape[1]].set(a)
        return out.astype(dtype)

    bf16, f32 = jnp.bfloat16, jnp.float32
    w1 = params["enc1"]["w"]
    wd1 = params["dec1"]["w"]

    packed = {
        "w1x": pad2(w1[:input_size], (in_pad, h_pad), bf16),
        "w1c": pad2(w1[input_size:], (c_pad, h_pad), bf16),
        "b1": pad2(params["enc1"]["b"], (1, h_pad), f32),
        "w2": pad2(params["enc2"]["w"], (h_pad, h_pad), bf16),
        "b2": pad2(params["enc2"]["b"], (1, h_pad), f32),
        "w3": pad2(params["enc3"]["w"], (h_pad, h_pad), bf16),
        "b3": pad2(params["enc3"]["b"], (1, h_pad), f32),
        "wd1z": pad2(wd1[:latent_size], (lat_pad, h_pad), bf16),
        "wd1c": pad2(wd1[latent_size:], (c_pad, h_pad), bf16),
        "bd1": pad2(params["dec1"]["b"], (1, h_pad), f32),
        "wd2": pad2(params["dec2"]["w"], (h_pad, h_pad), bf16),
        "bd2": pad2(params["dec2"]["b"], (1, h_pad), f32),
        "wd3": pad2(params["dec3"]["w"], (h_pad, h_pad), bf16),
        "bd3": pad2(params["dec3"]["b"], (1, h_pad), f32),
        "wd4": pad2(params["dec4"]["w"], (h_pad, out_pad), bf16),
        "bd4": pad2(params["dec4"]["b"], (1, out_pad), f32),
    }

    # Fused [mu | logvar] head: (h_pad, 2*lat_pad).
    wh = jnp.zeros((h_pad, 2 * lat_pad), f32)
    wh = wh.at[:hidden_dim, :latent_size].set(params["mu"]["w"])
    wh = wh.at[:hidden_dim, lat_pad:lat_pad + latent_size].set(params["logvar"]["w"])
    bh = jnp.zeros((1, 2 * lat_pad), f32)
    bh = bh.at[:, :latent_size].set(params["mu"]["b"])
    bh = bh.at[:, lat_pad:lat_pad + latent_size].set(params["logvar"]["b"])
    packed["wh"] = wh.astype(bf16)
    packed["bh"] = bh
    return packed


# -----------------------------------------------------------------------------
# Wrapper: pad batch / features, build grid + BlockSpecs, slice results back.
# -----------------------------------------------------------------------------
@jax.jit
def cvae_forward(x, c, eps, packed):
    """x: (N, 1, 28, 28) f32, c: (N, num_classes) f32, eps: (N, latent) f32."""
    n = x.shape[0]
    input_size = x.shape[1] * x.shape[2] * x.shape[3]
    latent_size = eps.shape[1]

    in_pad, h_pad = packed["w1x"].shape
    c_pad = packed["w1c"].shape[0]
    lat_pad = packed["wd1z"].shape[0]
    out_pad = packed["wd4"].shape[1]

    # Batch tiling: sublane-aligned tile, whole batch padded to a tile multiple.
    tile_m = min(128, _round_up(n, 8))
    n_pad = _round_up(n, tile_m)
    grid = (n_pad // tile_m,)

    def pad_act(a, cols, dtype):
        out = jnp.zeros((n_pad, cols), dtype)
        return out.at[: a.shape[0], : a.shape[1]].set(a.astype(dtype))

    x_p = pad_act(x.reshape(n, input_size), in_pad, jnp.bfloat16)
    c_p = pad_act(c, c_pad, jnp.bfloat16)
    eps_p = pad_act(eps, lat_pad, jnp.float32)

    def act_spec(cols):
        return pl.BlockSpec((tile_m, cols), lambda i: (i, 0))

    def const_spec(name):
        return pl.BlockSpec(packed[name].shape, lambda i: (0, 0))

    in_specs = [
        act_spec(in_pad), act_spec(c_pad), act_spec(lat_pad),
        const_spec("w1x"), const_spec("w1c"), const_spec("b1"),
        const_spec("w2"), const_spec("b2"),
        const_spec("w3"), const_spec("b3"),
        const_spec("wh"), const_spec("bh"),
        const_spec("wd1z"), const_spec("wd1c"), const_spec("bd1"),
        const_spec("wd2"), const_spec("bd2"),
        const_spec("wd3"), const_spec("bd3"),
        const_spec("wd4"), const_spec("bd4"),
    ]
    out_specs = (act_spec(out_pad), act_spec(lat_pad), act_spec(lat_pad))
    out_shape = (
        jax.ShapeDtypeStruct((n_pad, out_pad), jnp.float32),   # x_hat (padded)
        jax.ShapeDtypeStruct((n_pad, lat_pad), jnp.float32),   # mu    (padded)
        jax.ShapeDtypeStruct((n_pad, lat_pad), jnp.float32),   # logvar(padded)
    )

    xhat_p, mu_p, lv_p = pl.pallas_call(
        _cvae_kernel,
        out_shape=out_shape,
        grid_spec=pltpu.PrefetchScalarGridSpec(
            num_scalar_prefetch=0,
            grid=grid,
            in_specs=in_specs,
            out_specs=out_specs,
        ),
        compiler_params=pltpu.CompilerParams(
            dimension_semantics=("parallel",),   # megacore batch-split on v7x
            vmem_limit_bytes=32 << 20,
        ),
    )(
        x_p, c_p, eps_p,
        packed["w1x"], packed["w1c"], packed["b1"],
        packed["w2"], packed["b2"], packed["w3"], packed["b3"],
        packed["wh"], packed["bh"],
        packed["wd1z"], packed["wd1c"], packed["bd1"],
        packed["wd2"], packed["bd2"], packed["wd3"], packed["bd3"],
        packed["wd4"], packed["bd4"],
    )

    x_hat = xhat_p[:n, :input_size].reshape(x.shape)   # nn.Unflatten(1,(1,28,28))
    mu = mu_p[:n, :latent_size]
    logvar = lv_p[:n, :latent_size]
    return x_hat, mu, logvar


# -----------------------------------------------------------------------------
# Pure-JAX reference (mimics the kernel's bf16 matmul / f32-accumulate recipe
# so the numerical comparison is apples-to-apples).
# -----------------------------------------------------------------------------
def cvae_forward_ref(x, c, eps, params, latent_size=15):
    bf16, f32 = jnp.bfloat16, jnp.float32
    n = x.shape[0]

    def lin(a, name):
        return (jnp.dot(a, params[name]["w"].astype(bf16),
                        preferred_element_type=f32)
                + params[name]["b"])

    x_flat = x.reshape(n, -1)
    h = jnp.concatenate([x_flat, c], axis=1).astype(bf16)
    for name in ("enc1", "enc2", "enc3"):
        h = jnp.maximum(lin(h, name), 0.0).astype(bf16)
    mu = lin(h, "mu")
    logvar = lin(h, "logvar")
    z = eps * jnp.exp(0.5 * logvar) + mu
    d = jnp.concatenate([z, c.astype(f32)], axis=1).astype(bf16)
    for name in ("dec1", "dec2", "dec3"):
        d = jnp.maximum(lin(d, name), 0.0).astype(bf16)
    logits = lin(d, "dec4")
    x_hat = jax.nn.sigmoid(logits).reshape(x.shape)
    return x_hat, mu, logvar


if __name__ == "__main__":
    # MNIST-like input (N, 1, 28, 28) + one-hot class vector (N, 10), as the
    # module's Unflatten(1, (1, 28, 28)) implies.
    N, H, W = 2, 28, 28
    NUM_CLASSES, LATENT, HIDDEN = 10, 15, 400
    INPUT_SIZE = H * W

    key = jax.random.PRNGKey(0)
    k_x, k_eps, k_params = jax.random.split(key, 3)

    x = jax.random.uniform(k_x, (N, 1, H, W), jnp.float32)
    labels = jnp.array([3, 7], dtype=jnp.int32)
    c = jax.nn.one_hot(labels, NUM_CLASSES, dtype=jnp.float32)
    # TODO(synk): torch.randn_like noise is drawn outside the kernel (jax.random)
    # and passed in as `eps` to keep the kernel deterministic.
    eps = jax.random.normal(k_eps, (N, LATENT), jnp.float32)

    params = init_cvae_params(k_params, INPUT_SIZE, NUM_CLASSES, LATENT, HIDDEN)
    packed = pack_cvae_params(params, INPUT_SIZE, NUM_CLASSES, LATENT, HIDDEN)

    x_hat, mu, logvar = cvae_forward(x, c, eps, packed)
    jax.block_until_ready((x_hat, mu, logvar))

    # Shape / value sanity check against the (bf16-matched) JAX reference.
    assert x_hat.shape == (N, 1, 28, 28)
    assert mu.shape == (N, LATENT) and logvar.shape == (N, LATENT)
    x_hat_r, mu_r, logvar_r = cvae_forward_ref(x, c, eps, params, LATENT)
    assert jnp.allclose(x_hat, x_hat_r, atol=2e-2, rtol=2e-2)
    assert jnp.allclose(mu, mu_r, atol=2e-2, rtol=2e-2)
    assert jnp.allclose(logvar, logvar_r, atol=2e-2, rtol=2e-2)

    print("KERNEL_OK")
</pallas_src>

<mosaic_0001>
module attributes {stable_mosaic.version = 11 : i64} {
  func.func @_cvae_kernel(%arg0: i32, %arg1: memref<8x896xbf16, #tpu.memory_space<vmem>>, %arg2: memref<8x128xbf16, #tpu.memory_space<vmem>>, %arg3: memref<8x128xf32, #tpu.memory_space<vmem>>, %arg4: memref<896x512xbf16, #tpu.memory_space<vmem>>, %arg5: memref<128x512xbf16, #tpu.memory_space<vmem>>, %arg6: memref<1x512xf32, #tpu.memory_space<vmem>>, %arg7: memref<512x512xbf16, #tpu.memory_space<vmem>>, %arg8: memref<1x512xf32, #tpu.memory_space<vmem>>, %arg9: memref<512x512xbf16, #tpu.memory_space<vmem>>, %arg10: memref<1x512xf32, #tpu.memory_space<vmem>>, %arg11: memref<512x256xbf16, #tpu.memory_space<vmem>>, %arg12: memref<1x256xf32, #tpu.memory_space<vmem>>, %arg13: memref<128x512xbf16, #tpu.memory_space<vmem>>, %arg14: memref<128x512xbf16, #tpu.memory_space<vmem>>, %arg15: memref<1x512xf32, #tpu.memory_space<vmem>>, %arg16: memref<512x512xbf16, #tpu.memory_space<vmem>>, %arg17: memref<1x512xf32, #tpu.memory_space<vmem>>, %arg18: memref<512x512xbf16, #tpu.memory_space<vmem>>, %arg19: memref<1x512xf32, #tpu.memory_space<vmem>>, %arg20: memref<512x896xbf16, #tpu.memory_space<vmem>>, %arg21: memref<1x896xf32, #tpu.memory_space<vmem>>, %arg22: memref<8x896xf32, #tpu.memory_space<vmem>>, %arg23: memref<8x128xf32, #tpu.memory_space<vmem>>, %arg24: memref<8x128xf32, #tpu.memory_space<vmem>>) attributes {dimension_semantics = [#tpu.dimension_semantics<parallel>], iteration_bounds = array<i64: 1>, scalar_prefetch = 0 : i64, scratch_operands = 0 : i64, tpu.core_type = #tpu.core_type<tc>, window_params = [{transform_indices = @transform_0, window_bounds = array<i64: 8, 896>}, {transform_indices = @transform_1, window_bounds = array<i64: 8, 128>}, {transform_indices = @transform_2, window_bounds = array<i64: 8, 128>}, {pipeline_mode = #tpu.pipeline_mode<synchronous>, transform_indices = @transform_3, window_bounds = array<i64: 896, 512>}, {pipeline_mode = #tpu.pipeline_mode<synchronous>, transform_indices = @transform_4, window_bounds = array<i64: 128, 512>}, {pipeline_mode = #tpu.pipeline_mode<synchronous>, transform_indices = @transform_5, window_bounds = array<i64: 1, 512>}, {pipeline_mode = #tpu.pipeline_mode<synchronous>, transform_indices = @transform_6, window_bounds = array<i64: 512, 512>}, {pipeline_mode = #tpu.pipeline_mode<synchronous>, transform_indices = @transform_7, window_bounds = array<i64: 1, 512>}, {pipeline_mode = #tpu.pipeline_mode<synchronous>, transform_indices = @transform_8, window_bounds = array<i64: 512, 512>}, {pipeline_mode = #tpu.pipeline_mode<synchronous>, transform_indices = @transform_9, window_bounds = array<i64: 1, 512>}, {pipeline_mode = #tpu.pipeline_mode<synchronous>, transform_indices = @transform_10, window_bounds = array<i64: 512, 256>}, {pipeline_mode = #tpu.pipeline_mode<synchronous>, transform_indices = @transform_11, window_bounds = array<i64: 1, 256>}, {pipeline_mode = #tpu.pipeline_mode<synchronous>, transform_indices = @transform_12, window_bounds = array<i64: 128, 512>}, {pipeline_mode = #tpu.pipeline_mode<synchronous>, transform_indices = @transform_13, window_bounds = array<i64: 128, 512>}, {pipeline_mode = #tpu.pipeline_mode<synchronous>, transform_indices = @transform_14, window_bounds = array<i64: 1, 512>}, {pipeline_mode = #tpu.pipeline_mode<synchronous>, transform_indices = @transform_15, window_bounds = array<i64: 512, 512>}, {pipeline_mode = #tpu.pipeline_mode<synchronous>, transform_indices = @transform_16, window_bounds = array<i64: 1, 512>}, {pipeline_mode = #tpu.pipeline_mode<synchronous>, transform_indices = @transform_17, window_bounds = array<i64: 512, 512>}, {pipeline_mode = #tpu.pipeline_mode<synchronous>, transform_indices = @transform_18, window_bounds = array<i64: 1, 512>}, {pipeline_mode = #tpu.pipeline_mode<synchronous>, transform_indices = @transform_19, window_bounds = array<i64: 512, 896>}, {pipeline_mode = #tpu.pipeline_mode<synchronous>, transform_indices = @transform_20, window_bounds = array<i64: 1, 896>}, {transform_indices = @transform_21, window_bounds = array<i64: 8, 896>}, {transform_indices = @transform_22, window_bounds = array<i64: 8, 128>}, {transform_indices = @transform_23, window_bounds = array<i64: 8, 128>}]} {
    %c0 = arith.constant 0 : index
    %c0_0 = arith.constant 0 : index
    %0 = vector.load %arg1[%c0, %c0_0] : memref<8x896xbf16, #tpu.memory_space<vmem>>, vector<8x896xbf16>
    %c0_1 = arith.constant 0 : index
    %c0_2 = arith.constant 0 : index
    %1 = vector.load %arg2[%c0_1, %c0_2] : memref<8x128xbf16, #tpu.memory_space<vmem>>, vector<8x128xbf16>
    %c0_3 = arith.constant 0 : index
    %c0_4 = arith.constant 0 : index
    %2 = vector.load %arg4[%c0_3, %c0_4] : memref<896x512xbf16, #tpu.memory_space<vmem>>, vector<896x512xbf16>
    %cst = arith.constant dense<0.000000e+00> : vector<8x512xf32>
    %3 = tpu.matmul %0, %2, %cst {dimension_numbers = #tpu.dot_dimension_numbers<[1], [0], [0], [1], [0, 0, 1, 1], [], []>} : vector<8x896xbf16>, vector<896x512xbf16>, vector<8x512xf32> -> vector<8x512xf32>
    %c0_5 = arith.constant 0 : index
    %c0_6 = arith.constant 0 : index
    %4 = vector.load %arg5[%c0_5, %c0_6] : memref<128x512xbf16, #tpu.memory_space<vmem>>, vector<128x512xbf16>
    %cst_7 = arith.constant dense<0.000000e+00> : vector<8x512xf32>
    %5 = tpu.matmul %1, %4, %cst_7 {dimension_numbers = #tpu.dot_dimension_numbers<[1], [0], [0], [1], [0, 0, 1, 1], [], []>} : vector<8x128xbf16>, vector<128x512xbf16>, vector<8x512xf32> -> vector<8x512xf32>
    %6 = arith.addf %3, %5 : vector<8x512xf32>
    %c0_8 = arith.constant 0 : index
    %c0_9 = arith.constant 0 : index
    %7 = vector.load %arg6[%c0_8, %c0_9] : memref<1x512xf32, #tpu.memory_space<vmem>>, vector<1x512xf32>
    %8 = vector.broadcast %7 : vector<1x512xf32> to vector<8x512xf32>
    %9 = arith.addf %6, %8 : vector<8x512xf32>
    %cst_10 = arith.constant 0.000000e+00 : f32
    %10 = vector.broadcast %cst_10 : f32 to vector<8x512xf32>
    %11 = arith.maximumf %9, %10 : vector<8x512xf32>
    %12 = arith.truncf %11 : vector<8x512xf32> to vector<8x512xbf16>
    %c0_11 = arith.constant 0 : index
    %c0_12 = arith.constant 0 : index
    %13 = vector.load %arg7[%c0_11, %c0_12] : memref<512x512xbf16, #tpu.memory_space<vmem>>, vector<512x512xbf16>
    %cst_13 = arith.constant dense<0.000000e+00> : vector<8x512xf32>
    %14 = tpu.matmul %12, %13, %cst_13 {dimension_numbers = #tpu.dot_dimension_numbers<[1], [0], [0], [1], [0, 0, 1, 1], [], []>} : vector<8x512xbf16>, vector<512x512xbf16>, vector<8x512xf32> -> vector<8x512xf32>
    %c0_14 = arith.constant 0 : index
    %c0_15 = arith.constant 0 : index
    %15 = vector.load %arg8[%c0_14, %c0_15] : memref<1x512xf32, #tpu.memory_space<vmem>>, vector<1x512xf32>
    %16 = vector.broadcast %15 : vector<1x512xf32> to vector<8x512xf32>
    %17 = arith.addf %14, %16 : vector<8x512xf32>
    %cst_16 = arith.constant 0.000000e+00 : f32
    %18 = vector.broadcast %cst_16 : f32 to vector<8x512xf32>
    %19 = arith.maximumf %17, %18 : vector<8x512xf32>
    %20 = arith.truncf %19 : vector<8x512xf32> to vector<8x512xbf16>
    %c0_17 = arith.constant 0 : index
    %c0_18 = arith.constant 0 : index
    %21 = vector.load %arg9[%c0_17, %c0_18] : memref<512x512xbf16, #tpu.memory_space<vmem>>, vector<512x512xbf16>
    %cst_19 = arith.constant dense<0.000000e+00> : vector<8x512xf32>
    %22 = tpu.matmul %20, %21, %cst_19 {dimension_numbers = #tpu.dot_dimension_numbers<[1], [0], [0], [1], [0, 0, 1, 1], [], []>} : vector<8x512xbf16>, vector<512x512xbf16>, vector<8x512xf32> -> vector<8x512xf32>
    %c0_20 = arith.constant 0 : index
    %c0_21 = arith.constant 0 : index
    %23 = vector.load %arg10[%c0_20, %c0_21] : memref<1x512xf32, #tpu.memory_space<vmem>>, vector<1x512xf32>
    %24 = vector.broadcast %23 : vector<1x512xf32> to vector<8x512xf32>
    %25 = arith.addf %22, %24 : vector<8x512xf32>
    %cst_22 = arith.constant 0.000000e+00 : f32
    %26 = vector.broadcast %cst_22 : f32 to vector<8x512xf32>
    %27 = arith.maximumf %25, %26 : vector<8x512xf32>
    %28 = arith.truncf %27 : vector<8x512xf32> to vector<8x512xbf16>
    %c0_23 = arith.constant 0 : index
    %c0_24 = arith.constant 0 : index
    %29 = vector.load %arg11[%c0_23, %c0_24] : memref<512x256xbf16, #tpu.memory_space<vmem>>, vector<512x256xbf16>
    %cst_25 = arith.constant dense<0.000000e+00> : vector<8x256xf32>
    %30 = tpu.matmul %28, %29, %cst_25 {dimension_numbers = #tpu.dot_dimension_numbers<[1], [0], [0], [1], [0, 0, 1, 1], [], []>} : vector<8x512xbf16>, vector<512x256xbf16>, vector<8x256xf32> -> vector<8x256xf32>
    %c0_26 = arith.constant 0 : index
    %c0_27 = arith.constant 0 : index
    %31 = vector.load %arg12[%c0_26, %c0_27] : memref<1x256xf32, #tpu.memory_space<vmem>>, vector<1x256xf32>
    %32 = vector.broadcast %31 : vector<1x256xf32> to vector<8x256xf32>
    %33 = arith.addf %30, %32 : vector<8x256xf32>
    %34 = vector.extract_strided_slice %33 {offsets = [0, 0], sizes = [8, 128], strides = [1, 1]} : vector<8x256xf32> to vector<8x128xf32>
    %35 = vector.extract_strided_slice %33 {offsets = [0, 128], sizes = [8, 128], strides = [1, 1]} : vector<8x256xf32> to vector<8x128xf32>
    %c0_28 = arith.constant 0 : index
    %c0_29 = arith.constant 0 : index
    %36 = vector.load %arg3[%c0_28, %c0_29] : memref<8x128xf32, #tpu.memory_space<vmem>>, vector<8x128xf32>
    %cst_30 = arith.constant 5.000000e-01 : f32
    %37 = vector.broadcast %cst_30 : f32 to vector<8x128xf32>
    %38 = arith.mulf %37, %35 : vector<8x128xf32>
    %39 = math.exp %38 : vector<8x128xf32>
    %40 = arith.mulf %36, %39 : vector<8x128xf32>
    %41 = arith.addf %40, %34 : vector<8x128xf32>
    %42 = arith.truncf %41 : vector<8x128xf32> to vector<8x128xbf16>
    %c0_31 = arith.constant 0 : index
    %c0_32 = arith.constant 0 : index
    %43 = vector.load %arg13[%c0_31, %c0_32] : memref<128x512xbf16, #tpu.memory_space<vmem>>, vector<128x512xbf16>
    %cst_33 = arith.constant dense<0.000000e+00> : vector<8x512xf32>
    %44 = tpu.matmul %42, %43, %cst_33 {dimension_numbers = #tpu.dot_dimension_numbers<[1], [0], [0], [1], [0, 0, 1, 1], [], []>} : vector<8x128xbf16>, vector<128x512xbf16>, vector<8x512xf32> -> vector<8x512xf32>
    %c0_34 = arith.constant 0 : index
    %c0_35 = arith.constant 0 : index
    %45 = vector.load %arg14[%c0_34, %c0_35] : memref<128x512xbf16, #tpu.memory_space<vmem>>, vector<128x512xbf16>
    %cst_36 = arith.constant dense<0.000000e+00> : vector<8x512xf32>
    %46 = tpu.matmul %1, %45, %cst_36 {dimension_numbers = #tpu.dot_dimension_numbers<[1], [0], [0], [1], [0, 0, 1, 1], [], []>} : vector<8x128xbf16>, vector<128x512xbf16>, vector<8x512xf32> -> vector<8x512xf32>
    %47 = arith.addf %44, %46 : vector<8x512xf32>
    %c0_37 = arith.constant 0 : index
    %c0_38 = arith.constant 0 : index
    %48 = vector.load %arg15[%c0_37, %c0_38] : memref<1x512xf32, #tpu.memory_space<vmem>>, vector<1x512xf32>
    %49 = vector.broadcast %48 : vector<1x512xf32> to vector<8x512xf32>
    %50 = arith.addf %47, %49 : vector<8x512xf32>
    %cst_39 = arith.constant 0.000000e+00 : f32
    %51 = vector.broadcast %cst_39 : f32 to vector<8x512xf32>
    %52 = arith.maximumf %50, %51 : vector<8x512xf32>
    %53 = arith.truncf %52 : vector<8x512xf32> to vector<8x512xbf16>
    %c0_40 = arith.constant 0 : index
    %c0_41 = arith.constant 0 : index
    %54 = vector.load %arg16[%c0_40, %c0_41] : memref<512x512xbf16, #tpu.memory_space<vmem>>, vector<512x512xbf16>
    %cst_42 = arith.constant dense<0.000000e+00> : vector<8x512xf32>
    %55 = tpu.matmul %53, %54, %cst_42 {dimension_numbers = #tpu.dot_dimension_numbers<[1], [0], [0], [1], [0, 0, 1, 1], [], []>} : vector<8x512xbf16>, vector<512x512xbf16>, vector<8x512xf32> -> vector<8x512xf32>
    %c0_43 = arith.constant 0 : index
    %c0_44 = arith.constant 0 : index
    %56 = vector.load %arg17[%c0_43, %c0_44] : memref<1x512xf32, #tpu.memory_space<vmem>>, vector<1x512xf32>
    %57 = vector.broadcast %56 : vector<1x512xf32> to vector<8x512xf32>
    %58 = arith.addf %55, %57 : vector<8x512xf32>
    %cst_45 = arith.constant 0.000000e+00 : f32
    %59 = vector.broadcast %cst_45 : f32 to vector<8x512xf32>
    %60 = arith.maximumf %58, %59 : vector<8x512xf32>
    %61 = arith.truncf %60 : vector<8x512xf32> to vector<8x512xbf16>
    %c0_46 = arith.constant 0 : index
    %c0_47 = arith.constant 0 : index
    %62 = vector.load %arg18[%c0_46, %c0_47] : memref<512x512xbf16, #tpu.memory_space<vmem>>, vector<512x512xbf16>
    %cst_48 = arith.constant dense<0.000000e+00> : vector<8x512xf32>
    %63 = tpu.matmul %61, %62, %cst_48 {dimension_numbers = #tpu.dot_dimension_numbers<[1], [0], [0], [1], [0, 0, 1, 1], [], []>} : vector<8x512xbf16>, vector<512x512xbf16>, vector<8x512xf32> -> vector<8x512xf32>
    %c0_49 = arith.constant 0 : index
    %c0_50 = arith.constant 0 : index
    %64 = vector.load %arg19[%c0_49, %c0_50] : memref<1x512xf32, #tpu.memory_space<vmem>>, vector<1x512xf32>
    %65 = vector.broadcast %64 : vector<1x512xf32> to vector<8x512xf32>
    %66 = arith.addf %63, %65 : vector<8x512xf32>
    %cst_51 = arith.constant 0.000000e+00 : f32
    %67 = vector.broadcast %cst_51 : f32 to vector<8x512xf32>
    %68 = arith.maximumf %66, %67 : vector<8x512xf32>
    %69 = arith.truncf %68 : vector<8x512xf32> to vector<8x512xbf16>
    %c0_52 = arith.constant 0 : index
    %c0_53 = arith.constant 0 : index
    %70 = vector.load %arg20[%c0_52, %c0_53] : memref<512x896xbf16, #tpu.memory_space<vmem>>, vector<512x896xbf16>
    %cst_54 = arith.constant dense<0.000000e+00> : vector<8x896xf32>
    %71 = tpu.matmul %69, %70, %cst_54 {dimension_numbers = #tpu.dot_dimension_numbers<[1], [0], [0], [1], [0, 0, 1, 1], [], []>} : vector<8x512xbf16>, vector<512x896xbf16>, vector<8x896xf32> -> vector<8x896xf32>
    %c0_55 = arith.constant 0 : index
    %c0_56 = arith.constant 0 : index
    %72 = vector.load %arg21[%c0_55, %c0_56] : memref<1x896xf32, #tpu.memory_space<vmem>>, vector<1x896xf32>
    %73 = vector.broadcast %72 : vector<1x896xf32> to vector<8x896xf32>
    %74 = arith.addf %71, %73 : vector<8x896xf32>
    %cst_57 = arith.constant 0.000000e+00 : f32
    %75 = vector.broadcast %cst_57 : f32 to vector<8x896xf32>
    %76 = arith.subf %75, %74 : vector<8x896xf32>
    %77 = math.exp %76 : vector<8x896xf32>
    %cst_58 = arith.constant 1.000000e+00 : f32
    %78 = vector.broadcast %cst_58 : f32 to vector<8x896xf32>
    %79 = arith.addf %78, %77 : vector<8x896xf32>
    %80 = tpu.reciprocal %79 : vector<8x896xf32> -> vector<8x896xf32>
    %c0_59 = arith.constant 0 : index
    %c0_60 = arith.constant 0 : index
    %81 = vector.load %arg22[%c0_59, %c0_60] : memref<8x896xf32, #tpu.memory_space<vmem>>, vector<8x896xf32>
    tpu.vector_store %arg22[%c0_59, %c0_60], %80 {strides = array<i32>} : memref<8x896xf32, #tpu.memory_space<vmem>>, vector<8x896xf32>,
    %c0_61 = arith.constant 0 : index
    %c0_62 = arith.constant 0 : index
    %82 = vector.load %arg23[%c0_61, %c0_62] : memref<8x128xf32, #tpu.memory_space<vmem>>, vector<8x128xf32>
    tpu.vector_store %arg23[%c0_61, %c0_62], %34 {strides = array<i32>} : memref<8x128xf32, #tpu.memory_space<vmem>>, vector<8x128xf32>,
    %c0_63 = arith.constant 0 : index
    %c0_64 = arith.constant 0 : index
    %83 = vector.load %arg24[%c0_63, %c0_64] : memref<8x128xf32, #tpu.memory_space<vmem>>, vector<8x128xf32>
    tpu.vector_store %arg24[%c0_63, %c0_64], %35 {strides = array<i32>} : memref<8x128xf32, #tpu.memory_space<vmem>>, vector<8x128xf32>,
    return
  }
  func.func @transform_0(%arg0: i32) -> (i32, i32) {
    %c0_i32 = arith.constant 0 : i32
    %c0_i32_0 = arith.constant 0 : i32
    return %arg0, %c0_i32 : i32, i32
  }
  func.func @transform_1(%arg0: i32) -> (i32, i32) {
    %c0_i32 = arith.constant 0 : i32
    %c0_i32_0 = arith.constant 0 : i32
    return %arg0, %c0_i32 : i32, i32
  }
  func.func @transform_2(%arg0: i32) -> (i32, i32) {
    %c0_i32 = arith.constant 0 : i32
    %c0_i32_0 = arith.constant 0 : i32
    return %arg0, %c0_i32 : i32, i32
  }
  func.func @transform_3(%arg0: i32) -> (i32, i32) {
    %c0_i32 = arith.constant 0 : i32
    %c0_i32_0 = arith.constant 0 : i32
    %c0_i32_1 = arith.constant 0 : i32
    return %c0_i32, %c0_i32_0 : i32, i32
  }
  func.func @transform_4(%arg0: i32) -> (i32, i32) {
    %c0_i32 = arith.constant 0 : i32
    %c0_i32_0 = arith.constant 0 : i32
    %c0_i32_1 = arith.constant 0 : i32
    return %c0_i32, %c0_i32_0 : i32, i32
  }
  func.func @transform_5(%arg0: i32) -> (i32, i32) {
    %c0_i32 = arith.constant 0 : i32
    %c0_i32_0 = arith.constant 0 : i32
    %c0_i32_1 = arith.constant 0 : i32
    return %c0_i32, %c0_i32_0 : i32, i32
  }
  func.func @transform_6(%arg0: i32) -> (i32, i32) {
    %c0_i32 = arith.constant 0 : i32
    %c0_i32_0 = arith.constant 0 : i32
    %c0_i32_1 = arith.constant 0 : i32
    return %c0_i32, %c0_i32_0 : i32, i32
  }
  func.func @transform_7(%arg0: i32) -> (i32, i32) {
    %c0_i32 = arith.constant 0 : i32
    %c0_i32_0 = arith.constant 0 : i32
    %c0_i32_1 = arith.constant 0 : i32
    return %c0_i32, %c0_i32_0 : i32, i32
  }
  func.func @transform_8(%arg0: i32) -> (i32, i32) {
    %c0_i32 = arith.constant 0 : i32
    %c0_i32_0 = arith.constant 0 : i32
    %c0_i32_1 = arith.constant 0 : i32
    return %c0_i32, %c0_i32_0 : i32, i32
  }
  func.func @transform_9(%arg0: i32) -> (i32, i32) {
    %c0_i32 = arith.constant 0 : i32
    %c0_i32_0 = arith.constant 0 : i32
    %c0_i32_1 = arith.constant 0 : i32
    return %c0_i32, %c0_i32_0 : i32, i32
  }
  func.func @transform_10(%arg0: i32) -> (i32, i32) {
    %c0_i32 = arith.constant 0 : i32
    %c0_i32_0 = arith.constant 0 : i32
    %c0_i32_1 = arith.constant 0 : i32
    return %c0_i32, %c0_i32_0 : i32, i32
  }
  func.func @transform_11(%arg0: i32) -> (i32, i32) {
    %c0_i32 = arith.constant 0 : i32
    %c0_i32_0 = arith.constant 0 : i32
    %c0_i32_1 = arith.constant 0 : i32
    return %c0_i32, %c0_i32_0 : i32, i32
  }
  func.func @transform_12(%arg0: i32) -> (i32, i32) {
    %c0_i32 = arith.constant 0 : i32
    %c0_i32_0 = arith.constant 0 : i32
    %c0_i32_1 = arith.constant 0 : i32
    return %c0_i32, %c0_i32_0 : i32, i32
  }
  func.func @transform_13(%arg0: i32) -> (i32, i32) {
    %c0_i32 = arith.constant 0 : i32
    %c0_i32_0 = arith.constant 0 : i32
    %c0_i32_1 = arith.constant 0 : i32
    return %c0_i32, %c0_i32_0 : i32, i32
  }
  func.func @transform_14(%arg0: i32) -> (i32, i32) {
    %c0_i32 = arith.constant 0 : i32
    %c0_i32_0 = arith.constant 0 : i32
    %c0_i32_1 = arith.constant 0 : i32
    return %c0_i32, %c0_i32_0 : i32, i32
  }
  func.func @transform_15(%arg0: i32) -> (i32, i32) {
    %c0_i32 = arith.constant 0 : i32
    %c0_i32_0 = arith.constant 0 : i32
    %c0_i32_1 = arith.constant 0 : i32
    return %c0_i32, %c0_i32_0 : i32, i32
  }
  func.func @transform_16(%arg0: i32) -> (i32, i32) {
    %c0_i32 = arith.constant 0 : i32
    %c0_i32_0 = arith.constant 0 : i32
    %c0_i32_1 = arith.constant 0 : i32
    return %c0_i32, %c0_i32_0 : i32, i32
  }
  func.func @transform_17(%arg0: i32) -> (i32, i32) {
    %c0_i32 = arith.constant 0 : i32
    %c0_i32_0 = arith.constant 0 : i32
    %c0_i32_1 = arith.constant 0 : i32
    return %c0_i32, %c0_i32_0 : i32, i32
  }
  func.func @transform_18(%arg0: i32) -> (i32, i32) {
    %c0_i32 = arith.constant 0 : i32
    %c0_i32_0 = arith.constant 0 : i32
    %c0_i32_1 = arith.constant 0 : i32
    return %c0_i32, %c0_i32_0 : i32, i32
  }
  func.func @transform_19(%arg0: i32) -> (i32, i32) {
    %c0_i32 = arith.constant 0 : i32
    %c0_i32_0 = arith.constant 0 : i32
    %c0_i32_1 = arith.constant 0 : i32
    return %c0_i32, %c0_i32_0 : i32, i32
  }
  func.func @transform_20(%arg0: i32) -> (i32, i32) {
    %c0_i32 = arith.constant 0 : i32
    %c0_i32_0 = arith.constant 0 : i32
    %c0_i32_1 = arith.constant 0 : i32
    return %c0_i32, %c0_i32_0 : i32, i32
  }
  func.func @transform_21(%arg0: i32) -> (i32, i32) {
    %c0_i32 = arith.constant 0 : i32
    %c0_i32_0 = arith.constant 0 : i32
    return %arg0, %c0_i32 : i32, i32
  }
  func.func @transform_22(%arg0: i32) -> (i32, i32) {
    %c0_i32 = arith.constant 0 : i32
    %c0_i32_0 = arith.constant 0 : i32
    return %arg0, %c0_i32 : i32, i32
  }
  func.func @transform_23(%arg0: i32) -> (i32, i32) {
    %c0_i32 = arith.constant 0 : i32
    %c0_i32_0 = arith.constant 0 : i32
    return %arg0, %c0_i32 : i32, i32
  }
}

</mosaic_0001>

<bundles_post_ra>
// kernel: cvae_forward.1
= control target key start
LH: loop header
LB: loop body
LE: loop exit
PB: predicated region body
PF: predicated region fallthrough
CT: control target
= control target key end

     0   :  { %s12757_s0 = inlined_call_operand.vmem [shape: bf16[8,896], index: 0, kind: input, shape index: {}]   ;;  %s12758_s1 = inlined_call_operand.vmem [shape: bf16[8,128], index: 1, kind: input, shape index: {}]   ;;  %s12759_s2 = inlined_call_operand.vmem [shape: f32[8,128], index: 2, kind: input, shape index: {}]   ;;  %s12760_s3 = inlined_call_operand.hbm [shape: bf16[896,512], index: 3, kind: input, shape index: {}]   ;;  %s12761_s4 = inlined_call_operand.hbm [shape: bf16[128,512], index: 4, kind: input, shape index: {}]   ;;  %s12762_s5 = inlined_call_operand.vmem [shape: f32[1,512], index: 5, kind: input, shape index: {}]   ;;  %s12763_s6 = inlined_call_operand.hbm [shape: bf16[512,512], index: 6, kind: input, shape index: {}]   ;;  %s12764_s7 = inlined_call_operand.vmem [shape: f32[1,512], index: 7, kind: input, shape index: {}]   ;;  %s12765_s8 = inlined_call_operand.hbm [shape: bf16[512,512], index: 8, kind: input, shape index: {}]   ;;  %s12766_s9 = inlined_call_operand.vmem [shape: f32[1,512], index: 9, kind: input, shape index: {}]   ;;  %s12767_s10 = inlined_call_operand.hbm [shape: bf16[512,256], index: 10, kind: input, shape index: {}]   ;;  %s12768_s11 = inlined_call_operand.vmem [shape: f32[1,256], index: 11, kind: input, shape index: {}]   ;;  %s12769_s12 = inlined_call_operand.hbm [shape: bf16[128,512], index: 12, kind: input, shape index: {}]   ;;  %s12770_s13 = inlined_call_operand.hbm [shape: bf16[128,512], index: 13, kind: input, shape index: {}]   ;;  %s12771_s14 = inlined_call_operand.vmem [shape: f32[1,512], index: 14, kind: input, shape index: {}]   ;;  %s12772_s15 = inlined_call_operand.hbm [shape: bf16[512,512], index: 15, kind: input, shape index: {}]   ;;  %s12773_s16 = inlined_call_operand.vmem [shape: f32[1,512], index: 16, kind: input, shape index: {}]   ;;  %s12774_s17 = inlined_call_operand.hbm [shape: bf16[512,512], index: 17, kind: input, shape index: {}]   ;;  %s12775_s18 = inlined_call_operand.vmem [shape: f32[1,512], index: 18, kind: input, shape index: {}]   ;;  %s12776_s19 = inlined_call_operand.hbm [shape: bf16[512,896], index: 19, kind: input, shape index: {}]   ;;  %s12777_s20 = inlined_call_operand.vmem [shape: f32[1,896], index: 20, kind: input, shape index: {}]   ;;  %s12778_s21 = inlined_call_operand.vmem [shape: f32[8,896], index: 21, kind: output, shape index: {0}]   ;;  %s12779_s22 = inlined_call_operand.vmem [shape: f32[8,128], index: 22, kind: output, shape index: {1}]   ;;  %s12780_s23 = inlined_call_operand.vmem [shape: f32[8,128], index: 23, kind: output, shape index: {2}]  }
   0x1   :  { %12787 = sst [smem:[#allocation24_spill]] %s12757_s0 }
   0x2   :  { %12788 = sst [smem:[#allocation25_spill]] %s12758_s1 }
   0x3   :  { %12789 = sst [smem:[#allocation26_spill]] %s12759_s2 }
   0x4   :  { %12790 = sst [smem:[#allocation27_spill]] %s12760_s3 }
   0x5   :  { %12791 = sst [smem:[#allocation28_spill]] %s12761_s4 }
   0x6   :  { %12792 = sst [smem:[#allocation29_spill]] %s12762_s5 }
   0x7   :  { %12793 = sst [smem:[#allocation30_spill]] %s12763_s6 }
   0x8   :  { %12794 = sst [smem:[#allocation31_spill]] %s12764_s7 }
   0x9   :  { %12795 = sst [smem:[#allocation32_spill]] %s12778_s21 }
   0xa   :  { %29 = vsyncpa [#allocation3], 0 }
   0xb   :  { %30 = vsyncpa [#allocation5], 0 }
   0xc   :  { %31 = vsyncpa [#allocation8], 0 }
   0xd   :  { %32 = vsyncpa [#allocation11], 0 }
   0xe   :  { %33 = vsyncpa [#allocation14], 0 }
   0xf   :  { %34 = vsyncpa [#allocation17], 0  ;;  %s12160_s4 = smov [#allocation4]   ;;  %s12161_s24 = smov [#allocation7]  }
  0x10   :  { %s58_s30 = sshll.u32 %s12160_s4, 4  ;;  %s86_s25 = sshll.u32 %s12161_s24, 4  ;;  %s59_s30 = int_to_ptr.vmem [resolvable:$true] %s58_s30  ;;  %s12297_s25 = int_to_ptr.vmem [resolvable:$true] %s86_s25 }
  0x11   :  { %s12796_s26 = sld [smem:[#allocation28_spill]] }
  0x17   :  { %s11928_s2 = scalar_lea.hbm %s12796_s26, 4096 }
  0x18   :  { %p11929_p0 = scmp.ne.s32.totalorder %s12796_s26, %s11928_s2  ;;  %p11932_p1 = scmp.lt.u32.totalorder %s11928_s2, %s12796_s26 }
  0x1a   :  { %p11934_p2 = pnand %p11932_p1, %p11929_p0 }
  0x1c   :  { %11937 = shalt.err (!%p11934_p2)
}
  0x1d   :  { %s11938_s29 = scalar_lea.vmem %s59_s30, 4096  ;;  %p11943_p4 = scmp.lt.s32.totalorder %s59_s30, %s59_s30 }
  0x1e   :  { %p11939_p3 = scmp.ne.s32.totalorder %s59_s30, %s11938_s29  ;;  %p11944_p5 = scmp.lt.s32.totalorder %s11938_s29, %s11938_s29 }
  0x20   :  { %p11945_p6 = por %p11944_p5, %p11943_p4 }
  0x22   :  { %p11946_p7 = pnand %p11945_p6, %p11939_p3 }
  0x24   :  { %11949 = shalt.err (!%p11946_p7)
}
  0x25   :  { %s12162_s3 = smov 256   ;;  %s12163_s0 = smov 16  }
  0x26   :  { %64 = dma.hbm_to_vmem [thread:$0]  %s12796_s26, 4096, %s59_s30, [#allocation5], %s12162_s3, %s12162_s3, %s12163_s0  }
  0x27   :  { %s11950_s2 = scalar_lea.hbm %s12765_s8, 16384 }
  0x28   :  { %p11951_p8 = scmp.ne.s32.totalorder %s12765_s8, %s11950_s2  ;;  %p11954_p9 = scmp.lt.u32.totalorder %s11950_s2, %s12765_s8 }
  0x2a   :  { %p11956_p10 = pnand %p11954_p9, %p11951_p8 }
  0x2c   :  { %11959 = shalt.err (!%p11956_p10)
}
  0x2d   :  { %s11960_s29 = scalar_lea.vmem %s12297_s25, 16384  ;;  %p11965_p12 = scmp.lt.s32.totalorder %s12297_s25, %s12297_s25 }
  0x2e   :  { %p11961_p11 = scmp.ne.s32.totalorder %s12297_s25, %s11960_s29  ;;  %p11966_p13 = scmp.lt.s32.totalorder %s11960_s29, %s11960_s29 }
  0x30   :  { %p11967_p0 = por %p11966_p13, %p11965_p12 }
  0x32   :  { %p11968_p1 = pnand %p11967_p0, %p11961_p11 }
  0x34   :  { %11971 = shalt.err (!%p11968_p1)
}
  0x35   :  { %92 = dma.hbm_to_vmem [thread:$0]  %s12765_s8, 16384, %s12297_s25, [#allocation8], %s12162_s3, %s12162_s3, %s12163_s0  }
  0x36   :  { %s12164_s4 = smov [#allocation10]   ;;  %s12165_s5 = smov [#allocation13]  }
  0x37   :  { %s114_s24 = sshll.u32 %s12164_s4, 4  ;;  %s140_s1 = sshll.u32 %s12165_s5, 4  ;;  %s115_s24 = int_to_ptr.vmem [resolvable:$true] %s114_s24  ;;  %s12334_s1 = int_to_ptr.vmem [resolvable:$true] %s140_s1 }
  0x38   :  { %s11972_s27 = scalar_lea.hbm %s12769_s12, 4096 }
  0x39   :  { %p11973_p2 = scmp.ne.s32.totalorder %s12769_s12, %s11972_s27  ;;  %p11976_p3 = scmp.lt.u32.totalorder %s11972_s27, %s12769_s12 }
  0x3b   :  { %p11978_p4 = pnand %p11976_p3, %p11973_p2 }
  0x3d   :  { %11981 = shalt.err (!%p11978_p4)
}
  0x3e   :  { %s11982_s8 = scalar_lea.vmem %s115_s24, 4096  ;;  %p11987_p6 = scmp.lt.s32.totalorder %s115_s24, %s115_s24 }
  0x3f   :  { %p11983_p5 = scmp.ne.s32.totalorder %s115_s24, %s11982_s8  ;;  %p11988_p7 = scmp.lt.s32.totalorder %s11982_s8, %s11982_s8 }
  0x41   :  { %p11989_p8 = por %p11988_p7, %p11987_p6 }
  0x43   :  { %p11990_p9 = pnand %p11989_p8, %p11983_p5 }
  0x45   :  { %11993 = shalt.err (!%p11990_p9)
}
  0x46   :  { %120 = dma.hbm_to_vmem [thread:$0]  %s12769_s12, 4096, %s115_s24, [#allocation11], %s12162_s3, %s12162_s3, %s12163_s0  }
  0x47   :  { %s11994_s21 = scalar_lea.hbm %s12772_s15, 16384 }
  0x48   :  { %p11995_p10 = scmp.ne.s32.totalorder %s12772_s15, %s11994_s21  ;;  %p11998_p11 = scmp.lt.u32.totalorder %s11994_s21, %s12772_s15 }
  0x4a   :  { %p12000_p12 = pnand %p11998_p11, %p11995_p10 }
  0x4c   :  { %12003 = shalt.err (!%p12000_p12)
}
  0x4d   :  { %s12004_s7 = scalar_lea.vmem %s12334_s1, 16384  ;;  %p12009_p0 = scmp.lt.s32.totalorder %s12334_s1, %s12334_s1 }
  0x4e   :  { %p12005_p13 = scmp.ne.s32.totalorder %s12334_s1, %s12004_s7  ;;  %p12010_p1 = scmp.lt.s32.totalorder %s12004_s7, %s12004_s7 }
  0x50   :  { %p12011_p2 = por %p12010_p1, %p12009_p0 }
  0x52   :  { %p12012_p3 = pnand %p12011_p2, %p12005_p13 }
  0x54   :  { %12015 = shalt.err (!%p12012_p3)
}
  0x55   :  { %146 = dma.hbm_to_vmem [thread:$0]  %s12772_s15, 16384, %s12334_s1, [#allocation14], %s12162_s3, %s12162_s3, %s12163_s0  }
  0x56   :  { %s12166_s28 = smov [#allocation2]   ;;  %s12167_s8 = smov [#allocation6]  }
  0x57   :  { %s46_s29 = sshll.u32 %s12166_s28, 4  ;;  %s72_s25 = sshll.u32 %s12167_s8, 4  ;;  %s47_s29 = int_to_ptr.vmem [resolvable:$true] %s46_s29  ;;  %s12371_s25 = int_to_ptr.vmem [resolvable:$true] %s72_s25 }
  0x58   :  { %s12797_s4 = sld [smem:[#allocation27_spill]] }
  0x5e   :  { %s12016_s21 = scalar_lea.hbm %s12797_s4, 28672 }
  0x5f   :  { %p12017_p4 = scmp.ne.s32.totalorder %s12797_s4, %s12016_s21  ;;  %p12020_p5 = scmp.lt.u32.totalorder %s12016_s21, %s12797_s4 }
  0x61   :  { %p12022_p6 = pnand %p12020_p5, %p12017_p4 }
  0x63   :  { %12025 = shalt.err (!%p12022_p6)
}
  0x64   :  { %s12026_s15 = scalar_lea.vmem %s47_s29, 28672  ;;  %p12031_p8 = scmp.lt.s32.totalorder %s47_s29, %s47_s29 }
  0x65   :  { %p12027_p7 = scmp.ne.s32.totalorder %s47_s29, %s12026_s15  ;;  %p12032_p9 = scmp.lt.s32.totalorder %s12026_s15, %s12026_s15 }
  0x67   :  { %p12033_p10 = por %p12032_p9, %p12031_p8 }
  0x69   :  { %p12034_p11 = pnand %p12033_p10, %p12027_p7 }
  0x6b   :  { %12037 = shalt.err (!%p12034_p11)
}
  0x6c   :  { %52 = dma.hbm_to_vmem [thread:$0]  %s12797_s4, 28672, %s47_s29, [#allocation3], %s12162_s3, %s12162_s3, %s12163_s0  }
  0x6d   :  { %s12798_s28 = sld [smem:[#allocation30_spill]] }
  0x73   :  { %s12038_s8 = scalar_lea.hbm %s12798_s28, 16384 }
  0x74   :  { %p12039_p12 = scmp.ne.s32.totalorder %s12798_s28, %s12038_s8  ;;  %p12042_p13 = scmp.lt.u32.totalorder %s12038_s8, %s12798_s28 }
  0x76   :  { %p12044_p0 = pnand %p12042_p13, %p12039_p12 }
  0x78   :  { %12047 = shalt.err (!%p12044_p0)
}
  0x79   :  { %s12048_s2 = scalar_lea.vmem %s12371_s25, 16384  ;;  %p12053_p2 = scmp.lt.s32.totalorder %s12371_s25, %s12371_s25 }
  0x7a   :  { %p12049_p1 = scmp.ne.s32.totalorder %s12371_s25, %s12048_s2  ;;  %p12054_p3 = scmp.lt.s32.totalorder %s12048_s2, %s12048_s2 }
  0x7c   :  { %p12055_p4 = por %p12054_p3, %p12053_p2 }
  0x7e   :  { %p12056_p5 = pnand %p12055_p4, %p12049_p1 }
  0x80   :  { %12059 = shalt.err (!%p12056_p5)
}
  0x81   :  { %78 = dma.hbm_to_vmem [thread:$0]  %s12798_s28, 16384, %s12371_s25, [#allocation5], %s12162_s3, %s12162_s3, %s12163_s0  }
  0x82   :  { %s12168_s6 = smov [#allocation9]   ;;  %s12060_s7 = scalar_lea.hbm %s12767_s10, 8192 }
  0x83   :  { %s100_s27 = sshll.u32 %s12168_s6, 4  ;;  %p12061_p6 = scmp.ne.s32.totalorder %s12767_s10, %s12060_s7  ;;  %s101_s27 = int_to_ptr.vmem [resolvable:$true] %s100_s27 }
  0x84   :  { %p12064_p7 = scmp.lt.u32.totalorder %s12060_s7, %s12767_s10 }
  0x86   :  { %p12066_p8 = pnand %p12064_p7, %p12061_p6 }
  0x88   :  { %12069 = shalt.err (!%p12066_p8)
}
  0x89   :  { %s12070_s26 = scalar_lea.vmem %s101_s27, 8192  ;;  %p12075_p10 = scmp.lt.s32.totalorder %s101_s27, %s101_s27 }
  0x8a   :  { %p12071_p9 = scmp.ne.s32.totalorder %s101_s27, %s12070_s26  ;;  %p12076_p11 = scmp.lt.s32.totalorder %s12070_s26, %s12070_s26 }
  0x8c   :  { %p12077_p12 = por %p12076_p11, %p12075_p10 }
  0x8e   :  { %p12078_p13 = pnand %p12077_p12, %p12071_p9 }
  0x90   :  { %12081 = shalt.err (!%p12078_p13)
}
  0x91   :  { %s12169_s25 = smov 128   ;;  %s12170_s28 = smov 8  }
  0x92   :  { %106 = dma.hbm_to_vmem [thread:$0]  %s12767_s10, 8192, %s101_s27, [#allocation8], %s12169_s25, %s12169_s25, %s12170_s28  }
  0x93   :  { %s12171_s2 = smov [#allocation12]   ;;  %s12172_s4 = smov [#allocation15]  }
  0x94   :  { %s126_s29 = sshll.u32 %s12171_s2, 4  ;;  %s154_s6 = sshll.u32 %s12172_s4, 4  ;;  %s127_s29 = int_to_ptr.vmem [resolvable:$true] %s126_s29  ;;  %s155_s6 = int_to_ptr.vmem [resolvable:$true] %s154_s6 }
  0x95   :  { %s12082_s7 = scalar_lea.hbm %s12770_s13, 4096 }
  0x96   :  { %p12083_p0 = scmp.ne.s32.totalorder %s12770_s13, %s12082_s7  ;;  %p12086_p1 = scmp.lt.u32.totalorder %s12082_s7, %s12770_s13 }
  0x98   :  { %p12088_p2 = pnand %p12086_p1, %p12083_p0 }
  0x9a   :  { %12091 = shalt.err (!%p12088_p2)
}
  0x9b   :  { %s12092_s10 = scalar_lea.vmem %s127_s29, 4096  ;;  %p12097_p4 = scmp.lt.s32.totalorder %s127_s29, %s127_s29 }
  0x9c   :  { %p12093_p3 = scmp.ne.s32.totalorder %s127_s29, %s12092_s10  ;;  %p12098_p5 = scmp.lt.s32.totalorder %s12092_s10, %s12092_s10 }
  0x9e   :  { %p12099_p6 = por %p12098_p5, %p12097_p4 }
  0xa0   :  { %p12100_p7 = pnand %p12099_p6, %p12093_p3 }
  0xa2   :  { %12103 = shalt.err (!%p12100_p7)
}
  0xa3   :  { %132 = dma.hbm_to_vmem [thread:$0]  %s12770_s13, 4096, %s127_s29, [#allocation11], %s12162_s3, %s12162_s3, %s12163_s0  }
  0xa4   :  { %s12104_s21 = scalar_lea.hbm %s12774_s17, 16384 }
  0xa5   :  { %p12105_p8 = scmp.ne.s32.totalorder %s12774_s17, %s12104_s21  ;;  %p12108_p9 = scmp.lt.u32.totalorder %s12104_s21, %s12774_s17 }
  0xa7   :  { %p12110_p10 = pnand %p12108_p9, %p12105_p8 }
  0xa9   :  { %12113 = shalt.err (!%p12110_p10)
}
  0xaa   :  { %s12114_s1 = scalar_lea.vmem %s155_s6, 16384  ;;  %p12119_p12 = scmp.lt.s32.totalorder %s155_s6, %s155_s6 }
  0xab   :  { %p12115_p11 = scmp.ne.s32.totalorder %s155_s6, %s12114_s1  ;;  %p12120_p13 = scmp.lt.s32.totalorder %s12114_s1, %s12114_s1 }
  0xad   :  { %p12121_p0 = por %p12120_p13, %p12119_p12 }
  0xaf   :  { %p12122_p1 = pnand %p12121_p0, %p12115_p11 }
  0xb1   :  { %12125 = shalt.err (!%p12122_p1)
}
  0xb2   :  { %160 = dma.hbm_to_vmem [thread:$0]  %s12774_s17, 16384, %s155_s6, [#allocation14], %s12162_s3, %s12162_s3, %s12163_s0  }
  0xb3   :  { %s12173_s7 = smov [#allocation16]   ;;  %s12126_s30 = scalar_lea.hbm %s12776_s19, 28672 }
  0xb4   :  { %s168_s12 = sshll.u32 %s12173_s7, 4  ;;  %p12127_p2 = scmp.ne.s32.totalorder %s12776_s19, %s12126_s30  ;;  %s169_s12 = int_to_ptr.vmem [resolvable:$true] %s168_s12 }
  0xb5   :  { %p12130_p3 = scmp.lt.u32.totalorder %s12126_s30, %s12776_s19 }
  0xb7   :  { %p12132_p4 = pnand %p12130_p3, %p12127_p2 }
  0xb9   :  { %12135 = shalt.err (!%p12132_p4)
}
  0xba   :  { %s12136_s28 = scalar_lea.vmem %s169_s12, 28672  ;;  %p12141_p6 = scmp.lt.s32.totalorder %s169_s12, %s169_s12 }
  0xbb   :  { %p12137_p5 = scmp.ne.s32.totalorder %s169_s12, %s12136_s28  ;;  %p12142_p7 = scmp.lt.s32.totalorder %s12136_s28, %s12136_s28 }
  0xbd   :  { %p12143_p8 = por %p12142_p7, %p12141_p6 }
  0xbf   :  { %p12144_p9 = pnand %p12143_p8, %p12137_p5 }
  0xc1   :  { %12147 = shalt.err (!%p12144_p9)
}
  0xc2   :  { %s12174_s17 = smov 448   ;;  %s12175_s3 = smov 28  }
  0xc3   :  { %174 = dma.hbm_to_vmem [thread:$0]  %s12776_s19, 28672, %s169_s12, [#allocation17], %s12174_s17, %s12174_s17, %s12175_s3  }
  0xc4   :  { %12148 = dma.done.wait [#allocation3], 28672  }
  0xc5   :  { %12149 = vsyncadd [#allocation3], 4294938624 }
  0xc6   :  { %12150 = dma.done.wait [#allocation5], 20480  }
  0xc7   :  { %12151 = vsyncadd [#allocation5], 4294946816 }
  0xc8   :  { %12152 = dma.done.wait [#allocation8], 24576  }
  0xc9   :  { %12153 = vsyncadd [#allocation8], 4294942720 }
  0xca   :  { %12154 = dma.done.wait [#allocation11], 8192  }
  0xcb   :  { %12155 = vsyncadd [#allocation11], 4294959104 }
  0xcc   :  { %12156 = dma.done.wait [#allocation14], 32768  }
  0xcd   :  { %12157 = vsyncadd [#allocation14], 4294934528 }
  0xce   :  { %12158 = dma.done.wait [#allocation17], 28672  }
  0xcf   :  { %12159 = vsyncadd [#allocation17], 4294938624  ;;  %v12176_v0 = vmov 0   ;;  %v10226_v1 = vld [vmem:[#allocation4 + $0x4] ss:$16 sps:$4 sm:$0xff]   ;;  %s12799_s5 = sld [smem:[#allocation25_spill]] }
  0xd0   :  { %661 = vmatprep.mubr.bf16.mxu1 %v12176_v0  ;;  %v10228_v2 = vld [vmem:[#allocation2 + $0x4] ss:$16 sps:$4 sm:$0xff]   ;;  %629 = vmatprep.subr.bf16.mxu1 %v10226_v1  ;;  %v10230_v3 = vld [vmem:[#allocation4] ss:$16 sps:$4 sm:$0xff]   ;;  %v10276_v33 = vld [vmem:[#allocation4 + $0xc] ss:$16 sps:$4 sm:$0xff]  }
  0xd1   :  { %v10231_v4 = vld [vmem:[#allocation2] ss:$16 sps:$4 sm:$0xff]   ;;  %1856 = vmatprep.subr.bf16.mxu0 %v10228_v2  ;;  %v10232_v5 = vld [vmem:[#allocation4 + $0x24] ss:$16 sps:$4 sm:$0xff]   ;;  %630 = vmatpush1.bf16.msra.mxu1 %v10230_v3  ;;  %v10274_v36 = vld [vmem:[#allocation4 + $0x8] ss:$16 sps:$4 sm:$0xff]  }
  0xd2   :  { %1857 = vmatpush1.bf16.msra.mxu0 %v10231_v4  ;;  %v10234_v6 = vld [vmem:[#allocation2 + $0x24] ss:$16 sps:$4 sm:$0xff]   ;;  %v10236_v7 = vld [vmem:[#allocation4 + $0x20] ss:$16 sps:$4 sm:$0xff]   ;;  %631 = vmatprep.subr.bf16.mxu1 %v10232_v5  ;;  %v10282_v38 = vld [vmem:[#allocation4 + $0x2c] ss:$16 sps:$4 sm:$0xff]  }
  0xd3   :  { %v10237_v8 = vld [vmem:[#allocation2 + $0x20] ss:$16 sps:$4 sm:$0xff]   ;;  %1858 = vmatprep.subr.bf16.mxu0 %v10234_v6  ;;  %v10238_v9 = vld [vmem:[#allocation4 + $0x44] ss:$16 sps:$4 sm:$0xff]   ;;  %v10280_v40 = vld [vmem:[#allocation4 + $0x28] ss:$16 sps:$4 sm:$0xff]  }
  0xd4   :  { %v10240_v10 = vld [vmem:[#allocation2 + $0x44] ss:$16 sps:$4 sm:$0xff]   ;;  %v10242_v11 = vld [vmem:[#allocation4 + $0x40] ss:$16 sps:$4 sm:$0xff]   ;;  %v10288_v42 = vld [vmem:[#allocation4 + $0x4c] ss:$16 sps:$4 sm:$0xff]  }
  0xd5   :  { %v10243_v12 = vld [vmem:[#allocation2 + $0x40] ss:$16 sps:$4 sm:$0xff]   ;;  %632 = vmatpush1.bf16.msra.mxu1 %v10236_v7  ;;  %v10244_v13 = vld [vmem:[#allocation4 + $0x64] ss:$16 sps:$4 sm:$0xff]   ;;  %v10286_v44 = vld [vmem:[#allocation4 + $0x48] ss:$16 sps:$4 sm:$0xff]  }
  0xd6   :  { %1859 = vmatpush1.bf16.msra.mxu0 %v10237_v8  ;;  %633 = vmatprep.subr.bf16.mxu1 %v10238_v9  ;;  %v10246_v14 = vld [vmem:[#allocation2 + $0x64] ss:$16 sps:$4 sm:$0xff]   ;;  %v10248_v15 = vld [vmem:[#allocation4 + $0x60] ss:$16 sps:$4 sm:$0xff]   ;;  %v10294_v46 = vld [vmem:[#allocation4 + $0x6c] ss:$16 sps:$4 sm:$0xff]  }
  0xd7   :  { %1860 = vmatprep.subr.bf16.mxu0 %v10240_v10  ;;  %v10249_v16 = vld [vmem:[#allocation2 + $0x60] ss:$16 sps:$4 sm:$0xff]   ;;  %v10250_v17 = vld [vmem:[#allocation4 + $0x84] ss:$16 sps:$4 sm:$0xff]   ;;  %s12800_s15 = sld [smem:[#allocation24_spill]]  ;;  %s12801_s10 = sld [smem:[#allocation29_spill]] }
  0xd8   :  { %v10252_v18 = vld [vmem:[#allocation2 + $0x84] ss:$16 sps:$4 sm:$0xff]   ;;  %v10254_v19 = vld [vmem:[#allocation4 + $0x80] ss:$16 sps:$4 sm:$0xff]   ;;  %v10292_v49 = vld [vmem:[#allocation4 + $0x68] ss:$16 sps:$4 sm:$0xff]  }
  0xd9   :  { %634 = vmatpush1.bf16.msra.mxu1 %v10242_v11  ;;  %v10255_v20 = vld [vmem:[#allocation2 + $0x80] ss:$16 sps:$4 sm:$0xff]   ;;  %v10256_v21 = vld [vmem:[#allocation4 + $0xa4] ss:$16 sps:$4 sm:$0xff]   ;;  %v10300_v52 = vld [vmem:[#allocation4 + $0x8c] ss:$16 sps:$4 sm:$0xff]  }
  0xda   :  { %1861 = vmatpush1.bf16.msra.mxu0 %v10243_v12  ;;  %635 = vmatprep.subr.bf16.mxu1 %v10244_v13  ;;  %v10258_v22 = vld [vmem:[#allocation2 + $0xa4] ss:$16 sps:$4 sm:$0xff]   ;;  %v10260_v23 = vld [vmem:[#allocation4 + $0xa0] ss:$16 sps:$4 sm:$0xff]   ;;  %v10298_v54 = vld [vmem:[#allocation4 + $0x88] ss:$16 sps:$4 sm:$0xff]  }
  0xdb   :  { %1862 = vmatprep.subr.bf16.mxu0 %v10246_v14  ;;  %v10261_v24 = vld [vmem:[#allocation2 + $0xa0] ss:$16 sps:$4 sm:$0xff]   ;;  %v10262_v25 = vld [vmem:[#allocation4 + $0xc4] ss:$16 sps:$4 sm:$0xff]   ;;  %v10306_v56 = vld [vmem:[#allocation4 + $0xac] ss:$16 sps:$4 sm:$0xff]  }
  0xdc   :  { %v10264_v26 = vld [vmem:[#allocation2 + $0xc4] ss:$16 sps:$4 sm:$0xff]   ;;  %v10266_v27 = vld [vmem:[#allocation4 + $0xc0] ss:$16 sps:$4 sm:$0xff]   ;;  %v10304_v58 = vld [vmem:[#allocation4 + $0xa8] ss:$16 sps:$4 sm:$0xff]  }
  0xdd   :  { %636 = vmatpush1.bf16.msra.mxu1 %v10248_v15  ;;  %v10267_v28 = vld [vmem:[#allocation2 + $0xc0] ss:$16 sps:$4 sm:$0xff]   ;;  %v10268_v29 = vld [vmem:[#allocation4 + $0xe4] ss:$16 sps:$4 sm:$0xff]   ;;  %v10312_v60 = vld [vmem:[#allocation4 + $0xcc] ss:$16 sps:$4 sm:$0xff]  }
  0xde   :  { %1863 = vmatpush1.bf16.msra.mxu0 %v10249_v16  ;;  %637 = vmatprep.subr.bf16.mxu1 %v10250_v17  ;;  %v10270_v30 = vld [vmem:[#allocation2 + $0xe4] ss:$16 sps:$4 sm:$0xff]   ;;  %v10272_v31 = vld [vmem:[#allocation4 + $0xe0] ss:$16 sps:$4 sm:$0xff]   ;;  %v10310_v62 = vld [vmem:[#allocation4 + $0xc8] ss:$16 sps:$4 sm:$0xff]  }
  0xdf   :  { %1864 = vmatprep.subr.bf16.mxu0 %v10252_v18  ;;  %v10273_v32 = vld [vmem:[#allocation2 + $0xe0] ss:$16 sps:$4 sm:$0xff]   ;;  %v10277_v34 = vld [vmem:[#allocation2 + $0x104] ss:$16 sps:$4 sm:$0xff]   ;;  %v10318_v1 = vld [vmem:[#allocation4 + $0xec] ss:$16 sps:$4 sm:$0xff]  }
  0xe0   :  { %v12466_v35 = vld [vmem:[%s12799_s5] sm:$0xf]  ;;  %v10283_v39 = vld [vmem:[#allocation2 + $0x124] ss:$16 sps:$4 sm:$0xff]   ;;  %v10316_v3 = vld [vmem:[#allocation4 + $0xe8] ss:$16 sps:$4 sm:$0xff]  }
  0xe1   :  { %638 = vmatpush1.bf16.msra.mxu1 %v10254_v19  ;;  %v10279_v37 = vld [vmem:[#allocation2 + $0x100] ss:$16 sps:$4 sm:$0xff]   ;;  %v10289_v43 = vld [vmem:[#allocation2 + $0x144] ss:$16 sps:$4 sm:$0xff]   ;;  %s12802_s25 = sld [smem:[#allocation31_spill]]  ;;  %s12804_s12 = sld [smem:[#allocation32_spill]] }
  0xe2   :  { %1865 = vmatpush1.bf16.msra.mxu0 %v10255_v20  ;;  %639 = vmatprep.subr.bf16.mxu1 %v10256_v21  ;;  %v10285_v41 = vld [vmem:[#allocation2 + $0x120] ss:$16 sps:$4 sm:$0xff]   ;;  %v10295_v47 = vld [vmem:[#allocation2 + $0x164] ss:$16 sps:$4 sm:$0xff]  }
  0xe3   :  { %1866 = vmatprep.subr.bf16.mxu0 %v10258_v22  ;;  %v10291_v45 = vld [vmem:[#allocation2 + $0x140] ss:$16 sps:$4 sm:$0xff]   ;;  %v10301_v53 = vld [vmem:[#allocation2 + $0x184] ss:$16 sps:$4 sm:$0xff]  }
  0xe4   :  { %v208_v48 = vld [vmem:[%s12800_s15] sm:$0xff] }
  0xe5   :  { %640 = vmatpush1.bf16.msra.mxu1 %v10260_v23  ;;  %v10297_v50 = vld [vmem:[#allocation2 + $0x160] ss:$16 sps:$4 sm:$0xff]   ;;  %v12473_v51 = vcombine.high %v208_v48, %v208_v48  ;;  %v10307_v57 = vld [vmem:[#allocation2 + $0x1a4] ss:$16 sps:$4 sm:$0xff]   ;;  %v12476_v7 = vcombine.low %v208_v48, %v208_v48 }
  0xe6   :  { %1867 = vmatpush1.bf16.msra.mxu0 %v10261_v24  ;;  %641 = vmatprep.subr.bf16.mxu1 %v10262_v25  ;;  %v10303_v55 = vld [vmem:[#allocation2 + $0x180] ss:$16 sps:$4 sm:$0xff]   ;;  %v10313_v61 = vld [vmem:[#allocation2 + $0x1c4] ss:$16 sps:$4 sm:$0xff]  }
  0xe7   :  { %1868 = vmatprep.subr.bf16.mxu0 %v10264_v26  ;;  %1888 = vmatprep.mubr.bf16.mxu0 %v12473_v51  ;;  %v10309_v59 = vld [vmem:[#allocation2 + $0x1a0] ss:$16 sps:$4 sm:$0xff]   ;;  %v10319_v2 = vld [vmem:[#allocation2 + $0x1e4] ss:$16 sps:$4 sm:$0xff]  }
  0xe8   :  { %v10315_v63 = vld [vmem:[#allocation2 + $0x1c0] ss:$16 sps:$4 sm:$0xff]   ;;  %v10326_v5 = vld [vmem:[#allocation2 + $0x204] ss:$16 sps:$4 sm:$0xff]  }
  0xe9   :  { %642 = vmatpush1.bf16.msra.mxu1 %v10266_v27  ;;  %v10321_v4 = vld [vmem:[#allocation2 + $0x1e0] ss:$16 sps:$4 sm:$0xff]   ;;  %v10329_v6 = vld [vmem:[#allocation2 + $0x404] ss:$16 sps:$4 sm:$0xff]  }
  0xea   :  { %1869 = vmatpush1.bf16.msra.mxu0 %v10267_v28  ;;  %643 = vmatprep.subr.bf16.mxu1 %v10268_v29  ;;  %v10324_v8 = vld [vmem:[#allocation2 + $0x200] ss:$16 sps:$4 sm:$0xff]   ;;  %v10332_v10 = vld [vmem:[#allocation2 + $0x224] ss:$16 sps:$4 sm:$0xff]  }
  0xeb   :  { %1870 = vmatprep.subr.bf16.mxu0 %v10270_v30  ;;  %v10327_v9 = vld [vmem:[#allocation2 + $0x400] ss:$16 sps:$4 sm:$0xff]   ;;  %v10335_v11 = vld [vmem:[#allocation2 + $0x424] ss:$16 sps:$4 sm:$0xff]  }
  0xec   :  { %v10330_v12 = vld [vmem:[#allocation2 + $0x220] ss:$16 sps:$4 sm:$0xff]   ;;  %v10338_v14 = vld [vmem:[#allocation2 + $0x244] ss:$16 sps:$4 sm:$0xff]  }
  0xed   :  { %644 = vmatpush1.bf16.msra.mxu1 %v10272_v31  ;;  %v10333_v13 = vld [vmem:[#allocation2 + $0x420] ss:$16 sps:$4 sm:$0xff]   ;;  %v10341_v15 = vld [vmem:[#allocation2 + $0x444] ss:$16 sps:$4 sm:$0xff]  }
  0xee   :  { %1871 = vmatpush1.bf16.msra.mxu0 %v10273_v32  ;;  %670 = vmatprep.subr.bf16.mxu1 %v10276_v33  ;;  %v10336_v16 = vld [vmem:[#allocation2 + $0x240] ss:$16 sps:$4 sm:$0xff]   ;;  %v10344_v18 = vld [vmem:[#allocation2 + $0x264] ss:$16 sps:$4 sm:$0xff]   ;;  %v12483_v32 = vld [vmem:[%s12800_s15 + $0x8] sm:$0xff] }
  0xef   :  { %1872 = vmatprep.subr.bf16.mxu0 %v10277_v34  ;;  %v10339_v17 = vld [vmem:[#allocation2 + $0x440] ss:$16 sps:$4 sm:$0xff]   ;;  %v10347_v19 = vld [vmem:[#allocation2 + $0x464] ss:$16 sps:$4 sm:$0xff]  }
  0xf0   :  { %662 = vmatmul.mubr.bf16.vlgmr.msra.gmra.mrb[0].mxu1 %v12466_v35  ;;  %v10342_v20 = vld [vmem:[#allocation2 + $0x260] ss:$16 sps:$4 sm:$0xff]   ;;  %v10350_v22 = vld [vmem:[#allocation2 + $0x284] ss:$16 sps:$4 sm:$0xff]  }
  0xf1   :  { %671 = vmatpush1.bf16.msra.mxu1 %v10274_v36  ;;  %702 = vmatprep.mubr.bf16.mxu1 %v12176_v0  ;;  %v10345_v21 = vld [vmem:[#allocation2 + $0x460] ss:$16 sps:$4 sm:$0xff]   ;;  %v10353_v23 = vld [vmem:[#allocation2 + $0x484] ss:$16 sps:$4 sm:$0xff]  }
  0xf2   :  { %1873 = vmatpush1.bf16.msra.mxu0 %v10279_v37  ;;  %672 = vmatprep.subr.bf16.mxu1 %v10282_v38  ;;  %v10348_v24 = vld [vmem:[#allocation2 + $0x280] ss:$16 sps:$4 sm:$0xff]   ;;  %v10356_v26 = vld [vmem:[#allocation2 + $0x2a4] ss:$16 sps:$4 sm:$0xff]  }
  0xf3   :  { %1874 = vmatprep.subr.bf16.mxu0 %v10283_v39  ;;  %v10351_v25 = vld [vmem:[#allocation2 + $0x480] ss:$16 sps:$4 sm:$0xff]   ;;  %v10359_v27 = vld [vmem:[#allocation2 + $0x4a4] ss:$16 sps:$4 sm:$0xff]  }
  0xf4   :  { %v10354_v28 = vld [vmem:[#allocation2 + $0x2a0] ss:$16 sps:$4 sm:$0xff]   ;;  %v10362_v30 = vld [vmem:[#allocation2 + $0x2c4] ss:$16 sps:$4 sm:$0xff]  }
  0xf5   :  { %673 = vmatpush1.bf16.msra.mxu1 %v10280_v40  ;;  %v10357_v29 = vld [vmem:[#allocation2 + $0x4a0] ss:$16 sps:$4 sm:$0xff]   ;;  %v10365_v31 = vld [vmem:[#allocation2 + $0x4c4] ss:$16 sps:$4 sm:$0xff]  }
  0xf6   :  { %1875 = vmatpush1.bf16.msra.mxu0 %v10285_v41  ;;  %674 = vmatprep.subr.bf16.mxu1 %v10288_v42  ;;  %v10360_v33 = vld [vmem:[#allocation2 + $0x2c0] ss:$16 sps:$4 sm:$0xff]   ;;  %v10368_v37 = vld [vmem:[#allocation2 + $0x2e4] ss:$16 sps:$4 sm:$0xff]  }
  0xf7   :  { %1876 = vmatprep.subr.bf16.mxu0 %v10289_v43  ;;  %v10363_v34 = vld [vmem:[#allocation2 + $0x4c0] ss:$16 sps:$4 sm:$0xff]   ;;  %v10371_v39 = vld [vmem:[#allocation2 + $0x4e4] ss:$16 sps:$4 sm:$0xff]  }
  0xf8   :  { %v12492_v36 = vld [vmem:[%s12800_s15 + $0x10] sm:$0xff] }
  0xf9   :  { %675 = vmatpush1.bf16.msra.mxu1 %v10286_v44  ;;  %v12496_v38 = vcombine.high %v12492_v36, %v12492_v36  ;;  %v10366_v40 = vld [vmem:[#allocation2 + $0x2e0] ss:$16 sps:$4 sm:$0xff]   ;;  %v10374_v42 = vld [vmem:[#allocation2 + $0x304] ss:$16 sps:$4 sm:$0xff]  }
  0xfa   :  { %1877 = vmatpush1.bf16.msra.mxu0 %v10291_v45  ;;  %676 = vmatprep.subr.bf16.mxu1 %v10294_v46  ;;  %v10369_v41 = vld [vmem:[#allocation2 + $0x4e0] ss:$16 sps:$4 sm:$0xff]   ;;  %v10377_v43 = vld [vmem:[#allocation2 + $0x504] ss:$16 sps:$4 sm:$0xff]  }
  0xfb   :  { %1878 = vmatprep.subr.bf16.mxu0 %v10295_v47  ;;  %v10372_v44 = vld [vmem:[#allocation2 + $0x300] ss:$16 sps:$4 sm:$0xff]   ;;  %v10380_v46 = vld [vmem:[#allocation2 + $0x324] ss:$16 sps:$4 sm:$0xff]  }
  0xfc   :  { %v10375_v45 = vld [vmem:[#allocation2 + $0x500] ss:$16 sps:$4 sm:$0xff]   ;;  %v10383_v47 = vld [vmem:[#allocation2 + $0x524] ss:$16 sps:$4 sm:$0xff]  }
  0xfd   :  { %677 = vmatpush1.bf16.msra.mxu1 %v10292_v49  ;;  %v10378_v48 = vld [vmem:[#allocation2 + $0x320] ss:$16 sps:$4 sm:$0xff]  }
  0xfe   :  { %1879 = vmatpush1.bf16.msra.mxu0 %v10297_v50  ;;  %678 = vmatprep.subr.bf16.mxu1 %v10300_v52  ;;  %v10381_v49 = vld [vmem:[#allocation2 + $0x520] ss:$16 sps:$4 sm:$0xff]   ;;  %v10386_v50 = vld [vmem:[#allocation2 + $0x344] ss:$16 sps:$4 sm:$0xff]  }
  0xff   :  { %1880 = vmatprep.subr.bf16.mxu0 %v10301_v53  ;;  %v10389_v52 = vld [vmem:[#allocation2 + $0x544] ss:$16 sps:$4 sm:$0xff]   ;;  %v10384_v53 = vld [vmem:[#allocation2 + $0x340] ss:$16 sps:$4 sm:$0xff]  }
 0x101   :  { %679 = vmatpush1.bf16.msra.mxu1 %v10298_v54  ;;  %v10387_v54 = vld [vmem:[#allocation2 + $0x540] ss:$16 sps:$4 sm:$0xff]  }
 0x102   :  { %1881 = vmatpush1.bf16.msra.mxu0 %v10303_v55  ;;  %680 = vmatprep.subr.bf16.mxu1 %v10306_v56  ;;  %v10392_v55 = vld [vmem:[#allocation2 + $0x364] ss:$16 sps:$4 sm:$0xff]  }
 0x103   :  { %1882 = vmatprep.subr.bf16.mxu0 %v10307_v57  ;;  %v10395_v56 = vld [vmem:[#allocation2 + $0x564] ss:$16 sps:$4 sm:$0xff]   ;;  %v10390_v57 = vld [vmem:[#allocation2 + $0x360] ss:$16 sps:$4 sm:$0xff]  }
 0x105   :  { %681 = vmatpush1.bf16.msra.mxu1 %v10304_v58  ;;  %v10393_v58 = vld [vmem:[#allocation2 + $0x560] ss:$16 sps:$4 sm:$0xff]  }
 0x106   :  { %1883 = vmatpush1.bf16.msra.mxu0 %v10309_v59  ;;  %682 = vmatprep.subr.bf16.mxu1 %v10312_v60  ;;  %v10398_v59 = vld [vmem:[#allocation2 + $0x384] ss:$16 sps:$4 sm:$0xff]  }
 0x107   :  { %1884 = vmatprep.subr.bf16.mxu0 %v10313_v61  ;;  %v10401_v60 = vld [vmem:[#allocation2 + $0x584] ss:$16 sps:$4 sm:$0xff]   ;;  %v10396_v61 = vld [vmem:[#allocation2 + $0x380] ss:$16 sps:$4 sm:$0xff]  }
 0x109   :  { %683 = vmatpush1.bf16.msra.mxu1 %v10310_v62  ;;  %v10399_v62 = vld [vmem:[#allocation2 + $0x580] ss:$16 sps:$4 sm:$0xff]  }
 0x10a   :  { %1885 = vmatpush1.bf16.msra.mxu0 %v10315_v63  ;;  %684 = vmatprep.subr.bf16.mxu1 %v10318_v1  ;;  %v10404_v63 = vld [vmem:[#allocation2 + $0x3a4] ss:$16 sps:$4 sm:$0xff]  }
 0x10b   :  { %1886 = vmatprep.subr.bf16.mxu0 %v10319_v2  ;;  %v10407_v1 = vld [vmem:[#allocation2 + $0x5a4] ss:$16 sps:$4 sm:$0xff]   ;;  %v10402_v2 = vld [vmem:[#allocation2 + $0x3a0] ss:$16 sps:$4 sm:$0xff]  }
 0x10d   :  { %685 = vmatpush1.bf16.msra.mxu1 %v10316_v3  ;;  %v10405_v3 = vld [vmem:[#allocation2 + $0x5a0] ss:$16 sps:$4 sm:$0xff]  }
 0x10e   :  { %1887 = vmatpush1.bf16.msra.mxu0 %v10321_v4  ;;  %1897 = vmatprep.subr.bf16.mxu1 %v10326_v5  ;;  %v10410_v4 = vld [vmem:[#allocation2 + $0x3c4] ss:$16 sps:$4 sm:$0xff]  }
 0x10f   :  { %1938 = vmatprep.subr.bf16.mxu0 %v10329_v6  ;;  %v10413_v5 = vld [vmem:[#allocation2 + $0x5c4] ss:$16 sps:$4 sm:$0xff]   ;;  %v10408_v6 = vld [vmem:[#allocation2 + $0x3c0] ss:$16 sps:$4 sm:$0xff]  }
 0x110   :  { %703 = vmatmul.mubr.bf16.vlgmr.msra.gmra.mrb[4].mxu1 %v12466_v35  ;;  %v12487_v35 = vcombine.high %v12483_v32, %v12483_v32 }
 0x111   :  { %1889 = vmatmul.mubr.bf16.vlgmr.msra.gmra.mrb[0].mxu0 %v12476_v7  ;;  %1898 = vmatpush1.bf16.msra.mxu1 %v10324_v8  ;;  %v10411_v8 = vld [vmem:[#allocation2 + $0x5c0] ss:$16 sps:$4 sm:$0xff]  }
 0x112   :  { %1939 = vmatpush1.bf16.msra.mxu0 %v10327_v9  ;;  %1899 = vmatprep.subr.bf16.mxu1 %v10332_v10  ;;  %v10416_v9 = vld [vmem:[#allocation2 + $0x3e4] ss:$16 sps:$4 sm:$0xff]  }
 0x113   :  { %1940 = vmatprep.subr.bf16.mxu0 %v10335_v11  ;;  %1929 = vmatprep.mubr.bf16.mxu1 %v12487_v35  ;;  %v10419_v10 = vld [vmem:[#allocation2 + $0x5e4] ss:$16 sps:$4 sm:$0xff]   ;;  %v10414_v11 = vld [vmem:[#allocation2 + $0x3e0] ss:$16 sps:$4 sm:$0xff]  }
 0x114   :  { %1970 = vmatprep.mubr.bf16.mxu0 %v12496_v38 }
 0x115   :  { %1900 = vmatpush1.bf16.msra.mxu1 %v10330_v12  ;;  %v10417_v12 = vld [vmem:[#allocation2 + $0x5e0] ss:$16 sps:$4 sm:$0xff]  }
 0x116   :  { %1941 = vmatpush1.bf16.msra.mxu0 %v10333_v13  ;;  %1901 = vmatprep.subr.bf16.mxu1 %v10338_v14  ;;  %v10424_v13 = vld [vmem:[#allocation2 + $0x604] ss:$16 sps:$4 sm:$0xff]   ;;  %v10454_v14 = vld [vmem:[#allocation2 + $0x20c] ss:$16 sps:$4 sm:$0xff]  }
 0x117   :  { %1942 = vmatprep.subr.bf16.mxu0 %v10341_v15  ;;  %v12502_v15 = vcombine.low %v12483_v32, %v12483_v32  ;;  %v10478_v32 = vld [vmem:[#allocation2 + $0x28c] ss:$16 sps:$4 sm:$0xff]  }
 0x119   :  { %1902 = vmatpush1.bf16.msra.mxu1 %v10336_v16  ;;  %v12506_v16 = vcombine.low %v12492_v36, %v12492_v36  ;;  %v10484_v36 = vld [vmem:[#allocation2 + $0x2ac] ss:$16 sps:$4 sm:$0xff]  }
 0x11a   :  { %1943 = vmatpush1.bf16.msra.mxu0 %v10339_v17  ;;  %1903 = vmatprep.subr.bf16.mxu1 %v10344_v18  ;;  %v10422_v17 = vld [vmem:[#allocation2 + $0x600] ss:$16 sps:$4 sm:$0xff]   ;;  %v10429_v18 = vld [vmem:[#allocation2 + $0x624] ss:$16 sps:$4 sm:$0xff]  }
 0x11b   :  { %1944 = vmatprep.subr.bf16.mxu0 %v10347_v19  ;;  %v10452_v19 = vld [vmem:[#allocation2 + $0x208] ss:$16 sps:$4 sm:$0xff]  }
 0x11d   :  { %1904 = vmatpush1.bf16.msra.mxu1 %v10342_v20  ;;  %v10460_v20 = vld [vmem:[#allocation2 + $0x22c] ss:$16 sps:$4 sm:$0xff]  }
 0x11e   :  { %1945 = vmatpush1.bf16.msra.mxu0 %v10345_v21  ;;  %1905 = vmatprep.subr.bf16.mxu1 %v10350_v22  ;;  %v10427_v21 = vld [vmem:[#allocation2 + $0x620] ss:$16 sps:$4 sm:$0xff]   ;;  %v10432_v22 = vld [vmem:[#allocation2 + $0x644] ss:$16 sps:$4 sm:$0xff]  }
 0x11f   :  { %1946 = vmatprep.subr.bf16.mxu0 %v10353_v23  ;;  %v10458_v23 = vld [vmem:[#allocation2 + $0x228] ss:$16 sps:$4 sm:$0xff]  }
 0x121   :  { %1906 = vmatpush1.bf16.msra.mxu1 %v10348_v24  ;;  %v10466_v24 = vld [vmem:[#allocation2 + $0x24c] ss:$16 sps:$4 sm:$0xff]  }
 0x122   :  { %1947 = vmatpush1.bf16.msra.mxu0 %v10351_v25  ;;  %1907 = vmatprep.subr.bf16.mxu1 %v10356_v26  ;;  %v10430_v25 = vld [vmem:[#allocation2 + $0x640] ss:$16 sps:$4 sm:$0xff]   ;;  %v10435_v26 = vld [vmem:[#allocation2 + $0x664] ss:$16 sps:$4 sm:$0xff]  }
 0x123   :  { %1948 = vmatprep.subr.bf16.mxu0 %v10359_v27  ;;  %v10464_v27 = vld [vmem:[#allocation2 + $0x248] ss:$16 sps:$4 sm:$0xff]  }
 0x125   :  { %1908 = vmatpush1.bf16.msra.mxu1 %v10354_v28  ;;  %v10472_v28 = vld [vmem:[#allocation2 + $0x26c] ss:$16 sps:$4 sm:$0xff]  }
 0x126   :  { %1949 = vmatpush1.bf16.msra.mxu0 %v10357_v29  ;;  %1909 = vmatprep.subr.bf16.mxu1 %v10362_v30  ;;  %v10433_v29 = vld [vmem:[#allocation2 + $0x660] ss:$16 sps:$4 sm:$0xff]   ;;  %v10438_v30 = vld [vmem:[#allocation2 + $0x684] ss:$16 sps:$4 sm:$0xff]  }
 0x127   :  { %1950 = vmatprep.subr.bf16.mxu0 %v10365_v31  ;;  %v10470_v31 = vld [vmem:[#allocation2 + $0x268] ss:$16 sps:$4 sm:$0xff]  }
 0x129   :  { %1910 = vmatpush1.bf16.msra.mxu1 %v10360_v33  ;;  %v10436_v33 = vld [vmem:[#allocation2 + $0x680] ss:$16 sps:$4 sm:$0xff]  }
 0x12a   :  { %1951 = vmatpush1.bf16.msra.mxu0 %v10363_v34  ;;  %1911 = vmatprep.subr.bf16.mxu1 %v10368_v37  ;;  %v10441_v34 = vld [vmem:[#allocation2 + $0x6a4] ss:$16 sps:$4 sm:$0xff]   ;;  %v10439_v37 = vld [vmem:[#allocation2 + $0x6a0] ss:$16 sps:$4 sm:$0xff]  }
 0x12b   :  { %1952 = vmatprep.subr.bf16.mxu0 %v10371_v39  ;;  %v10444_v39 = vld [vmem:[#allocation2 + $0x6c4] ss:$16 sps:$4 sm:$0xff]  }
 0x12d   :  { %1912 = vmatpush1.bf16.msra.mxu1 %v10366_v40  ;;  %v10482_v40 = vld [vmem:[#allocation2 + $0x2a8] ss:$16 sps:$4 sm:$0xff]  }
 0x12e   :  { %1953 = vmatpush1.bf16.msra.mxu0 %v10369_v41  ;;  %1913 = vmatprep.subr.bf16.mxu1 %v10374_v42  ;;  %v10490_v41 = vld [vmem:[#allocation2 + $0x2cc] ss:$16 sps:$4 sm:$0xff]   ;;  %v10442_v42 = vld [vmem:[#allocation2 + $0x6c0] ss:$16 sps:$4 sm:$0xff]  }
 0x12f   :  { %1954 = vmatprep.subr.bf16.mxu0 %v10377_v43  ;;  %v10447_v43 = vld [vmem:[#allocation2 + $0x6e4] ss:$16 sps:$4 sm:$0xff]  }
 0x131   :  { %1914 = vmatpush1.bf16.msra.mxu1 %v10372_v44  ;;  %v10488_v44 = vld [vmem:[#allocation2 + $0x2c8] ss:$16 sps:$4 sm:$0xff]  }
 0x132   :  { %1955 = vmatpush1.bf16.msra.mxu0 %v10375_v45  ;;  %1915 = vmatprep.subr.bf16.mxu1 %v10380_v46  ;;  %v10496_v45 = vld [vmem:[#allocation2 + $0x2ec] ss:$16 sps:$4 sm:$0xff]   ;;  %v10445_v46 = vld [vmem:[#allocation2 + $0x6e0] ss:$16 sps:$4 sm:$0xff]  }
 0x133   :  { %1956 = vmatprep.subr.bf16.mxu0 %v10383_v47  ;;  %v10451_v47 = vld [vmem:[#allocation2 + $0xc] ss:$16 sps:$4 sm:$0xff]  }
 0x135   :  { %1916 = vmatpush1.bf16.msra.mxu1 %v10378_v48  ;;  %v10494_v48 = vld [vmem:[#allocation2 + $0x2e8] ss:$16 sps:$4 sm:$0xff]  }
 0x136   :  { %1957 = vmatpush1.bf16.msra.mxu0 %v10381_v49  ;;  %1917 = vmatprep.subr.bf16.mxu1 %v10386_v50  ;;  %v10502_v49 = vld [vmem:[#allocation2 + $0x30c] ss:$16 sps:$4 sm:$0xff]   ;;  %v12515_v50 = vld [vmem:[%s12800_s15 + $0x18] ss:$0 sps:$4 sm:$0xff]   ;;  %s12803_s15 = sld [smem:[#allocation26_spill]] }
 0x137   :  { %1958 = vmatprep.subr.bf16.mxu0 %v10389_v52  ;;  %v10449_v52 = vld [vmem:[#allocation2 + $0x8] ss:$16 sps:$4 sm:$0xff]  }
 0x139   :  { %1918 = vmatpush1.bf16.msra.mxu1 %v10384_v53  ;;  %v10457_v53 = vld [vmem:[#allocation2 + $0x2c] ss:$16 sps:$4 sm:$0xff]  }
 0x13a   :  { %1959 = vmatpush1.bf16.msra.mxu0 %v10387_v54  ;;  %1919 = vmatprep.subr.bf16.mxu1 %v10392_v55  ;;  %v10500_v54 = vld [vmem:[#allocation2 + $0x308] ss:$16 sps:$4 sm:$0xff]   ;;  %v10508_v55 = vld [vmem:[#allocation2 + $0x32c] ss:$16 sps:$4 sm:$0xff]  }
 0x13b   :  { %1960 = vmatprep.subr.bf16.mxu0 %v10395_v56  ;;  %v10455_v56 = vld [vmem:[#allocation2 + $0x28] ss:$16 sps:$4 sm:$0xff]  }
 0x13d   :  { %1920 = vmatpush1.bf16.msra.mxu1 %v10390_v57  ;;  %v10463_v57 = vld [vmem:[#allocation2 + $0x4c] ss:$16 sps:$4 sm:$0xff]  }
 0x13e   :  { %1961 = vmatpush1.bf16.msra.mxu0 %v10393_v58  ;;  %1921 = vmatprep.subr.bf16.mxu1 %v10398_v59  ;;  %v10506_v58 = vld [vmem:[#allocation2 + $0x328] ss:$16 sps:$4 sm:$0xff]   ;;  %v10514_v59 = vld [vmem:[#allocation2 + $0x34c] ss:$16 sps:$4 sm:$0xff]  }
 0x13f   :  { %1962 = vmatprep.subr.bf16.mxu0 %v10401_v60  ;;  %v10461_v60 = vld [vmem:[#allocation2 + $0x48] ss:$16 sps:$4 sm:$0xff]  }
 0x141   :  { %1922 = vmatpush1.bf16.msra.mxu1 %v10396_v61  ;;  %v10469_v61 = vld [vmem:[#allocation2 + $0x6c] ss:$16 sps:$4 sm:$0xff]  }
 0x142   :  { %1963 = vmatpush1.bf16.msra.mxu0 %v10399_v62  ;;  %1923 = vmatprep.subr.bf16.mxu1 %v10404_v63  ;;  %v10512_v62 = vld [vmem:[#allocation2 + $0x348] ss:$16 sps:$4 sm:$0xff]   ;;  %v10520_v63 = vld [vmem:[#allocation2 + $0x36c] ss:$16 sps:$4 sm:$0xff]  }
 0x143   :  { %1964 = vmatprep.subr.bf16.mxu0 %v10407_v1  ;;  %v10467_v1 = vld [vmem:[#allocation2 + $0x68] ss:$16 sps:$4 sm:$0xff]  }
 0x145   :  { %1924 = vmatpush1.bf16.msra.mxu1 %v10402_v2  ;;  %v10475_v2 = vld [vmem:[#allocation2 + $0x8c] ss:$16 sps:$4 sm:$0xff]  }
 0x146   :  { %1965 = vmatpush1.bf16.msra.mxu0 %v10405_v3  ;;  %1925 = vmatprep.subr.bf16.mxu1 %v10410_v4  ;;  %v10526_v3 = vld [vmem:[#allocation2 + $0x38c] ss:$16 sps:$4 sm:$0xff]   ;;  %v10473_v4 = vld [vmem:[#allocation2 + $0x88] ss:$16 sps:$4 sm:$0xff]  }
 0x147   :  { %1966 = vmatprep.subr.bf16.mxu0 %v10413_v5  ;;  %v10481_v5 = vld [vmem:[#allocation2 + $0xac] ss:$16 sps:$4 sm:$0xff]  }
 0x149   :  { %1926 = vmatpush1.bf16.msra.mxu1 %v10408_v6  ;;  %v10524_v6 = vld [vmem:[#allocation2 + $0x388] ss:$16 sps:$4 sm:$0xff]  }
 0x14a   :  { %1967 = vmatpush1.bf16.msra.mxu0 %v10411_v8  ;;  %1927 = vmatprep.subr.bf16.mxu1 %v10416_v9  ;;  %v10532_v8 = vld [vmem:[#allocation2 + $0x3ac] ss:$16 sps:$4 sm:$0xff]   ;;  %v10479_v9 = vld [vmem:[#allocation2 + $0xa8] ss:$16 sps:$4 sm:$0xff]  }
 0x14b   :  { %1968 = vmatprep.subr.bf16.mxu0 %v10419_v10  ;;  %v10487_v10 = vld [vmem:[#allocation2 + $0xcc] ss:$16 sps:$4 sm:$0xff]  }
 0x14d   :  { %1928 = vmatpush1.bf16.msra.mxu1 %v10414_v11  ;;  %v10530_v11 = vld [vmem:[#allocation2 + $0x3a8] ss:$16 sps:$4 sm:$0xff]  }
 0x14e   :  { %1969 = vmatpush1.bf16.msra.mxu0 %v10417_v12  ;;  %1979 = vmatprep.subr.bf16.mxu1 %v10424_v13  ;;  %v10538_v12 = vld [vmem:[#allocation2 + $0x3cc] ss:$16 sps:$4 sm:$0xff]   ;;  %v10485_v13 = vld [vmem:[#allocation2 + $0xc8] ss:$16 sps:$4 sm:$0xff]  }
 0x14f   :  { %2061 = vmatprep.subr.bf16.mxu0 %v10454_v14  ;;  %v10493_v14 = vld [vmem:[#allocation2 + $0xec] ss:$16 sps:$4 sm:$0xff]  }
 0x150   :  { %1930 = vmatmul.mubr.bf16.vlgmr.msra.gmra.mrb[8].mxu1 %v12502_v15 }
 0x151   :  { %1971 = vmatmul.mubr.bf16.vlgmr.msra.gmra.mrb[4].mxu0 %v12506_v16  ;;  %1980 = vmatpush1.bf16.msra.mxu1 %v10422_v17  ;;  %v10536_v17 = vld [vmem:[#allocation2 + $0x3c8] ss:$16 sps:$4 sm:$0xff]  }
 0x152   :  { %2011 = vmatprep.mubr.bf16.mxu1 %v12176_v0  ;;  %1981 = vmatprep.subr.bf16.mxu1 %v10429_v18  ;;  %v10491_v18 = vld [vmem:[#allocation2 + $0xe8] ss:$16 sps:$4 sm:$0xff]  }
 0x153   :  { %2062 = vmatpush1.bf16.msra.mxu0 %v10452_v19  ;;  %2093 = vmatprep.mubr.bf16.mxu0 %v12487_v35  ;;  %v10476_v35 = vld [vmem:[#allocation2 + $0x288] ss:$16 sps:$4 sm:$0xff]   ;;  %v10544_v19 = vld [vmem:[#allocation2 + $0x3ec] ss:$16 sps:$4 sm:$0xff]  }
 0x154   :  { %2063 = vmatprep.subr.bf16.mxu0 %v10460_v20  ;;  %v10499_v20 = vld [vmem:[#allocation2 + $0x10c] ss:$16 sps:$4 sm:$0xff]  }
 0x155   :  { %1982 = vmatpush1.bf16.msra.mxu1 %v10427_v21  ;;  %v10542_v21 = vld [vmem:[#allocation2 + $0x3e8] ss:$16 sps:$4 sm:$0xff]  }
 0x156   :  { %1983 = vmatprep.subr.bf16.mxu1 %v10432_v22  ;;  %v10571_v22 = vld [vmem:[#allocation2 + $0x60c] ss:$16 sps:$4 sm:$0xff]  }
 0x157   :  { %2064 = vmatpush1.bf16.msra.mxu0 %v10458_v23  ;;  %v10497_v23 = vld [vmem:[#allocation2 + $0x108] ss:$16 sps:$4 sm:$0xff]  }
 0x158   :  { %2065 = vmatprep.subr.bf16.mxu0 %v10466_v24  ;;  %v10505_v24 = vld [vmem:[#allocation2 + $0x12c] ss:$16 sps:$4 sm:$0xff]  }
 0x159   :  { %1984 = vmatpush1.bf16.msra.mxu1 %v10430_v25  ;;  %v10569_v25 = vld [vmem:[#allocation2 + $0x608] ss:$16 sps:$4 sm:$0xff]  }
 0x15a   :  { %1985 = vmatprep.subr.bf16.mxu1 %v10435_v26  ;;  %v10577_v26 = vld [vmem:[#allocation2 + $0x62c] ss:$16 sps:$4 sm:$0xff]  }
 0x15b   :  { %2066 = vmatpush1.bf16.msra.mxu0 %v10464_v27  ;;  %v10503_v27 = vld [vmem:[#allocation2 + $0x128] ss:$16 sps:$4 sm:$0xff]  }
 0x15c   :  { %2067 = vmatprep.subr.bf16.mxu0 %v10472_v28  ;;  %v10511_v28 = vld [vmem:[#allocation2 + $0x14c] ss:$16 sps:$4 sm:$0xff]  }
 0x15d   :  { %1986 = vmatpush1.bf16.msra.mxu1 %v10433_v29  ;;  %v10575_v29 = vld [vmem:[#allocation2 + $0x628] ss:$16 sps:$4 sm:$0xff]  }
 0x15e   :  { %1987 = vmatprep.subr.bf16.mxu1 %v10438_v30  ;;  %v10583_v30 = vld [vmem:[#allocation2 + $0x64c] ss:$16 sps:$4 sm:$0xff]  }
 0x15f   :  { %2068 = vmatpush1.bf16.msra.mxu0 %v10470_v31  ;;  %v10509_v31 = vld [vmem:[#allocation2 + $0x148] ss:$16 sps:$4 sm:$0xff]  }
 0x160   :  { %2069 = vmatprep.subr.bf16.mxu0 %v10478_v32  ;;  %v10517_v32 = vld [vmem:[#allocation2 + $0x16c] ss:$16 sps:$4 sm:$0xff]  }
 0x161   :  { %1988 = vmatpush1.bf16.msra.mxu1 %v10436_v33  ;;  %v10581_v33 = vld [vmem:[#allocation2 + $0x648] ss:$16 sps:$4 sm:$0xff]  }
 0x162   :  { %1989 = vmatprep.subr.bf16.mxu1 %v10441_v34  ;;  %v10589_v34 = vld [vmem:[#allocation2 + $0x66c] ss:$16 sps:$4 sm:$0xff]  }
 0x163   :  { %2070 = vmatpush1.bf16.msra.mxu0 %v10476_v35  ;;  %v10515_v35 = vld [vmem:[#allocation2 + $0x168] ss:$16 sps:$4 sm:$0xff]  }
 0x164   :  { %2071 = vmatprep.subr.bf16.mxu0 %v10484_v36  ;;  %v10523_v36 = vld [vmem:[#allocation2 + $0x18c] ss:$16 sps:$4 sm:$0xff]  }
 0x165   :  { %1990 = vmatpush1.bf16.msra.mxu1 %v10439_v37  ;;  %v10587_v37 = vld [vmem:[#allocation2 + $0x668] ss:$16 sps:$4 sm:$0xff]  }
 0x166   :  { %1991 = vmatprep.subr.bf16.mxu1 %v10444_v39  ;;  %v10595_v39 = vld [vmem:[#allocation2 + $0x68c] ss:$16 sps:$4 sm:$0xff]  }
 0x167   :  { %2072 = vmatpush1.bf16.msra.mxu0 %v10482_v40  ;;  %v10529_v40 = vld [vmem:[#allocation2 + $0x1ac] ss:$16 sps:$4 sm:$0xff]  }
 0x168   :  { %2073 = vmatprep.subr.bf16.mxu0 %v10490_v41  ;;  %v10593_v41 = vld [vmem:[#allocation2 + $0x688] ss:$16 sps:$4 sm:$0xff]  }
 0x169   :  { %1992 = vmatpush1.bf16.msra.mxu1 %v10442_v42  ;;  %v10601_v42 = vld [vmem:[#allocation2 + $0x6ac] ss:$16 sps:$4 sm:$0xff]  }
 0x16a   :  { %1993 = vmatprep.subr.bf16.mxu1 %v10447_v43  ;;  %v10527_v43 = vld [vmem:[#allocation2 + $0x1a8] ss:$16 sps:$4 sm:$0xff]  }
 0x16b   :  { %2074 = vmatpush1.bf16.msra.mxu0 %v10488_v44  ;;  %v10535_v44 = vld [vmem:[#allocation2 + $0x1cc] ss:$16 sps:$4 sm:$0xff]  }
 0x16c   :  { %2075 = vmatprep.subr.bf16.mxu0 %v10496_v45  ;;  %v10599_v45 = vld [vmem:[#allocation2 + $0x6a8] ss:$16 sps:$4 sm:$0xff]  }
 0x16d   :  { %1994 = vmatpush1.bf16.msra.mxu1 %v10445_v46  ;;  %v10607_v46 = vld [vmem:[#allocation2 + $0x6cc] ss:$16 sps:$4 sm:$0xff]  }
 0x16e   :  { %2020 = vmatprep.subr.bf16.mxu1 %v10451_v47  ;;  %v10533_v47 = vld [vmem:[#allocation2 + $0x1c8] ss:$16 sps:$4 sm:$0xff]  }
 0x16f   :  { %2076 = vmatpush1.bf16.msra.mxu0 %v10494_v48  ;;  %v10541_v48 = vld [vmem:[#allocation2 + $0x1ec] ss:$16 sps:$4 sm:$0xff]  }
 0x170   :  { %2077 = vmatprep.subr.bf16.mxu0 %v10502_v49  ;;  %2012 = vmatmul.mubr.bf16.vlgmr.msra.gmra.mrb[12].mxu1 %v12515_v50  ;;  %v10605_v49 = vld [vmem:[#allocation2 + $0x6c8] ss:$16 sps:$4 sm:$0xff]  }
 0x171   :  { %2021 = vmatpush1.bf16.msra.mxu1 %v10449_v52  ;;  %2052 = vmatprep.mubr.bf16.mxu1 %v12473_v51  ;;  %v10518_v51 = vld [vmem:[#allocation2 + $0x368] ss:$16 sps:$4 sm:$0xff]   ;;  %v10613_v52 = vld [vmem:[#allocation2 + $0x6ec] ss:$16 sps:$4 sm:$0xff]  }
 0x172   :  { %2022 = vmatprep.subr.bf16.mxu1 %v10457_v53  ;;  %v10539_v53 = vld [vmem:[#allocation2 + $0x1e8] ss:$16 sps:$4 sm:$0xff]  }
 0x173   :  { %2078 = vmatpush1.bf16.msra.mxu0 %v10500_v54  ;;  %v10547_v54 = vld [vmem:[#allocation2 + $0x40c] ss:$16 sps:$4 sm:$0xff]  }
 0x174   :  { %2079 = vmatprep.subr.bf16.mxu0 %v10508_v55  ;;  %v10611_v55 = vld [vmem:[#allocation2 + $0x6e8] ss:$16 sps:$4 sm:$0xff]  }
 0x175   :  { %2023 = vmatpush1.bf16.msra.mxu1 %v10455_v56  ;;  %v10619_v56 = vld [vmem:[#allocation6 + $0x4] ss:$16 sps:$4 sm:$0xff]  }
 0x176   :  { %2024 = vmatprep.subr.bf16.mxu1 %v10463_v57  ;;  %v10545_v57 = vld [vmem:[#allocation2 + $0x408] ss:$16 sps:$4 sm:$0xff]  }
 0x177   :  { %2080 = vmatpush1.bf16.msra.mxu0 %v10506_v58  ;;  %v10550_v58 = vld [vmem:[#allocation2 + $0x42c] ss:$16 sps:$4 sm:$0xff]  }
 0x178   :  { %2081 = vmatprep.subr.bf16.mxu0 %v10514_v59  ;;  %v10548_v59 = vld [vmem:[#allocation2 + $0x428] ss:$16 sps:$4 sm:$0xff]  }
 0x179   :  { %2025 = vmatpush1.bf16.msra.mxu1 %v10461_v60  ;;  %v10617_v60 = vld [vmem:[#allocation6] ss:$16 sps:$4 sm:$0xff]  }
 0x17a   :  { %2026 = vmatprep.subr.bf16.mxu1 %v10469_v61  ;;  %v10553_v61 = vld [vmem:[#allocation2 + $0x44c] ss:$16 sps:$4 sm:$0xff]  }
 0x17b   :  { %2082 = vmatpush1.bf16.msra.mxu0 %v10512_v62  ;;  %v10625_v62 = vld [vmem:[#allocation6 + $0x24] ss:$16 sps:$4 sm:$0xff]  }
 0x17c   :  { %2083 = vmatprep.subr.bf16.mxu0 %v10520_v63  ;;  %v10623_v63 = vld [vmem:[#allocation6 + $0x20] ss:$16 sps:$4 sm:$0xff]  }
 0x17d   :  { %2027 = vmatpush1.bf16.msra.mxu1 %v10467_v1  ;;  %v10631_v1 = vld [vmem:[#allocation6 + $0x44] ss:$16 sps:$4 sm:$0xff]  }
 0x17e   :  { %2028 = vmatprep.subr.bf16.mxu1 %v10475_v2  ;;  %v10551_v2 = vld [vmem:[#allocation2 + $0x448] ss:$16 sps:$4 sm:$0xff]  }
 0x17f   :  { %2084 = vmatpush1.bf16.msra.mxu0 %v10518_v51  ;;  %v10556_v51 = vld [vmem:[#allocation2 + $0x46c] ss:$16 sps:$4 sm:$0xff]  }
 0x180   :  { %2085 = vmatprep.subr.bf16.mxu0 %v10526_v3  ;;  %v10629_v3 = vld [vmem:[#allocation6 + $0x40] ss:$16 sps:$4 sm:$0xff]  }
 0x181   :  { %2029 = vmatpush1.bf16.msra.mxu1 %v10473_v4  ;;  %v10637_v4 = vld [vmem:[#allocation6 + $0x64] ss:$16 sps:$4 sm:$0xff]  }
 0x182   :  { %2030 = vmatprep.subr.bf16.mxu1 %v10481_v5  ;;  %v10554_v5 = vld [vmem:[#allocation2 + $0x468] ss:$16 sps:$4 sm:$0xff]  }
 0x183   :  { %2086 = vmatpush1.bf16.msra.mxu0 %v10524_v6  ;;  %v10635_v6 = vld [vmem:[#allocation6 + $0x60] ss:$16 sps:$4 sm:$0xff]  }
 0x184   :  { %2087 = vmatprep.subr.bf16.mxu0 %v10532_v8  ;;  %v10557_v8 = vld [vmem:[#allocation2 + $0x488] ss:$16 sps:$4 sm:$0xff]  }
 0x185   :  { %2031 = vmatpush1.bf16.msra.mxu1 %v10479_v9  ;;  %v10641_v9 = vld [vmem:[#allocation6 + $0x80] ss:$16 sps:$4 sm:$0xff]  }
 0x186   :  { %2032 = vmatprep.subr.bf16.mxu1 %v10487_v10  ;;  %v10649_v10 = vld [vmem:[#allocation6 + $0xa4] ss:$16 sps:$4 sm:$0xff]  }
 0x187   :  { %2088 = vmatpush1.bf16.msra.mxu0 %v10530_v11  ;;  %v10560_v11 = vld [vmem:[#allocation2 + $0x4a8] ss:$16 sps:$4 sm:$0xff]  }
 0x188   :  { %2089 = vmatprep.subr.bf16.mxu0 %v10538_v12  ;;  %v10565_v12 = vld [vmem:[#allocation2 + $0x4cc] ss:$16 sps:$4 sm:$0xff]  }
 0x189   :  { %2033 = vmatpush1.bf16.msra.mxu1 %v10485_v13 }
 0x18a   :  { %2034 = vmatprep.subr.bf16.mxu1 %v10493_v14  ;;  %v10647_v14 = vld [vmem:[#allocation6 + $0xa0] ss:$16 sps:$4 sm:$0xff]  }
 0x18b   :  { %2090 = vmatpush1.bf16.msra.mxu0 %v10536_v17 }
 0x18c   :  { %2091 = vmatprep.subr.bf16.mxu0 %v10544_v19  ;;  %v10655_v19 = vld [vmem:[#allocation6 + $0xc4] ss:$16 sps:$4 sm:$0xff]  }
 0x18d   :  { %2035 = vmatpush1.bf16.msra.mxu1 %v10491_v18  ;;  %v10563_v18 = vld [vmem:[#allocation2 + $0x4c8] ss:$16 sps:$4 sm:$0xff]  }
 0x18e   :  { %2036 = vmatprep.subr.bf16.mxu1 %v10499_v20 }
 0x18f   :  { %2092 = vmatpush1.bf16.msra.mxu0 %v10542_v21  ;;  %v10568_v21 = vld [vmem:[#allocation2 + $0x4ec] ss:$16 sps:$4 sm:$0xff]  }
 0x190   :  { %2143 = vmatprep.subr.bf16.mxu0 %v10571_v22  ;;  %v10653_v22 = vld [vmem:[#allocation6 + $0xc0] ss:$16 sps:$4 sm:$0xff]  }
 0x191   :  { %2037 = vmatpush1.bf16.msra.mxu1 %v10497_v23 }
 0x192   :  { %2094 = vmatmul.mubr.bf16.vlgmr.msra.gmra.mrb[8].mxu0 %v12502_v15  ;;  %2038 = vmatprep.subr.bf16.mxu1 %v10505_v24  ;;  %v10521_v15 = vld [vmem:[#allocation2 + $0x188] ss:$16 sps:$4 sm:$0xff]  }
 0x193   :  { %2144 = vmatpush1.bf16.msra.mxu0 %v10569_v25  ;;  %2175 = vmatprep.mubr.bf16.mxu0 %v12176_v0  ;;  %v10566_v24 = vld [vmem:[#allocation2 + $0x4e8] ss:$16 sps:$4 sm:$0xff]   ;;  %v10661_v25 = vld [vmem:[#allocation6 + $0xe4] ss:$16 sps:$4 sm:$0xff]  }
 0x194   :  { %2145 = vmatprep.subr.bf16.mxu0 %v10577_v26  ;;  %v10574_v26 = vld [vmem:[#allocation2 + $0x50c] ss:$16 sps:$4 sm:$0xff]  }
 0x195   :  { %2039 = vmatpush1.bf16.msra.mxu1 %v10503_v27  ;;  %v10659_v27 = vld [vmem:[#allocation6 + $0xe0] ss:$16 sps:$4 sm:$0xff]  }
 0x196   :  { %2040 = vmatprep.subr.bf16.mxu1 %v10511_v28  ;;  %v10667_v28 = vld [vmem:[#allocation6 + $0x104] ss:$16 sps:$4 sm:$0xff]  }
 0x197   :  { %2146 = vmatpush1.bf16.msra.mxu0 %v10575_v29  ;;  %v10572_v29 = vld [vmem:[#allocation2 + $0x508] ss:$16 sps:$4 sm:$0xff]  }
 0x198   :  { %2147 = vmatprep.subr.bf16.mxu0 %v10583_v30  ;;  %v10580_v30 = vld [vmem:[#allocation2 + $0x52c] ss:$16 sps:$4 sm:$0xff]  }
 0x199   :  { %2041 = vmatpush1.bf16.msra.mxu1 %v10509_v31  ;;  %v10665_v31 = vld [vmem:[#allocation6 + $0x100] ss:$16 sps:$4 sm:$0xff]  }
 0x19a   :  { %2042 = vmatprep.subr.bf16.mxu1 %v10517_v32  ;;  %v10673_v32 = vld [vmem:[#allocation6 + $0x124] ss:$16 sps:$4 sm:$0xff]  }
 0x19b   :  { %2148 = vmatpush1.bf16.msra.mxu0 %v10581_v33  ;;  %v10578_v33 = vld [vmem:[#allocation2 + $0x528] ss:$16 sps:$4 sm:$0xff]  }
 0x19c   :  { %2149 = vmatprep.subr.bf16.mxu0 %v10589_v34  ;;  %v10586_v34 = vld [vmem:[#allocation2 + $0x54c] ss:$16 sps:$4 sm:$0xff]  }
 0x19d   :  { %2043 = vmatpush1.bf16.msra.mxu1 %v10515_v35  ;;  %v10671_v35 = vld [vmem:[#allocation6 + $0x120] ss:$16 sps:$4 sm:$0xff]  }
 0x19e   :  { %2044 = vmatprep.subr.bf16.mxu1 %v10523_v36  ;;  %v10679_v36 = vld [vmem:[#allocation6 + $0x144] ss:$16 sps:$4 sm:$0xff]  }
 0x19f   :  { %2150 = vmatpush1.bf16.msra.mxu0 %v10587_v37  ;;  %v10584_v37 = vld [vmem:[#allocation2 + $0x548] ss:$16 sps:$4 sm:$0xff]  }
 0x1a0   :  { %2151 = vmatprep.subr.bf16.mxu0 %v10595_v39  ;;  %v10592_v39 = vld [vmem:[#allocation2 + $0x56c] ss:$16 sps:$4 sm:$0xff]  }
 0x1a1   :  { %2045 = vmatpush1.bf16.msra.mxu1 %v10521_v15  ;;  %v10677_v15 = vld [vmem:[#allocation6 + $0x140] ss:$16 sps:$4 sm:$0xff]  }
 0x1a2   :  { %2046 = vmatprep.subr.bf16.mxu1 %v10529_v40  ;;  %v10685_v40 = vld [vmem:[#allocation6 + $0x164] ss:$16 sps:$4 sm:$0xff]  }
 0x1a3   :  { %2152 = vmatpush1.bf16.msra.mxu0 %v10593_v41  ;;  %v10590_v41 = vld [vmem:[#allocation2 + $0x568] ss:$16 sps:$4 sm:$0xff]  }
 0x1a4   :  { %2153 = vmatprep.subr.bf16.mxu0 %v10601_v42  ;;  %v10598_v42 = vld [vmem:[#allocation2 + $0x58c] ss:$16 sps:$4 sm:$0xff]  }
 0x1a5   :  { %2047 = vmatpush1.bf16.msra.mxu1 %v10527_v43  ;;  %v10683_v43 = vld [vmem:[#allocation6 + $0x160] ss:$16 sps:$4 sm:$0xff]  }
 0x1a6   :  { %2048 = vmatprep.subr.bf16.mxu1 %v10535_v44  ;;  %v10691_v44 = vld [vmem:[#allocation6 + $0x184] ss:$16 sps:$4 sm:$0xff]  }
 0x1a7   :  { %2154 = vmatpush1.bf16.msra.mxu0 %v10599_v45  ;;  %v10596_v45 = vld [vmem:[#allocation2 + $0x588] ss:$16 sps:$4 sm:$0xff]  }
 0x1a8   :  { %2155 = vmatprep.subr.bf16.mxu0 %v10607_v46  ;;  %v10604_v46 = vld [vmem:[#allocation2 + $0x5ac] ss:$16 sps:$4 sm:$0xff]  }
 0x1a9   :  { %2049 = vmatpush1.bf16.msra.mxu1 %v10533_v47  ;;  %v10689_v47 = vld [vmem:[#allocation6 + $0x180] ss:$16 sps:$4 sm:$0xff]  }
 0x1aa   :  { %2050 = vmatprep.subr.bf16.mxu1 %v10541_v48  ;;  %v10697_v48 = vld [vmem:[#allocation6 + $0x1a4] ss:$16 sps:$4 sm:$0xff]  }
 0x1ab   :  { %2156 = vmatpush1.bf16.msra.mxu0 %v10605_v49  ;;  %v10602_v49 = vld [vmem:[#allocation2 + $0x5a8] ss:$16 sps:$4 sm:$0xff]  }
 0x1ac   :  { %2157 = vmatprep.subr.bf16.mxu0 %v10613_v52  ;;  %v10610_v52 = vld [vmem:[#allocation2 + $0x5cc] ss:$16 sps:$4 sm:$0xff]  }
 0x1ad   :  { %2051 = vmatpush1.bf16.msra.mxu1 %v10539_v53  ;;  %v10695_v53 = vld [vmem:[#allocation6 + $0x1a0] ss:$16 sps:$4 sm:$0xff]  }
 0x1ae   :  { %2102 = vmatprep.subr.bf16.mxu1 %v10547_v54  ;;  %v10703_v54 = vld [vmem:[#allocation6 + $0x1c4] ss:$16 sps:$4 sm:$0xff]  }
 0x1af   :  { %2158 = vmatpush1.bf16.msra.mxu0 %v10611_v55 }
 0x1b0   :  { %3008 = vmatprep.subr.bf16.mxu0 %v10619_v56  ;;  %2053 = vmatmul.mubr.bf16.vlgmr.msra.gmra.mrb[16].mxu1 %v12476_v7  ;;  %v10559_v7 = vld [vmem:[#allocation2 + $0x48c] ss:$16 sps:$4 sm:$0xff]  }
 0x1b1   :  { %2103 = vmatpush1.bf16.msra.mxu1 %v10545_v57  ;;  %2134 = vmatprep.mubr.bf16.mxu1 %v12496_v38  ;;  %v10643_v38 = vld [vmem:[#allocation6 + $0x84] ss:$16 sps:$4 sm:$0xff]   ;;  %v10608_v57 = vld [vmem:[#allocation2 + $0x5c8] ss:$16 sps:$4 sm:$0xff]  }
 0x1b2   :  { %2104 = vmatprep.subr.bf16.mxu1 %v10550_v58  ;;  %2176 = vmatmul.mubr.bf16.vlgmr.msra.gmra.mrb[12].mxu0 %v12515_v50  ;;  %v10562_v50 = vld [vmem:[#allocation2 + $0x4ac] ss:$16 sps:$4 sm:$0xff]  }
 0x1b3   :  { %3009 = vmatpush1.bf16.msra.mxu0 %v10617_v60 }
 0x1b4   :  { %3010 = vmatprep.subr.bf16.mxu0 %v10625_v62 }
 0x1b5   :  { %2105 = vmatpush1.bf16.msra.mxu1 %v10548_v59 }
 0x1b6   :  { %2106 = vmatprep.subr.bf16.mxu1 %v10553_v61  ;;  %v10616_v61 = vld [vmem:[#allocation2 + $0x5ec] ss:$16 sps:$4 sm:$0xff]  }
 0x1b7   :  { %3011 = vmatpush1.bf16.msra.mxu0 %v10623_v63 }
 0x1b8   :  { %3012 = vmatprep.subr.bf16.mxu0 %v10631_v1 }
 0x1b9   :  { %2107 = vmatpush1.bf16.msra.mxu1 %v10551_v2  ;;  %v10701_v2 = vld [vmem:[#allocation6 + $0x1c0] ss:$16 sps:$4 sm:$0xff]  }
 0x1ba   :  { %2108 = vmatprep.subr.bf16.mxu1 %v10556_v51 }
 0x1bb   :  { %3013 = vmatpush1.bf16.msra.mxu0 %v10629_v3 }
 0x1bc   :  { %3014 = vmatprep.subr.bf16.mxu0 %v10637_v4  ;;  %v10709_v4 = vld [vmem:[#allocation6 + $0x1e4] ss:$16 sps:$4 sm:$0xff]  }
 0x1bd   :  { %2109 = vmatpush1.bf16.msra.mxu1 %v10554_v5  ;;  %v10614_v5 = vld [vmem:[#allocation2 + $0x5e8] ss:$16 sps:$4 sm:$0xff]  }
 0x1be   :  { %2110 = vmatprep.subr.bf16.mxu1 %v10559_v7  ;;  %v10622_v7 = vld [vmem:[#allocation6 + $0xc] ss:$16 sps:$4 sm:$0xff]  }
 0x1bf   :  { %3015 = vmatpush1.bf16.msra.mxu0 %v10635_v6  ;;  %v10707_v6 = vld [vmem:[#allocation6 + $0x1e0] ss:$16 sps:$4 sm:$0xff]  }
 0x1c0   :  { %3016 = vmatprep.subr.bf16.mxu0 %v10643_v38  ;;  %v10620_v38 = vld [vmem:[#allocation6 + $0x8] ss:$16 sps:$4 sm:$0xff]  }
 0x1c1   :  { %2111 = vmatpush1.bf16.msra.mxu1 %v10557_v8  ;;  %v10628_v8 = vld [vmem:[#allocation6 + $0x2c] ss:$16 sps:$4 sm:$0xff]  }
 0x1c2   :  { %2112 = vmatprep.subr.bf16.mxu1 %v10562_v50  ;;  %v10626_v50 = vld [vmem:[#allocation6 + $0x28] ss:$16 sps:$4 sm:$0xff]  }
 0x1c3   :  { %v12524_v13 = vpop.f32.mrb[0].mxu1  ;;  %3017 = vmatpush1.bf16.msra.mxu0 %v10641_v9  ;;  %v10634_v9 = vld [vmem:[#allocation6 + $0x4c] ss:$16 sps:$4 sm:$0xff]  }
 0x1c4   :  { %v12526_v17 = vpop.f32.mrb[1].mxu1  ;;  %3018 = vmatprep.subr.bf16.mxu0 %v10649_v10  ;;  %v10632_v10 = vld [vmem:[#allocation6 + $0x48] ss:$16 sps:$4 sm:$0xff]  }
 0x1c5   :  { %v667_v20 = vpop.f32.mrb[2].mxu1  ;;  %2113 = vmatpush1.bf16.msra.mxu1 %v10560_v11  ;;  %v10640_v11 = vld [vmem:[#allocation6 + $0x6c] ss:$16 sps:$4 sm:$0xff]  }
 0x1c6   :  { %v668_v23 = vpop.f32.mrb[3].mxu1  ;;  %2114 = vmatprep.subr.bf16.mxu1 %v10565_v12  ;;  %v10638_v12 = vld [vmem:[#allocation6 + $0x68] ss:$16 sps:$4 sm:$0xff]   ;;  %v10664_v20 = vld [vmem:[#allocation6 + $0xec] ss:$16 sps:$4 sm:$0xff]  }
 0x1c7   :  { %3019 = vmatpush1.bf16.msra.mxu0 %v10647_v14  ;;  %v10644_v14 = vld [vmem:[#allocation6 + $0x88] ss:$16 sps:$4 sm:$0xff]   ;;  %v10670_v23 = vld [vmem:[#allocation6 + $0x10c] ss:$16 sps:$4 sm:$0xff]  }
 0x1c8   :  { %3020 = vmatprep.subr.bf16.mxu0 %v10655_v19  ;;  %v10658_v19 = vld [vmem:[#allocation6 + $0xcc] ss:$16 sps:$4 sm:$0xff]  }
 0x1c9   :  { %2115 = vmatpush1.bf16.msra.mxu1 %v10563_v18  ;;  %v10650_v18 = vld [vmem:[#allocation6 + $0xa8] ss:$16 sps:$4 sm:$0xff]  }
 0x1ca   :  { %2116 = vmatprep.subr.bf16.mxu1 %v10568_v21  ;;  %v10715_v21 = vld [vmem:[#allocation6 + $0x204] ss:$16 sps:$4 sm:$0xff]  }
 0x1cb   :  { %3021 = vmatpush1.bf16.msra.mxu0 %v10653_v22  ;;  %v10662_v22 = vld [vmem:[#allocation6 + $0xe8] ss:$16 sps:$4 sm:$0xff]  }
 0x1cc   :  { %3022 = vmatprep.subr.bf16.mxu0 %v10661_v25  ;;  %v10676_v25 = vld [vmem:[#allocation6 + $0x12c] ss:$16 sps:$4 sm:$0xff]  }
 0x1cd   :  { %2117 = vmatpush1.bf16.msra.mxu1 %v10566_v24  ;;  %v10668_v24 = vld [vmem:[#allocation6 + $0x108] ss:$16 sps:$4 sm:$0xff]  }
 0x1ce   :  { %2118 = vmatprep.subr.bf16.mxu1 %v10574_v26  ;;  %v10674_v26 = vld [vmem:[#allocation6 + $0x128] ss:$16 sps:$4 sm:$0xff]  }
 0x1cf   :  { %3023 = vmatpush1.bf16.msra.mxu0 %v10659_v27  ;;  %v10682_v27 = vld [vmem:[#allocation6 + $0x14c] ss:$16 sps:$4 sm:$0xff]  }
 0x1d0   :  { %3024 = vmatprep.subr.bf16.mxu0 %v10667_v28  ;;  %v10680_v28 = vld [vmem:[#allocation6 + $0x148] ss:$16 sps:$4 sm:$0xff]  }
 0x1d1   :  { %2119 = vmatpush1.bf16.msra.mxu1 %v10572_v29  ;;  %v10688_v29 = vld [vmem:[#allocation6 + $0x16c] ss:$16 sps:$4 sm:$0xff]  }
 0x1d2   :  { %2120 = vmatprep.subr.bf16.mxu1 %v10580_v30  ;;  %v10686_v30 = vld [vmem:[#allocation6 + $0x168] ss:$16 sps:$4 sm:$0xff]  }
 0x1d3   :  { %3025 = vmatpush1.bf16.msra.mxu0 %v10665_v31  ;;  %v10694_v31 = vld [vmem:[#allocation6 + $0x18c] ss:$16 sps:$4 sm:$0xff]  }
 0x1d4   :  { %3026 = vmatprep.subr.bf16.mxu0 %v10673_v32  ;;  %v10692_v32 = vld [vmem:[#allocation6 + $0x188] ss:$16 sps:$4 sm:$0xff]  }
 0x1d5   :  { %2121 = vmatpush1.bf16.msra.mxu1 %v10578_v33  ;;  %v10700_v33 = vld [vmem:[#allocation6 + $0x1ac] ss:$16 sps:$4 sm:$0xff]  }
 0x1d6   :  { %2122 = vmatprep.subr.bf16.mxu1 %v10586_v34  ;;  %v10698_v34 = vld [vmem:[#allocation6 + $0x1a8] ss:$16 sps:$4 sm:$0xff]  }
 0x1d7   :  { %3027 = vmatpush1.bf16.msra.mxu0 %v10671_v35  ;;  %v10706_v35 = vld [vmem:[#allocation6 + $0x1cc] ss:$16 sps:$4 sm:$0xff]  }
 0x1d8   :  { %3028 = vmatprep.subr.bf16.mxu0 %v10679_v36 }
 0x1d9   :  { %2123 = vmatpush1.bf16.msra.mxu1 %v10584_v37 }
 0x1da   :  { %2124 = vmatprep.subr.bf16.mxu1 %v10592_v39  ;;  %v10704_v39 = vld [vmem:[#allocation6 + $0x1c8] ss:$16 sps:$4 sm:$0xff]  }
 0x1db   :  { %3029 = vmatpush1.bf16.msra.mxu0 %v10677_v15 }
 0x1dc   :  { %3030 = vmatprep.subr.bf16.mxu0 %v10685_v40 }
 0x1dd   :  { %2125 = vmatpush1.bf16.msra.mxu1 %v10590_v41 }
 0x1de   :  { %2126 = vmatprep.subr.bf16.mxu1 %v10598_v42  ;;  %v10712_v42 = vld [vmem:[#allocation6 + $0x1ec] ss:$16 sps:$4 sm:$0xff]  }
 0x1df   :  { %3031 = vmatpush1.bf16.msra.mxu0 %v10683_v43 }
 0x1e0   :  { %3032 = vmatprep.subr.bf16.mxu0 %v10691_v44 }
 0x1e1   :  { %2127 = vmatpush1.bf16.msra.mxu1 %v10596_v45 }
 0x1e2   :  { %2128 = vmatprep.subr.bf16.mxu1 %v10604_v46 }
 0x1e3   :  { %v12528_v55 = vpop.f32.mrb[4].mxu1  ;;  %3033 = vmatpush1.bf16.msra.mxu0 %v10689_v47 }
 0x1e4   :  { %v1890_v56 = vpop.f32.mrb[0].mxu0  ;;  %v12533_v59 = vpop.f32.mrb[5].mxu1  ;;  %3034 = vmatprep.subr.bf16.mxu0 %v10697_v48 }
 0x1e5   :  { %v12531_v58 = vadd.f32 %v1890_v56, %v12524_v13  ;;  %v1892_v60 = vpop.f32.mrb[1].mxu0  ;;  %v708_v63 = vpop.f32.mrb[6].mxu1  ;;  %2129 = vmatpush1.bf16.msra.mxu1 %v10602_v49  ;;  %v10646_v13 = vld [vmem:[#allocation6 + $0x8c] ss:$16 sps:$4 sm:$0xff]  }
 0x1e6   :  { %v12536_v62 = vadd.f32 %v1892_v60, %v12526_v17  ;;  %v1894_v1 = vpop.f32.mrb[2].mxu0  ;;  %v709_v51 = vpop.f32.mrb[7].mxu1  ;;  %2130 = vmatprep.subr.bf16.mxu1 %v10610_v52  ;;  %v10652_v17 = vld [vmem:[#allocation6 + $0xac] ss:$16 sps:$4 sm:$0xff]   ;;  %v10710_v52 = vld [vmem:[#allocation6 + $0x1e8] ss:$16 sps:$4 sm:$0xff]  }
 0x1e7   :  { %v1895_v3 = vpop.f32.mrb[3].mxu0  ;;  %3035 = vmatpush1.bf16.msra.mxu0 %v10695_v53  ;;  %v10718_v53 = vld [vmem:[#allocation6 + $0x20c] ss:$16 sps:$4 sm:$0xff]  }
 0x1e8   :  { %3036 = vmatprep.subr.bf16.mxu0 %v10703_v54  ;;  %v2186_v54 = vlaneseq }
 0x1e9   :  { %2131 = vmatpush1.bf16.msra.mxu1 %v10608_v57  ;;  %v12546_v57 = vld [vmem:[%s12801_s10] sm:$0xf] }
 0x1ea   :  { %2132 = vmatprep.subr.bf16.mxu1 %v10616_v61  ;;  %v12541_v56 = vshrl.u32 %v2186_v54, 7  ;;  %v10775_v54 = vld [vmem:[#allocation6 + $0x344] ss:$16 sps:$4 sm:$0xff]  }
 0x1eb   :  { %3037 = vmatpush1.bf16.msra.mxu0 %v10701_v2 }
 0x1ec   :  { %3038 = vmatprep.subr.bf16.mxu0 %v10709_v4  ;;  %v12552_v60 = vsub.s32 1, %v12541_v56 }
 0x1ed   :  { %2133 = vmatpush1.bf16.msra.mxu1 %v10614_v5 }
 0x1ee   :  { %3090 = vmatprep.subr.bf16.mxu1 %v10622_v7  ;;  %v2193_v63 = vrot.slane %v12546_v57, %v12552_v60 }
 0x1ef   :  { %3039 = vmatpush1.bf16.msra.mxu0 %v10707_v6 }
 0x1f0   :  { %2135 = vmatmul.mubr.bf16.vlgmr.msra.gmra.mrb[20].mxu1 %v12506_v16  ;;  %v10656_v16 = vld [vmem:[#allocation6 + $0xc8] ss:$16 sps:$4 sm:$0xff]   ;;  %3049 = vmatprep.subr.bf16.mxu0 %v10715_v21  ;;  %v10736_v21 = vld [vmem:[#allocation6 + $0x26c] ss:$16 sps:$4 sm:$0xff]  }
 0x1f1   :  { %3091 = vmatpush1.bf16.msra.mxu1 %v10620_v38 }
 0x1f2   :  { %3092 = vmatprep.subr.bf16.mxu1 %v10628_v8  ;;  %v10713_v8 = vld [vmem:[#allocation6 + $0x200] ss:$16 sps:$4 sm:$0xff]  }
 0x1f5   :  { %3093 = vmatpush1.bf16.msra.mxu1 %v10626_v50  ;;  %v10716_v50 = vld [vmem:[#allocation6 + $0x208] ss:$16 sps:$4 sm:$0xff]  }
 0x1f6   :  { %3094 = vmatprep.subr.bf16.mxu1 %v10634_v9 }
 0x1f9   :  { %3095 = vmatpush1.bf16.msra.mxu1 %v10632_v10  ;;  %v10721_v10 = vld [vmem:[#allocation6 + $0x224] ss:$16 sps:$4 sm:$0xff]  }
 0x1fa   :  { %3096 = vmatprep.subr.bf16.mxu1 %v10640_v11  ;;  %v10724_v11 = vld [vmem:[#allocation6 + $0x22c] ss:$16 sps:$4 sm:$0xff]  }
 0x1fd   :  { %3097 = vmatpush1.bf16.msra.mxu1 %v10638_v12 }
 0x1fe   :  { %3098 = vmatprep.subr.bf16.mxu1 %v10646_v13  ;;  %v10719_v13 = vld [vmem:[#allocation6 + $0x220] ss:$16 sps:$4 sm:$0xff]  }
 0x201   :  { %3099 = vmatpush1.bf16.msra.mxu1 %v10644_v14  ;;  %v10722_v14 = vld [vmem:[#allocation6 + $0x228] ss:$16 sps:$4 sm:$0xff]  }
 0x202   :  { %3100 = vmatprep.subr.bf16.mxu1 %v10652_v17  ;;  %v10727_v17 = vld [vmem:[#allocation6 + $0x244] ss:$16 sps:$4 sm:$0xff]  }
 0x205   :  { %3101 = vmatpush1.bf16.msra.mxu1 %v10650_v18  ;;  %v10730_v18 = vld [vmem:[#allocation6 + $0x24c] ss:$16 sps:$4 sm:$0xff]  }
 0x206   :  { %3102 = vmatprep.subr.bf16.mxu1 %v10658_v19  ;;  %v10725_v19 = vld [vmem:[#allocation6 + $0x240] ss:$16 sps:$4 sm:$0xff]  }
 0x209   :  { %3103 = vmatpush1.bf16.msra.mxu1 %v10656_v16  ;;  %v10728_v16 = vld [vmem:[#allocation6 + $0x248] ss:$16 sps:$4 sm:$0xff]  }
 0x20a   :  { %3104 = vmatprep.subr.bf16.mxu1 %v10664_v20  ;;  %v10733_v20 = vld [vmem:[#allocation6 + $0x264] ss:$16 sps:$4 sm:$0xff]  }
 0x20d   :  { %3105 = vmatpush1.bf16.msra.mxu1 %v10662_v22  ;;  %v10731_v22 = vld [vmem:[#allocation6 + $0x260] ss:$16 sps:$4 sm:$0xff]  }
 0x20e   :  { %3106 = vmatprep.subr.bf16.mxu1 %v10670_v23  ;;  %v10734_v23 = vld [vmem:[#allocation6 + $0x268] ss:$16 sps:$4 sm:$0xff]  }
 0x211   :  { %3107 = vmatpush1.bf16.msra.mxu1 %v10668_v24  ;;  %v10739_v24 = vld [vmem:[#allocation6 + $0x284] ss:$16 sps:$4 sm:$0xff]  }
 0x212   :  { %3108 = vmatprep.subr.bf16.mxu1 %v10676_v25  ;;  %v10742_v25 = vld [vmem:[#allocation6 + $0x28c] ss:$16 sps:$4 sm:$0xff]  }
 0x215   :  { %3109 = vmatpush1.bf16.msra.mxu1 %v10674_v26  ;;  %v10737_v26 = vld [vmem:[#allocation6 + $0x280] ss:$16 sps:$4 sm:$0xff]  }
 0x216   :  { %3110 = vmatprep.subr.bf16.mxu1 %v10682_v27  ;;  %v10740_v27 = vld [vmem:[#allocation6 + $0x288] ss:$16 sps:$4 sm:$0xff]  }
 0x219   :  { %3111 = vmatpush1.bf16.msra.mxu1 %v10680_v28  ;;  %v10745_v28 = vld [vmem:[#allocation6 + $0x2a4] ss:$16 sps:$4 sm:$0xff]  }
 0x21a   :  { %3112 = vmatprep.subr.bf16.mxu1 %v10688_v29  ;;  %v10748_v29 = vld [vmem:[#allocation6 + $0x2ac] ss:$16 sps:$4 sm:$0xff]  }
 0x21d   :  { %3113 = vmatpush1.bf16.msra.mxu1 %v10686_v30  ;;  %v10743_v30 = vld [vmem:[#allocation6 + $0x2a0] ss:$16 sps:$4 sm:$0xff]  }
 0x21e   :  { %3114 = vmatprep.subr.bf16.mxu1 %v10694_v31  ;;  %v10746_v31 = vld [vmem:[#allocation6 + $0x2a8] ss:$16 sps:$4 sm:$0xff]  }
 0x221   :  { %3115 = vmatpush1.bf16.msra.mxu1 %v10692_v32  ;;  %v10751_v32 = vld [vmem:[#allocation6 + $0x2c4] ss:$16 sps:$4 sm:$0xff]  }
 0x222   :  { %3116 = vmatprep.subr.bf16.mxu1 %v10700_v33  ;;  %v10754_v33 = vld [vmem:[#allocation6 + $0x2cc] ss:$16 sps:$4 sm:$0xff]  }
 0x223   :  { %v1931_v36 = vpop.f32.mrb[8].mxu1 }
 0x224   :  { %v1972_v37 = vpop.f32.mrb[4].mxu0  ;;  %v1932_v15 = vadd.f32 %v1931_v36, %v12531_v58  ;;  %v1933_v40 = vpop.f32.mrb[9].mxu1  ;;  %v12549_v58 = vsub.s32 0, %v12541_v56  ;;  %v10757_v36 = vld [vmem:[#allocation6 + $0x2e4] ss:$16 sps:$4 sm:$0xff]  }
 0x225   :  { %v1974_v41 = vpop.f32.mrb[5].mxu0  ;;  %v1934_v43 = vadd.f32 %v1933_v40, %v12536_v62  ;;  %v1935_v44 = vpop.f32.mrb[10].mxu1  ;;  %3117 = vmatpush1.bf16.msra.mxu1 %v10698_v34  ;;  %v10749_v34 = vld [vmem:[#allocation6 + $0x2c0] ss:$16 sps:$4 sm:$0xff]  }
 0x226   :  { %v1976_v45 = vpop.f32.mrb[6].mxu0  ;;  %v1973_v46 = vadd.f32 %v1972_v37, %v1932_v15  ;;  %v1936_v47 = vpop.f32.mrb[11].mxu1  ;;  %3118 = vmatprep.subr.bf16.mxu1 %v10706_v35  ;;  %v2189_v61 = vrot.slane %v12546_v57, %v12549_v58  ;;  %v10752_v35 = vld [vmem:[#allocation6 + $0x2c8] ss:$16 sps:$4 sm:$0xff]   ;;  %v10760_v37 = vld [vmem:[#allocation6 + $0x2ec] ss:$16 sps:$4 sm:$0xff]  }
 0x227   :  { %v1977_v48 = vpop.f32.mrb[7].mxu0  ;;  %v1975_v49 = vadd.f32 %v1974_v41, %v1934_v43  ;;  %v10755_v40 = vld [vmem:[#allocation6 + $0x2e0] ss:$16 sps:$4 sm:$0xff]   ;;  %v10758_v41 = vld [vmem:[#allocation6 + $0x2e8] ss:$16 sps:$4 sm:$0xff]  }
 0x228   :  { %v10763_v43 = vld [vmem:[#allocation6 + $0x304] ss:$16 sps:$4 sm:$0xff]   ;;  %v10766_v44 = vld [vmem:[#allocation6 + $0x30c] ss:$16 sps:$4 sm:$0xff]   ;;  %v10764_v47 = vld [vmem:[#allocation6 + $0x308] ss:$16 sps:$4 sm:$0xff]  }
 0x229   :  { %3119 = vmatpush1.bf16.msra.mxu1 %v10704_v39  ;;  %v10769_v48 = vld [vmem:[#allocation6 + $0x324] ss:$16 sps:$4 sm:$0xff]  }
 0x22a   :  { %3120 = vmatprep.subr.bf16.mxu1 %v10712_v42 }
 0x22d   :  { %3121 = vmatpush1.bf16.msra.mxu1 %v10710_v52  ;;  %v10767_v52 = vld [vmem:[#allocation6 + $0x320] ss:$16 sps:$4 sm:$0xff]  }
 0x22e   :  { %3131 = vmatprep.subr.bf16.mxu1 %v10718_v53  ;;  %v10770_v53 = vld [vmem:[#allocation6 + $0x328] ss:$16 sps:$4 sm:$0xff]  }
 0x243   :  { %v2013_v62 = vpop.f32.mrb[12].mxu1 }
 0x244   :  { %v2014_v1 = vadd.f32 %v2013_v62, %v1973_v46  ;;  %v2015_v2 = vpop.f32.mrb[13].mxu1  ;;  %v10761_v46 = vld [vmem:[#allocation6 + $0x300] ss:$16 sps:$4 sm:$0xff]  }
 0x245   :  { %v2016_v51 = vadd.f32 %v2015_v2, %v1975_v49  ;;  %v2017_v3 = vpop.f32.mrb[14].mxu1  ;;  %v10772_v49 = vld [vmem:[#allocation6 + $0x32c] ss:$16 sps:$4 sm:$0xff]   ;;  %v10773_v62 = vld [vmem:[#allocation6 + $0x340] ss:$16 sps:$4 sm:$0xff]  }
 0x246   :  { %v2206_v4 = vadd.f32 %v2189_v61, %v2014_v1  ;;  %v2018_v5 = vpop.f32.mrb[15].mxu1  ;;  %v10778_v61 = vld [vmem:[#allocation6 + $0x34c] ss:$16 sps:$4 sm:$0xff]   ;;  %v10781_v1 = vld [vmem:[#allocation6 + $0x364] ss:$16 sps:$4 sm:$0xff]  }
 0x247   :  { %v2207_v7 = vadd.f32 %v2193_v63, %v2016_v51  ;;  %v10776_v63 = vld [vmem:[#allocation6 + $0x348] ss:$16 sps:$4 sm:$0xff]   ;;  %v10784_v2 = vld [vmem:[#allocation6 + $0x36c] ss:$16 sps:$4 sm:$0xff]   ;;  %v10779_v51 = vld [vmem:[#allocation6 + $0x360] ss:$16 sps:$4 sm:$0xff]  }
 0x248   :  { %v2210_v6 = vmax.f32 %v2206_v4, 0.0  ;;  %v10782_v3 = vld [vmem:[#allocation6 + $0x368] ss:$16 sps:$4 sm:$0xff]   ;;  %v10787_v4 = vld [vmem:[#allocation6 + $0x384] ss:$16 sps:$4 sm:$0xff]  }
 0x249   :  { %v2211_v38 = vmax.f32 %v2207_v7, 0.0  ;;  %v10790_v5 = vld [vmem:[#allocation6 + $0x38c] ss:$16 sps:$4 sm:$0xff]   ;;  %v10785_v7 = vld [vmem:[#allocation6 + $0x380] ss:$16 sps:$4 sm:$0xff]  }
 0x24a   :  { %v2214_v12 = vpack.c.bf16 %v2210_v6, %v2210_v6  ;;  %v10788_v6 = vld [vmem:[#allocation6 + $0x388] ss:$16 sps:$4 sm:$0xff]  }
 0x24b   :  { %v2215_v9 = vpack.c.bf16 %v2211_v38, %v2211_v38  ;;  %v10793_v38 = vld [vmem:[#allocation6 + $0x3a4] ss:$16 sps:$4 sm:$0xff]  }
 0x24d   :  { %3040 = vmatprep.mubr.bf16.mxu0 %v2215_v9  ;;  %3122 = vmatprep.mubr.bf16.mxu1 %v2215_v9  ;;  %v10794_v9 = vld [vmem:[#allocation6 + $0x3a8] ss:$16 sps:$4 sm:$0xff]  }
 0x24e   :  { %3041 = vmatmul.mubr.bf16.vlgmr.msra.gmra.mrb[16].mxu0 %v2214_v12  ;;  %3123 = vmatmul.mubr.bf16.vlgmr.msra.gmra.mrb[24].mxu1 %v2214_v12  ;;  %v10797_v12 = vld [vmem:[#allocation6 + $0x3c0] ss:$16 sps:$4 sm:$0xff]  }
 0x24f   :  { %3050 = vmatpush1.bf16.msra.mxu0 %v10713_v8  ;;  %3132 = vmatpush1.bf16.msra.mxu1 %v10716_v50  ;;  %v10796_v8 = vld [vmem:[#allocation6 + $0x3ac] ss:$16 sps:$4 sm:$0xff]   ;;  %v10791_v50 = vld [vmem:[#allocation6 + $0x3a0] ss:$16 sps:$4 sm:$0xff]  }
 0x250   :  { %3051 = vmatprep.subr.bf16.mxu0 %v10721_v10  ;;  %3133 = vmatprep.subr.bf16.mxu1 %v10724_v11  ;;  %v10799_v10 = vld [vmem:[#allocation6 + $0x3c4] ss:$16 sps:$4 sm:$0xff]   ;;  %v10802_v11 = vld [vmem:[#allocation6 + $0x3cc] ss:$16 sps:$4 sm:$0xff]  }
 0x253   :  { %3052 = vmatpush1.bf16.msra.mxu0 %v10719_v13  ;;  %3134 = vmatpush1.bf16.msra.mxu1 %v10722_v14  ;;  %v10800_v13 = vld [vmem:[#allocation6 + $0x3c8] ss:$16 sps:$4 sm:$0xff]   ;;  %v10805_v14 = vld [vmem:[#allocation6 + $0x3e4] ss:$16 sps:$4 sm:$0xff]  }
 0x254   :  { %3053 = vmatprep.subr.bf16.mxu0 %v10727_v17  ;;  %3135 = vmatprep.subr.bf16.mxu1 %v10730_v18  ;;  %v10808_v17 = vld [vmem:[#allocation6 + $0x3ec] ss:$16 sps:$4 sm:$0xff]  }
 0x257   :  { %3054 = vmatpush1.bf16.msra.mxu0 %v10725_v19  ;;  %3136 = vmatpush1.bf16.msra.mxu1 %v10728_v16 }
 0x258   :  { %3055 = vmatprep.subr.bf16.mxu0 %v10733_v20  ;;  %3137 = vmatprep.subr.bf16.mxu1 %v10736_v21 }
 0x25b   :  { %3056 = vmatpush1.bf16.msra.mxu0 %v10731_v22  ;;  %3138 = vmatpush1.bf16.msra.mxu1 %v10734_v23  ;;  %v10803_v23 = vld [vmem:[#allocation6 + $0x3e0] ss:$16 sps:$4 sm:$0xff]  }
 0x25c   :  { %3057 = vmatprep.subr.bf16.mxu0 %v10739_v24  ;;  %3139 = vmatprep.subr.bf16.mxu1 %v10742_v25  ;;  %v10806_v24 = vld [vmem:[#allocation6 + $0x3e8] ss:$16 sps:$4 sm:$0xff]  }
 0x25f   :  { %3058 = vmatpush1.bf16.msra.mxu0 %v10737_v26  ;;  %3140 = vmatpush1.bf16.msra.mxu1 %v10740_v27 }
 0x260   :  { %3059 = vmatprep.subr.bf16.mxu0 %v10745_v28  ;;  %3141 = vmatprep.subr.bf16.mxu1 %v10748_v29  ;;  %v10811_v28 = vld [vmem:[#allocation7 + $0x4] ss:$16 sps:$4 sm:$0xff]   ;;  %v10814_v29 = vld [vmem:[#allocation7 + $0xc] ss:$16 sps:$4 sm:$0xff]  }
 0x263   :  { %3060 = vmatpush1.bf16.msra.mxu0 %v10743_v30  ;;  %3142 = vmatpush1.bf16.msra.mxu1 %v10746_v31 }
 0x264   :  { %3061 = vmatprep.subr.bf16.mxu0 %v10751_v32  ;;  %3143 = vmatprep.subr.bf16.mxu1 %v10754_v33  ;;  %v12570_v32 = vsub.s32 3, %v12541_v56 }
 0x265   :  { %v12558_v39 = vpop.f32.mrb[8].mxu0 }
 0x266   :  { %v12560_v15 = vpop.f32.mrb[9].mxu0 }
 0x267   :  { %v2099_v42 = vpop.f32.mrb[10].mxu0  ;;  %3062 = vmatpush1.bf16.msra.mxu0 %v10749_v34  ;;  %3144 = vmatpush1.bf16.msra.mxu1 %v10752_v35 }
 0x268   :  { %v2100_v45 = vpop.f32.mrb[11].mxu0  ;;  %3063 = vmatprep.subr.bf16.mxu0 %v10757_v36  ;;  %3145 = vmatprep.subr.bf16.mxu1 %v10760_v37 }
 0x26b   :  { %3064 = vmatpush1.bf16.msra.mxu0 %v10755_v40  ;;  %3146 = vmatpush1.bf16.msra.mxu1 %v10758_v41 }
 0x26c   :  { %3065 = vmatprep.subr.bf16.mxu0 %v10763_v43  ;;  %3147 = vmatprep.subr.bf16.mxu1 %v10766_v44 }
 0x26f   :  { %3066 = vmatpush1.bf16.msra.mxu0 %v10761_v46  ;;  %3148 = vmatpush1.bf16.msra.mxu1 %v10764_v47  ;;  %v10809_v47 = vld [vmem:[#allocation7] ss:$16 sps:$4 sm:$0xff]  }
 0x270   :  { %3067 = vmatprep.subr.bf16.mxu0 %v10769_v48  ;;  %3149 = vmatprep.subr.bf16.mxu1 %v10772_v49  ;;  %v10812_v48 = vld [vmem:[#allocation7 + $0x8] ss:$16 sps:$4 sm:$0xff]   ;;  %v10817_v49 = vld [vmem:[#allocation7 + $0x24] ss:$16 sps:$4 sm:$0xff]  }
 0x273   :  { %3068 = vmatpush1.bf16.msra.mxu0 %v10767_v52  ;;  %3150 = vmatpush1.bf16.msra.mxu1 %v10770_v53  ;;  %v10820_v52 = vld [vmem:[#allocation7 + $0x2c] ss:$16 sps:$4 sm:$0xff]  }
 0x274   :  { %3069 = vmatprep.subr.bf16.mxu0 %v10775_v54  ;;  %3151 = vmatprep.subr.bf16.mxu1 %v10778_v61  ;;  %v10815_v61 = vld [vmem:[#allocation7 + $0x20] ss:$16 sps:$4 sm:$0xff]  }
 0x277   :  { %3070 = vmatpush1.bf16.msra.mxu0 %v10773_v62  ;;  %3152 = vmatpush1.bf16.msra.mxu1 %v10776_v63  ;;  %v10818_v62 = vld [vmem:[#allocation7 + $0x28] ss:$16 sps:$4 sm:$0xff]   ;;  %v10826_v63 = vld [vmem:[#allocation7 + $0x4c] ss:$16 sps:$4 sm:$0xff]  }
 0x278   :  { %3071 = vmatprep.subr.bf16.mxu0 %v10781_v1  ;;  %3153 = vmatprep.subr.bf16.mxu1 %v10784_v2  ;;  %v10821_v1 = vld [vmem:[#allocation7 + $0x40] ss:$16 sps:$4 sm:$0xff]   ;;  %v10824_v2 = vld [vmem:[#allocation7 + $0x48] ss:$16 sps:$4 sm:$0xff]  }
 0x27b   :  { %3072 = vmatpush1.bf16.msra.mxu0 %v10779_v51  ;;  %3154 = vmatpush1.bf16.msra.mxu1 %v10782_v3  ;;  %v10829_v51 = vld [vmem:[#allocation7 + $0x64] ss:$16 sps:$4 sm:$0xff]   ;;  %v10832_v3 = vld [vmem:[#allocation7 + $0x6c] ss:$16 sps:$4 sm:$0xff]  }
 0x27c   :  { %3073 = vmatprep.subr.bf16.mxu0 %v10787_v4  ;;  %3155 = vmatprep.subr.bf16.mxu1 %v10790_v5  ;;  %v10827_v4 = vld [vmem:[#allocation7 + $0x60] ss:$16 sps:$4 sm:$0xff]   ;;  %v10830_v5 = vld [vmem:[#allocation7 + $0x68] ss:$16 sps:$4 sm:$0xff]  }
 0x27f   :  { %3074 = vmatpush1.bf16.msra.mxu0 %v10785_v7  ;;  %3156 = vmatpush1.bf16.msra.mxu1 %v10788_v6  ;;  %v10835_v7 = vld [vmem:[#allocation7 + $0x84] ss:$16 sps:$4 sm:$0xff]   ;;  %v10838_v6 = vld [vmem:[#allocation7 + $0x8c] ss:$16 sps:$4 sm:$0xff]  }
 0x280   :  { %3075 = vmatprep.subr.bf16.mxu0 %v10793_v38  ;;  %3157 = vmatprep.subr.bf16.mxu1 %v10796_v8  ;;  %v10833_v38 = vld [vmem:[#allocation7 + $0x80] ss:$16 sps:$4 sm:$0xff]   ;;  %v10836_v8 = vld [vmem:[#allocation7 + $0x88] ss:$16 sps:$4 sm:$0xff]  }
 0x283   :  { %v2054_v18 = vpop.f32.mrb[16].mxu1  ;;  %3076 = vmatpush1.bf16.msra.mxu0 %v10791_v50  ;;  %3158 = vmatpush1.bf16.msra.mxu1 %v10794_v9  ;;  %v10841_v50 = vld [vmem:[#allocation7 + $0xa4] ss:$16 sps:$4 sm:$0xff]   ;;  %v10844_v9 = vld [vmem:[#allocation7 + $0xac] ss:$16 sps:$4 sm:$0xff]  }
 0x284   :  { %v2055_v19 = vadd.f32 %v2054_v18, %v12528_v55  ;;  %v2056_v16 = vpop.f32.mrb[17].mxu1  ;;  %3077 = vmatprep.subr.bf16.mxu0 %v10799_v10  ;;  %3159 = vmatprep.subr.bf16.mxu1 %v10802_v11  ;;  %v10839_v10 = vld [vmem:[#allocation7 + $0xa0] ss:$16 sps:$4 sm:$0xff]   ;;  %v10842_v11 = vld [vmem:[#allocation7 + $0xa8] ss:$16 sps:$4 sm:$0xff]  }
 0x285   :  { %v2057_v20 = vadd.f32 %v2056_v16, %v12533_v59  ;;  %v2058_v21 = vpop.f32.mrb[18].mxu1  ;;  %v2177_v22 = vpop.f32.mrb[12].mxu0  ;;  %v12567_v59 = vsub.s32 2, %v12541_v56  ;;  %v10853_v18 = vld [vmem:[#allocation7 + $0xe4] ss:$16 sps:$4 sm:$0xff]  }
 0x286   :  { %v2096_v25 = vadd.f32 %v12558_v39, %v2055_v19  ;;  %v2059_v26 = vpop.f32.mrb[19].mxu1  ;;  %v2179_v27 = vpop.f32.mrb[13].mxu0  ;;  %v2201_v39 = vrot.slane %v12546_v57, %v12570_v32  ;;  %v10856_v19 = vld [vmem:[#allocation7 + $0xec] ss:$16 sps:$4 sm:$0xff]   ;;  %v10851_v16 = vld [vmem:[#allocation7 + $0xe0] ss:$16 sps:$4 sm:$0xff]  }
 0x287   :  { %v2098_v30 = vadd.f32 %v12560_v15, %v2057_v20  ;;  %v2181_v31 = vpop.f32.mrb[14].mxu0  ;;  %3078 = vmatpush1.bf16.msra.mxu0 %v10797_v12  ;;  %3160 = vmatpush1.bf16.msra.mxu1 %v10800_v13  ;;  %v2197_v35 = vrot.slane %v12546_v57, %v12567_v59  ;;  %v10823_v57 = vld [vmem:[#allocation7 + $0x44] ss:$16 sps:$4 sm:$0xff]   ;;  %v10850_v13 = vld [vmem:[#allocation7 + $0xcc] ss:$16 sps:$4 sm:$0xff]  }
 0x288   :  { %v2182_v55 = vpop.f32.mrb[15].mxu0  ;;  %3079 = vmatprep.subr.bf16.mxu0 %v10805_v14  ;;  %3161 = vmatprep.subr.bf16.mxu1 %v10808_v17  ;;  %v10847_v12 = vld [vmem:[#allocation7 + $0xc4] ss:$16 sps:$4 sm:$0xff]   ;;  %v10845_v14 = vld [vmem:[#allocation7 + $0xc0] ss:$16 sps:$4 sm:$0xff]  }
 0x289   :  { %v10848_v17 = vld [vmem:[#allocation7 + $0xc8] ss:$16 sps:$4 sm:$0xff]   ;;  %v10859_v21 = vld [vmem:[#allocation7 + $0x104] ss:$16 sps:$4 sm:$0xff]   ;;  %v10868_v26 = vld [vmem:[#allocation7 + $0x12c] ss:$16 sps:$4 sm:$0xff]  }
 0x28a   :  { %v10854_v20 = vld [vmem:[#allocation7 + $0xe8] ss:$16 sps:$4 sm:$0xff]   ;;  %v10869_v31 = vld [vmem:[#allocation7 + $0x140] ss:$16 sps:$4 sm:$0xff]  }
 0x28b   :  { %3080 = vmatpush1.bf16.msra.mxu0 %v10803_v23  ;;  %3162 = vmatpush1.bf16.msra.mxu1 %v10806_v24  ;;  %v10857_v23 = vld [vmem:[#allocation7 + $0x100] ss:$16 sps:$4 sm:$0xff]   ;;  %v10860_v24 = vld [vmem:[#allocation7 + $0x108] ss:$16 sps:$4 sm:$0xff]  }
 0x28c   :  { %3970 = vmatprep.subr.bf16.mxu0 %v10811_v28  ;;  %4052 = vmatprep.subr.bf16.mxu1 %v10814_v29  ;;  %v10866_v28 = vld [vmem:[#allocation7 + $0x128] ss:$16 sps:$4 sm:$0xff]   ;;  %v10871_v29 = vld [vmem:[#allocation7 + $0x144] ss:$16 sps:$4 sm:$0xff]  }
 0x28d   :  { %v10872_v55 = vld [vmem:[#allocation7 + $0x148] ss:$16 sps:$4 sm:$0xff]  }
 0x2c3   :  { %v2136_v33 = vpop.f32.mrb[20].mxu1 }
 0x2c4   :  { %v2137_v34 = vadd.f32 %v2136_v33, %v2096_v25  ;;  %v2138_v36 = vpop.f32.mrb[21].mxu1  ;;  %v10865_v25 = vld [vmem:[#allocation7 + $0x124] ss:$16 sps:$4 sm:$0xff]  }
 0x2c5   :  { %v2139_v37 = vadd.f32 %v2138_v36, %v2098_v30  ;;  %v2140_v15 = vpop.f32.mrb[22].mxu1  ;;  %v10874_v30 = vld [vmem:[#allocation7 + $0x14c] ss:$16 sps:$4 sm:$0xff]   ;;  %v10877_v33 = vld [vmem:[#allocation7 + $0x164] ss:$16 sps:$4 sm:$0xff]  }
 0x2c6   :  { %v2178_v40 = vadd.f32 %v2177_v22, %v2137_v34  ;;  %v2141_v41 = vpop.f32.mrb[23].mxu1  ;;  %v10862_v22 = vld [vmem:[#allocation7 + $0x10c] ss:$16 sps:$4 sm:$0xff]   ;;  %v10878_v36 = vld [vmem:[#allocation7 + $0x168] ss:$16 sps:$4 sm:$0xff]  }
 0x2c7   :  { %v2180_v42 = vadd.f32 %v2179_v27, %v2139_v37  ;;  %v10863_v27 = vld [vmem:[#allocation7 + $0x120] ss:$16 sps:$4 sm:$0xff]   ;;  %v10880_v34 = vld [vmem:[#allocation7 + $0x16c] ss:$16 sps:$4 sm:$0xff]   ;;  %v10883_v37 = vld [vmem:[#allocation7 + $0x184] ss:$16 sps:$4 sm:$0xff]  }
 0x2c8   :  { %v2208_v43 = vadd.f32 %v2197_v35, %v2178_v40  ;;  %v10875_v35 = vld [vmem:[#allocation7 + $0x160] ss:$16 sps:$4 sm:$0xff]   ;;  %v10884_v40 = vld [vmem:[#allocation7 + $0x188] ss:$16 sps:$4 sm:$0xff]   ;;  %v10889_v41 = vld [vmem:[#allocation7 + $0x1a4] ss:$16 sps:$4 sm:$0xff]  }
 0x2c9   :  { %v2209_v44 = vadd.f32 %v2201_v39, %v2180_v42  ;;  %v10886_v39 = vld [vmem:[#allocation7 + $0x18c] ss:$16 sps:$4 sm:$0xff]   ;;  %v10881_v15 = vld [vmem:[#allocation7 + $0x180] ss:$16 sps:$4 sm:$0xff]  }
 0x2ca   :  { %v2212_v45 = vmax.f32 %v2208_v43, 0.0  ;;  %v10892_v42 = vld [vmem:[#allocation7 + $0x1ac] ss:$16 sps:$4 sm:$0xff]   ;;  %v10887_v43 = vld [vmem:[#allocation7 + $0x1a0] ss:$16 sps:$4 sm:$0xff]  }
 0x2cb   :  { %v2213_v46 = vmax.f32 %v2209_v44, 0.0  ;;  %v10890_v44 = vld [vmem:[#allocation7 + $0x1a8] ss:$16 sps:$4 sm:$0xff]  }
 0x2cc   :  { %v2216_v54 = vpack.c.bf16 %v2212_v45, %v2212_v45  ;;  %v10895_v45 = vld [vmem:[#allocation7 + $0x1c4] ss:$16 sps:$4 sm:$0xff]  }
 0x2cd   :  { %v2217_v53 = vpack.c.bf16 %v2213_v46, %v2213_v46  ;;  %v10898_v46 = vld [vmem:[#allocation7 + $0x1cc] ss:$16 sps:$4 sm:$0xff]  }
 0x2cf   :  { %3081 = vmatprep.mubr.bf16.mxu0 %v2217_v53  ;;  %3163 = vmatprep.mubr.bf16.mxu1 %v2217_v53  ;;  %v10899_v53 = vld [vmem:[#allocation7 + $0x1e0] ss:$16 sps:$4 sm:$0xff]  }
 0x2d0   :  { %3082 = vmatmul.mubr.bf16.vlgmr.msra.gmra.mrb[16].mxu0 %v2216_v54  ;;  %3164 = vmatmul.mubr.bf16.vlgmr.msra.gmra.mrb[24].mxu1 %v2216_v54  ;;  %v10902_v54 = vld [vmem:[#allocation7 + $0x1e8] ss:$16 sps:$4 sm:$0xff]  }
 0x2d1   :  { %3971 = vmatpush1.bf16.msra.mxu0 %v10809_v47  ;;  %4053 = vmatpush1.bf16.msra.mxu1 %v10812_v48  ;;  %v10893_v47 = vld [vmem:[#allocation7 + $0x1c0] ss:$16 sps:$4 sm:$0xff]   ;;  %v10896_v48 = vld [vmem:[#allocation7 + $0x1c8] ss:$16 sps:$4 sm:$0xff]  }
 0x2d2   :  { %3972 = vmatprep.subr.bf16.mxu0 %v10817_v49  ;;  %4054 = vmatprep.subr.bf16.mxu1 %v10820_v52  ;;  %v10901_v49 = vld [vmem:[#allocation7 + $0x1e4] ss:$16 sps:$4 sm:$0xff]   ;;  %v10904_v52 = vld [vmem:[#allocation7 + $0x1ec] ss:$16 sps:$4 sm:$0xff]  }
 0x2d5   :  { %3973 = vmatpush1.bf16.msra.mxu0 %v10815_v61  ;;  %4055 = vmatpush1.bf16.msra.mxu1 %v10818_v62  ;;  %v10907_v61 = vld [vmem:[#allocation7 + $0x204] ss:$16 sps:$4 sm:$0xff]   ;;  %v10910_v62 = vld [vmem:[#allocation7 + $0x20c] ss:$16 sps:$4 sm:$0xff]  }
 0x2d6   :  { %3974 = vmatprep.subr.bf16.mxu0 %v10823_v57  ;;  %4056 = vmatprep.subr.bf16.mxu1 %v10826_v63  ;;  %v12579_v57 = vld [vmem:[%s12802_s25] sm:$0xf] }
 0x2d7   :  { %v2351_v63 = vrot.slane %v12579_v57, %v12549_v58 }
 0x2d9   :  { %3975 = vmatpush1.bf16.msra.mxu0 %v10821_v1  ;;  %4057 = vmatpush1.bf16.msra.mxu1 %v10824_v2  ;;  %v2355_v1 = vrot.slane %v12579_v57, %v12552_v60  ;;  %v2363_v2 = vrot.slane %v12579_v57, %v12570_v32 }
 0x2da   :  { %3976 = vmatprep.subr.bf16.mxu0 %v10829_v51  ;;  %4058 = vmatprep.subr.bf16.mxu1 %v10832_v3 }
 0x2dd   :  { %3977 = vmatpush1.bf16.msra.mxu0 %v10827_v4  ;;  %4059 = vmatpush1.bf16.msra.mxu1 %v10830_v5 }
 0x2de   :  { %3978 = vmatprep.subr.bf16.mxu0 %v10835_v7  ;;  %4060 = vmatprep.subr.bf16.mxu1 %v10838_v6 }
 0x2e1   :  { %3979 = vmatpush1.bf16.msra.mxu0 %v10833_v38  ;;  %4061 = vmatpush1.bf16.msra.mxu1 %v10836_v8 }
 0x2e2   :  { %3980 = vmatprep.subr.bf16.mxu0 %v10841_v50  ;;  %4062 = vmatprep.subr.bf16.mxu1 %v10844_v9 }
 0x2e5   :  { %3981 = vmatpush1.bf16.msra.mxu0 %v10839_v10  ;;  %4063 = vmatpush1.bf16.msra.mxu1 %v10842_v11 }
 0x2e6   :  { %3982 = vmatprep.subr.bf16.mxu0 %v10847_v12  ;;  %4064 = vmatprep.subr.bf16.mxu1 %v10850_v13 }
 0x2e9   :  { %3983 = vmatpush1.bf16.msra.mxu0 %v10845_v14  ;;  %4065 = vmatpush1.bf16.msra.mxu1 %v10848_v17  ;;  %v10905_v17 = vld [vmem:[#allocation7 + $0x200] ss:$16 sps:$4 sm:$0xff]  }
 0x2ea   :  { %3984 = vmatprep.subr.bf16.mxu0 %v10853_v18  ;;  %4066 = vmatprep.subr.bf16.mxu1 %v10856_v19  ;;  %v10908_v18 = vld [vmem:[#allocation7 + $0x208] ss:$16 sps:$4 sm:$0xff]  }
 0x2ed   :  { %3985 = vmatpush1.bf16.msra.mxu0 %v10851_v16  ;;  %4067 = vmatpush1.bf16.msra.mxu1 %v10854_v20  ;;  %v10913_v16 = vld [vmem:[#allocation7 + $0x224] ss:$16 sps:$4 sm:$0xff]   ;;  %v10916_v20 = vld [vmem:[#allocation7 + $0x22c] ss:$16 sps:$4 sm:$0xff]  }
 0x2ee   :  { %3986 = vmatprep.subr.bf16.mxu0 %v10859_v21  ;;  %4068 = vmatprep.subr.bf16.mxu1 %v10862_v22  ;;  %v10911_v22 = vld [vmem:[#allocation7 + $0x220] ss:$16 sps:$4 sm:$0xff]  }
 0x2f1   :  { %3987 = vmatpush1.bf16.msra.mxu0 %v10857_v23  ;;  %4069 = vmatpush1.bf16.msra.mxu1 %v10860_v24  ;;  %v10914_v23 = vld [vmem:[#allocation7 + $0x228] ss:$16 sps:$4 sm:$0xff]   ;;  %v10919_v24 = vld [vmem:[#allocation7 + $0x244] ss:$16 sps:$4 sm:$0xff]  }
 0x2f2   :  { %3988 = vmatprep.subr.bf16.mxu0 %v10865_v25  ;;  %4070 = vmatprep.subr.bf16.mxu1 %v10868_v26  ;;  %v10922_v25 = vld [vmem:[#allocation7 + $0x24c] ss:$16 sps:$4 sm:$0xff]   ;;  %v10917_v26 = vld [vmem:[#allocation7 + $0x240] ss:$16 sps:$4 sm:$0xff]  }
 0x2f5   :  { %3989 = vmatpush1.bf16.msra.mxu0 %v10863_v27  ;;  %4071 = vmatpush1.bf16.msra.mxu1 %v10866_v28  ;;  %v10920_v27 = vld [vmem:[#allocation7 + $0x248] ss:$16 sps:$4 sm:$0xff]   ;;  %v10925_v28 = vld [vmem:[#allocation7 + $0x264] ss:$16 sps:$4 sm:$0xff]  }
 0x2f6   :  { %3990 = vmatprep.subr.bf16.mxu0 %v10871_v29  ;;  %4072 = vmatprep.subr.bf16.mxu1 %v10874_v30  ;;  %v10928_v29 = vld [vmem:[#allocation7 + $0x26c] ss:$16 sps:$4 sm:$0xff]   ;;  %v10923_v30 = vld [vmem:[#allocation7 + $0x260] ss:$16 sps:$4 sm:$0xff]  }
 0x2f9   :  { %3991 = vmatpush1.bf16.msra.mxu0 %v10869_v31  ;;  %4073 = vmatpush1.bf16.msra.mxu1 %v10872_v55  ;;  %v10926_v31 = vld [vmem:[#allocation7 + $0x268] ss:$16 sps:$4 sm:$0xff]   ;;  %v10931_v55 = vld [vmem:[#allocation7 + $0x284] ss:$16 sps:$4 sm:$0xff]  }
 0x2fa   :  { %3992 = vmatprep.subr.bf16.mxu0 %v10877_v33  ;;  %4074 = vmatprep.subr.bf16.mxu1 %v10880_v34  ;;  %v10934_v33 = vld [vmem:[#allocation7 + $0x28c] ss:$16 sps:$4 sm:$0xff]   ;;  %v10929_v34 = vld [vmem:[#allocation7 + $0x280] ss:$16 sps:$4 sm:$0xff]  }
 0x2fd   :  { %3993 = vmatpush1.bf16.msra.mxu0 %v10875_v35  ;;  %4075 = vmatpush1.bf16.msra.mxu1 %v10878_v36  ;;  %v10932_v35 = vld [vmem:[#allocation7 + $0x288] ss:$16 sps:$4 sm:$0xff]   ;;  %v10937_v36 = vld [vmem:[#allocation7 + $0x2a4] ss:$16 sps:$4 sm:$0xff]  }
 0x2fe   :  { %3994 = vmatprep.subr.bf16.mxu0 %v10883_v37  ;;  %4076 = vmatprep.subr.bf16.mxu1 %v10886_v39  ;;  %v10940_v37 = vld [vmem:[#allocation7 + $0x2ac] ss:$16 sps:$4 sm:$0xff]   ;;  %v10935_v39 = vld [vmem:[#allocation7 + $0x2a0] ss:$16 sps:$4 sm:$0xff]  }
 0x301   :  { %3995 = vmatpush1.bf16.msra.mxu0 %v10881_v15  ;;  %4077 = vmatpush1.bf16.msra.mxu1 %v10884_v40  ;;  %v10938_v15 = vld [vmem:[#allocation7 + $0x2a8] ss:$16 sps:$4 sm:$0xff]   ;;  %v10943_v40 = vld [vmem:[#allocation7 + $0x2c4] ss:$16 sps:$4 sm:$0xff]  }
 0x302   :  { %3996 = vmatprep.subr.bf16.mxu0 %v10889_v41  ;;  %4078 = vmatprep.subr.bf16.mxu1 %v10892_v42  ;;  %v10946_v41 = vld [vmem:[#allocation7 + $0x2cc] ss:$16 sps:$4 sm:$0xff]   ;;  %v10941_v42 = vld [vmem:[#allocation7 + $0x2c0] ss:$16 sps:$4 sm:$0xff]  }
 0x305   :  { %3997 = vmatpush1.bf16.msra.mxu0 %v10887_v43  ;;  %4079 = vmatpush1.bf16.msra.mxu1 %v10890_v44  ;;  %v10944_v43 = vld [vmem:[#allocation7 + $0x2c8] ss:$16 sps:$4 sm:$0xff]   ;;  %v10949_v44 = vld [vmem:[#allocation7 + $0x2e4] ss:$16 sps:$4 sm:$0xff]  }
 0x306   :  { %3998 = vmatprep.subr.bf16.mxu0 %v10895_v45  ;;  %4080 = vmatprep.subr.bf16.mxu1 %v10898_v46  ;;  %v10952_v45 = vld [vmem:[#allocation7 + $0x2ec] ss:$16 sps:$4 sm:$0xff]   ;;  %v10947_v46 = vld [vmem:[#allocation7 + $0x2e0] ss:$16 sps:$4 sm:$0xff]  }
 0x309   :  { %3999 = vmatpush1.bf16.msra.mxu0 %v10893_v47  ;;  %4081 = vmatpush1.bf16.msra.mxu1 %v10896_v48  ;;  %v10950_v47 = vld [vmem:[#allocation7 + $0x2e8] ss:$16 sps:$4 sm:$0xff]   ;;  %v10955_v48 = vld [vmem:[#allocation7 + $0x304] ss:$16 sps:$4 sm:$0xff]  }
 0x30a   :  { %4000 = vmatprep.subr.bf16.mxu0 %v10901_v49  ;;  %4082 = vmatprep.subr.bf16.mxu1 %v10904_v52  ;;  %v10958_v49 = vld [vmem:[#allocation7 + $0x30c] ss:$16 sps:$4 sm:$0xff]   ;;  %v10953_v52 = vld [vmem:[#allocation7 + $0x300] ss:$16 sps:$4 sm:$0xff]  }
 0x30d   :  { %4001 = vmatpush1.bf16.msra.mxu0 %v10899_v53  ;;  %4083 = vmatpush1.bf16.msra.mxu1 %v10902_v54  ;;  %v10956_v53 = vld [vmem:[#allocation7 + $0x308] ss:$16 sps:$4 sm:$0xff]   ;;  %v10961_v54 = vld [vmem:[#allocation7 + $0x324] ss:$16 sps:$4 sm:$0xff]  }
 0x30e   :  { %4011 = vmatprep.subr.bf16.mxu0 %v10907_v61  ;;  %4093 = vmatprep.subr.bf16.mxu1 %v10910_v62  ;;  %v10964_v61 = vld [vmem:[#allocation7 + $0x32c] ss:$16 sps:$4 sm:$0xff]   ;;  %v10959_v62 = vld [vmem:[#allocation7 + $0x320] ss:$16 sps:$4 sm:$0xff]  }
 0x3a3   :  { %v3083_v51 = vpop.f32.mrb[16].mxu0  ;;  %v12587_v3 = vpop.f32.mrb[24].mxu1 }
 0x3a4   :  { %v10137_v4 = vadd.f32 %v3083_v51, %v2351_v63  ;;  %v3085_v5 = vpop.f32.mrb[17].mxu0  ;;  %v3167_v7 = vpop.f32.mrb[25].mxu1  ;;  %v10962_v63 = vld [vmem:[#allocation7 + $0x328] ss:$16 sps:$4 sm:$0xff]   ;;  %v10965_v51 = vld [vmem:[#allocation7 + $0x340] ss:$16 sps:$4 sm:$0xff]  }
 0x3a5   :  { %v10138_v6 = vadd.f32 %v3085_v5, %v2355_v1  ;;  %v10140_v38 = vadd.f32 %v3167_v7, %v2363_v2  ;;  %v3087_v8 = vpop.f32.mrb[18].mxu0  ;;  %v3169_v50 = vpop.f32.mrb[26].mxu1  ;;  %v10967_v1 = vld [vmem:[#allocation7 + $0x344] ss:$16 sps:$4 sm:$0xff]   ;;  %v10970_v2 = vld [vmem:[#allocation7 + $0x34c] ss:$16 sps:$4 sm:$0xff]  }
 0x3a6   :  { %v3172_v9 = vmax.f32 %v10137_v4, 0.0  ;;  %v3088_v10 = vpop.f32.mrb[19].mxu0  ;;  %v3170_v11 = vpop.f32.mrb[27].mxu1  ;;  %v10968_v4 = vld [vmem:[#allocation7 + $0x348] ss:$16 sps:$4 sm:$0xff]  }
 0x3a7   :  { %v3173_v12 = vmax.f32 %v10138_v6, 0.0  ;;  %v3175_v13 = vmax.f32 %v10140_v38, 0.0  ;;  %v10973_v5 = vld [vmem:[#allocation7 + $0x364] ss:$16 sps:$4 sm:$0xff]   ;;  %v10976_v7 = vld [vmem:[#allocation7 + $0x36c] ss:$16 sps:$4 sm:$0xff]  }
 0x3a8   :  { %v3176_v19 = vpack.c.bf16 %v3172_v9, %v3172_v9  ;;  %v10971_v6 = vld [vmem:[#allocation7 + $0x360] ss:$16 sps:$4 sm:$0xff]   ;;  %v10974_v38 = vld [vmem:[#allocation7 + $0x368] ss:$16 sps:$4 sm:$0xff]   ;;  %v10979_v8 = vld [vmem:[#allocation7 + $0x384] ss:$16 sps:$4 sm:$0xff]  }
 0x3a9   :  { %v3177_v14 = vpack.c.bf16 %v3173_v12, %v3173_v12  ;;  %v3179_v21 = vpack.c.bf16 %v3175_v13, %v3175_v13  ;;  %v10982_v50 = vld [vmem:[#allocation7 + $0x38c] ss:$16 sps:$4 sm:$0xff]   ;;  %v10977_v9 = vld [vmem:[#allocation7 + $0x380] ss:$16 sps:$4 sm:$0xff]   ;;  %v10980_v10 = vld [vmem:[#allocation7 + $0x388] ss:$16 sps:$4 sm:$0xff]  }
 0x3aa   :  { %v10985_v11 = vld [vmem:[#allocation7 + $0x3a4] ss:$16 sps:$4 sm:$0xff]   ;;  %v10988_v12 = vld [vmem:[#allocation7 + $0x3ac] ss:$16 sps:$4 sm:$0xff]   ;;  %v10983_v13 = vld [vmem:[#allocation7 + $0x3a0] ss:$16 sps:$4 sm:$0xff]  }
 0x3ab   :  { %4002 = vmatprep.mubr.bf16.mxu0 %v3177_v14  ;;  %4084 = vmatprep.mubr.bf16.mxu1 %v3177_v14  ;;  %v10986_v14 = vld [vmem:[#allocation7 + $0x3a8] ss:$16 sps:$4 sm:$0xff]  }
 0x3ac   :  { %4003 = vmatmul.mubr.bf16.vlgmr.msra.gmra.mrb[20].mxu0 %v3176_v19  ;;  %4085 = vmatmul.mubr.bf16.vlgmr.msra.gmra.mrb[28].mxu1 %v3176_v19  ;;  %v10994_v19 = vld [vmem:[#allocation7 + $0x3cc] ss:$16 sps:$4 sm:$0xff]  }
 0x3ad   :  { %4012 = vmatpush1.bf16.msra.mxu0 %v10905_v17  ;;  %4094 = vmatpush1.bf16.msra.mxu1 %v10908_v18  ;;  %v2359_v17 = vrot.slane %v12579_v57, %v12567_v59  ;;  %v10991_v18 = vld [vmem:[#allocation7 + $0x3c4] ss:$16 sps:$4 sm:$0xff]  }
 0x3ae   :  { %4043 = vmatprep.mubr.bf16.mxu0 %v3179_v21  ;;  %4125 = vmatprep.mubr.bf16.mxu1 %v3179_v21  ;;  %v11003_v57 = vld [vmem:[#allocation9 + $0x4] ss:$8 sps:$4 sm:$0xff]  }
 0x3af   :  { %4013 = vmatprep.subr.bf16.mxu0 %v10913_v16  ;;  %4095 = vmatprep.subr.bf16.mxu1 %v10916_v20  ;;  %v10989_v16 = vld [vmem:[#allocation7 + $0x3c0] ss:$16 sps:$4 sm:$0xff]   ;;  %v10992_v20 = vld [vmem:[#allocation7 + $0x3c8] ss:$16 sps:$4 sm:$0xff]   ;;  %v10139_v21 = vadd.f32 %v12587_v3, %v2359_v17 }
 0x3b0   :  { %v11004_v3 = vld [vmem:[#allocation9 + $0x10] ss:$8 sps:$4 sm:$0xff]  }
 0x3b1   :  { %4014 = vmatpush1.bf16.msra.mxu0 %v10911_v22  ;;  %4096 = vmatpush1.bf16.msra.mxu1 %v10914_v23  ;;  %v10997_v22 = vld [vmem:[#allocation7 + $0x3e4] ss:$16 sps:$4 sm:$0xff]   ;;  %v11000_v23 = vld [vmem:[#allocation7 + $0x3ec] ss:$16 sps:$4 sm:$0xff]   ;;  %v11115_v17 = vld [vmem:[#allocation12 + $0xc0] ss:$16 sps:$4 sm:$0xff]  }
 0x3b2   :  { %4015 = vmatprep.subr.bf16.mxu0 %v10919_v24  ;;  %4097 = vmatprep.subr.bf16.mxu1 %v10922_v25  ;;  %v10995_v24 = vld [vmem:[#allocation7 + $0x3e0] ss:$16 sps:$4 sm:$0xff]   ;;  %v10998_v25 = vld [vmem:[#allocation7 + $0x3e8] ss:$16 sps:$4 sm:$0xff]  }
 0x3b5   :  { %4016 = vmatpush1.bf16.msra.mxu0 %v10917_v26  ;;  %4098 = vmatpush1.bf16.msra.mxu1 %v10920_v27  ;;  %v3174_v26 = vmax.f32 %v10139_v21, 0.0  ;;  %v11001_v27 = vld [vmem:[#allocation9] ss:$8 sps:$4 sm:$0xff]   ;;  %v11126_v21 = vld [vmem:[#allocation12 + $0x2c] ss:$16 sps:$4 sm:$0xff]  }
 0x3b6   :  { %4017 = vmatprep.subr.bf16.mxu0 %v10925_v28  ;;  %4099 = vmatprep.subr.bf16.mxu1 %v10928_v29  ;;  %v11006_v29 = vld [vmem:[#allocation9 + $0x14] ss:$8 sps:$4 sm:$0xff]  }
 0x3b7   :  { %v3178_v28 = vpack.c.bf16 %v3174_v26, %v3174_v26  ;;  %v11132_v26 = vld [vmem:[#allocation12 + $0x6c] ss:$16 sps:$4 sm:$0xff]  }
 0x3b9   :  { %4018 = vmatpush1.bf16.msra.mxu0 %v10923_v30  ;;  %4100 = vmatpush1.bf16.msra.mxu1 %v10926_v31  ;;  %v11009_v30 = vld [vmem:[#allocation9 + $0x24] ss:$8 sps:$4 sm:$0xff]   ;;  %v11007_v31 = vld [vmem:[#allocation9 + $0x20] ss:$8 sps:$4 sm:$0xff]  }
 0x3ba   :  { %4019 = vmatprep.subr.bf16.mxu0 %v10931_v55  ;;  %4101 = vmatprep.subr.bf16.mxu1 %v10934_v33  ;;  %v11012_v55 = vld [vmem:[#allocation9 + $0x34] ss:$8 sps:$4 sm:$0xff]   ;;  %v11010_v33 = vld [vmem:[#allocation9 + $0x30] ss:$8 sps:$4 sm:$0xff]  }
 0x3bd   :  { %4020 = vmatpush1.bf16.msra.mxu0 %v10929_v34  ;;  %4102 = vmatpush1.bf16.msra.mxu1 %v10932_v35  ;;  %v11015_v34 = vld [vmem:[#allocation9 + $0x44] ss:$8 sps:$4 sm:$0xff]   ;;  %v11013_v35 = vld [vmem:[#allocation9 + $0x40] ss:$8 sps:$4 sm:$0xff]  }
 0x3be   :  { %4021 = vmatprep.subr.bf16.mxu0 %v10937_v36  ;;  %4103 = vmatprep.subr.bf16.mxu1 %v10940_v37  ;;  %v11018_v36 = vld [vmem:[#allocation9 + $0x54] ss:$8 sps:$4 sm:$0xff]   ;;  %v11016_v37 = vld [vmem:[#allocation9 + $0x50] ss:$8 sps:$4 sm:$0xff]  }
 0x3c1   :  { %4022 = vmatpush1.bf16.msra.mxu0 %v10935_v39  ;;  %4104 = vmatpush1.bf16.msra.mxu1 %v10938_v15  ;;  %v11021_v39 = vld [vmem:[#allocation9 + $0x64] ss:$8 sps:$4 sm:$0xff]   ;;  %v11019_v15 = vld [vmem:[#allocation9 + $0x60] ss:$8 sps:$4 sm:$0xff]  }
 0x3c2   :  { %4023 = vmatprep.subr.bf16.mxu0 %v10943_v40  ;;  %4105 = vmatprep.subr.bf16.mxu1 %v10946_v41  ;;  %v11024_v40 = vld [vmem:[#allocation9 + $0x74] ss:$8 sps:$4 sm:$0xff]   ;;  %v11022_v41 = vld [vmem:[#allocation9 + $0x70] ss:$8 sps:$4 sm:$0xff]  }
 0x3c5   :  { %4024 = vmatpush1.bf16.msra.mxu0 %v10941_v42  ;;  %4106 = vmatpush1.bf16.msra.mxu1 %v10944_v43  ;;  %v11027_v42 = vld [vmem:[#allocation9 + $0x84] ss:$8 sps:$4 sm:$0xff]   ;;  %v11025_v43 = vld [vmem:[#allocation9 + $0x80] ss:$8 sps:$4 sm:$0xff]  }
 0x3c6   :  { %4025 = vmatprep.subr.bf16.mxu0 %v10949_v44  ;;  %4107 = vmatprep.subr.bf16.mxu1 %v10952_v45  ;;  %v11030_v44 = vld [vmem:[#allocation9 + $0x94] ss:$8 sps:$4 sm:$0xff]   ;;  %v11028_v45 = vld [vmem:[#allocation9 + $0x90] ss:$8 sps:$4 sm:$0xff]  }
 0x3c9   :  { %4026 = vmatpush1.bf16.msra.mxu0 %v10947_v46  ;;  %4108 = vmatpush1.bf16.msra.mxu1 %v10950_v47  ;;  %v11033_v46 = vld [vmem:[#allocation9 + $0xa4] ss:$8 sps:$4 sm:$0xff]   ;;  %v11031_v47 = vld [vmem:[#allocation9 + $0xa0] ss:$8 sps:$4 sm:$0xff]  }
 0x3ca   :  { %4027 = vmatprep.subr.bf16.mxu0 %v10955_v48  ;;  %4109 = vmatprep.subr.bf16.mxu1 %v10958_v49  ;;  %v11036_v48 = vld [vmem:[#allocation9 + $0xb4] ss:$8 sps:$4 sm:$0xff]   ;;  %v11034_v49 = vld [vmem:[#allocation9 + $0xb0] ss:$8 sps:$4 sm:$0xff]  }
 0x3cd   :  { %4028 = vmatpush1.bf16.msra.mxu0 %v10953_v52  ;;  %4110 = vmatpush1.bf16.msra.mxu1 %v10956_v53  ;;  %v11039_v52 = vld [vmem:[#allocation9 + $0xc4] ss:$8 sps:$4 sm:$0xff]   ;;  %v11037_v53 = vld [vmem:[#allocation9 + $0xc0] ss:$8 sps:$4 sm:$0xff]  }
 0x3ce   :  { %4029 = vmatprep.subr.bf16.mxu0 %v10961_v54  ;;  %4111 = vmatprep.subr.bf16.mxu1 %v10964_v61  ;;  %v11042_v54 = vld [vmem:[#allocation9 + $0xd4] ss:$8 sps:$4 sm:$0xff]   ;;  %v11040_v61 = vld [vmem:[#allocation9 + $0xd0] ss:$8 sps:$4 sm:$0xff]  }
 0x3d1   :  { %4030 = vmatpush1.bf16.msra.mxu0 %v10959_v62  ;;  %4112 = vmatpush1.bf16.msra.mxu1 %v10962_v63  ;;  %v11045_v62 = vld [vmem:[#allocation9 + $0xe4] ss:$8 sps:$4 sm:$0xff]   ;;  %v11043_v63 = vld [vmem:[#allocation9 + $0xe0] ss:$8 sps:$4 sm:$0xff]  }
 0x3d2   :  { %4031 = vmatprep.subr.bf16.mxu0 %v10967_v1  ;;  %4113 = vmatprep.subr.bf16.mxu1 %v10970_v2  ;;  %v11048_v1 = vld [vmem:[#allocation9 + $0xf4] ss:$8 sps:$4 sm:$0xff]   ;;  %v11046_v2 = vld [vmem:[#allocation9 + $0xf0] ss:$8 sps:$4 sm:$0xff]  }
 0x3d5   :  { %4032 = vmatpush1.bf16.msra.mxu0 %v10965_v51  ;;  %4114 = vmatpush1.bf16.msra.mxu1 %v10968_v4  ;;  %v11051_v51 = vld [vmem:[#allocation9 + $0x104] ss:$8 sps:$4 sm:$0xff]   ;;  %v11097_v4 = vld [vmem:[#allocation12] ss:$16 sps:$4 sm:$0xff]  }
 0x3d6   :  { %4033 = vmatprep.subr.bf16.mxu0 %v10973_v5  ;;  %4115 = vmatprep.subr.bf16.mxu1 %v10976_v7  ;;  %v11099_v5 = vld [vmem:[#allocation12 + $0x4] ss:$16 sps:$4 sm:$0xff]  }
 0x3d7   :  { %v11102_v7 = vld [vmem:[#allocation12 + $0x24] ss:$16 sps:$4 sm:$0xff]  }
 0x3d9   :  { %4034 = vmatpush1.bf16.msra.mxu0 %v10971_v6  ;;  %4116 = vmatpush1.bf16.msra.mxu1 %v10974_v38  ;;  %v11100_v6 = vld [vmem:[#allocation12 + $0x20] ss:$16 sps:$4 sm:$0xff]   ;;  %v11105_v38 = vld [vmem:[#allocation12 + $0x44] ss:$16 sps:$4 sm:$0xff]  }
 0x3da   :  { %4035 = vmatprep.subr.bf16.mxu0 %v10979_v8  ;;  %4117 = vmatprep.subr.bf16.mxu1 %v10982_v50  ;;  %v11103_v8 = vld [vmem:[#allocation12 + $0x40] ss:$16 sps:$4 sm:$0xff]   ;;  %v11108_v50 = vld [vmem:[#allocation12 + $0x64] ss:$16 sps:$4 sm:$0xff]  }
 0x3dd   :  { %4036 = vmatpush1.bf16.msra.mxu0 %v10977_v9  ;;  %4118 = vmatpush1.bf16.msra.mxu1 %v10980_v10  ;;  %v11106_v9 = vld [vmem:[#allocation12 + $0x60] ss:$16 sps:$4 sm:$0xff]   ;;  %v11111_v10 = vld [vmem:[#allocation12 + $0x84] ss:$16 sps:$4 sm:$0xff]  }
 0x3de   :  { %4037 = vmatprep.subr.bf16.mxu0 %v10985_v11  ;;  %4119 = vmatprep.subr.bf16.mxu1 %v10988_v12  ;;  %v11109_v11 = vld [vmem:[#allocation12 + $0x80] ss:$16 sps:$4 sm:$0xff]   ;;  %v11114_v12 = vld [vmem:[#allocation12 + $0xa4] ss:$16 sps:$4 sm:$0xff]  }
 0x3e1   :  { %4038 = vmatpush1.bf16.msra.mxu0 %v10983_v13  ;;  %4120 = vmatpush1.bf16.msra.mxu1 %v10986_v14  ;;  %v11112_v13 = vld [vmem:[#allocation12 + $0xa0] ss:$16 sps:$4 sm:$0xff]   ;;  %v11117_v14 = vld [vmem:[#allocation12 + $0xc4] ss:$16 sps:$4 sm:$0xff]  }
 0x3e2   :  { %4039 = vmatprep.subr.bf16.mxu0 %v10991_v18  ;;  %4121 = vmatprep.subr.bf16.mxu1 %v10994_v19  ;;  %v11120_v18 = vld [vmem:[#allocation12 + $0xe4] ss:$16 sps:$4 sm:$0xff]   ;;  %v11118_v19 = vld [vmem:[#allocation12 + $0xe0] ss:$16 sps:$4 sm:$0xff]  }
 0x3e5   :  { %4040 = vmatpush1.bf16.msra.mxu0 %v10989_v16  ;;  %4122 = vmatpush1.bf16.msra.mxu1 %v10992_v20  ;;  %v11123_v16 = vld [vmem:[#allocation12 + $0xc] ss:$16 sps:$4 sm:$0xff]   ;;  %v11121_v20 = vld [vmem:[#allocation12 + $0x8] ss:$16 sps:$4 sm:$0xff]  }
 0x3e6   :  { %4041 = vmatprep.subr.bf16.mxu0 %v10997_v22  ;;  %4123 = vmatprep.subr.bf16.mxu1 %v11000_v23  ;;  %v12596_v22 = vld [vmem:[%s12799_s5] sm:$0xf]  ;;  %v11124_v23 = vld [vmem:[#allocation12 + $0x28] ss:$16 sps:$4 sm:$0xff]  }
 0x3e9   :  { %4042 = vmatpush1.bf16.msra.mxu0 %v10995_v24  ;;  %4124 = vmatpush1.bf16.msra.mxu1 %v10998_v25  ;;  %v11129_v24 = vld [vmem:[#allocation12 + $0x4c] ss:$16 sps:$4 sm:$0xff]   ;;  %v11127_v25 = vld [vmem:[#allocation12 + $0x48] ss:$16 sps:$4 sm:$0xff]  }
 0x3ea   :  { %4538 = vmatprep.subr.bf16.mxu0 %v11003_v57  ;;  %4851 = vmatprep.subr.bf16.mxu1 %v11099_v5  ;;  %v11130_v57 = vld [vmem:[#allocation12 + $0x68] ss:$16 sps:$4 sm:$0xff]  }
 0x3eb   :  { %v11052_v5 = vld [vmem:[#allocation9 + $0x110] ss:$8 sps:$4 sm:$0xff]  }
 0x3ec   :  { %4044 = vmatmul.mubr.bf16.vlgmr.msra.gmra.mrb[20].mxu0 %v3178_v28  ;;  %4126 = vmatmul.mubr.bf16.vlgmr.msra.gmra.mrb[28].mxu1 %v3178_v28  ;;  %v11133_v28 = vld [vmem:[#allocation12 + $0x88] ss:$16 sps:$4 sm:$0xff]  }
 0x3ed   :  { %4539 = vmatpush1.bf16.msra.mxu0 %v11001_v27  ;;  %4883 = vmatprep.mubr.bf16.mxu1 %v12176_v0  ;;  %v11135_v27 = vld [vmem:[#allocation12 + $0x8c] ss:$16 sps:$4 sm:$0xff]  }
 0x3ee   :  { %4540 = vmatprep.subr.bf16.mxu0 %v11006_v29  ;;  %4852 = vmatpush1.bf16.msra.mxu1 %v11097_v4  ;;  %v11138_v29 = vld [vmem:[#allocation12 + $0xac] ss:$16 sps:$4 sm:$0xff]   ;;  %v11150_v4 = vld [vmem:[#allocation10 + $0x24] ss:$16 sps:$4 sm:$0xff]  }
 0x3ef   :  { %4853 = vmatprep.subr.bf16.mxu1 %v11102_v7  ;;  %v11057_v7 = vld [vmem:[#allocation9 + $0x124] ss:$8 sps:$4 sm:$0xff]  }
 0x3f1   :  { %4541 = vmatpush1.bf16.msra.mxu0 %v11004_v3  ;;  %v12603_v3 = vld [vmem:[%s12766_s9] sm:$0xf] }
 0x3f2   :  { %4542 = vmatprep.subr.bf16.mxu0 %v11009_v30  ;;  %4854 = vmatpush1.bf16.msra.mxu1 %v11100_v6  ;;  %v11136_v30 = vld [vmem:[#allocation12 + $0xa8] ss:$16 sps:$4 sm:$0xff]   ;;  %v11148_v6 = vld [vmem:[#allocation10 + $0x20] ss:$16 sps:$4 sm:$0xff]  }
 0x3f3   :  { %4855 = vmatprep.subr.bf16.mxu1 %v11105_v38  ;;  %v11055_v38 = vld [vmem:[#allocation9 + $0x120] ss:$8 sps:$4 sm:$0xff]  }
 0x3f5   :  { %4543 = vmatpush1.bf16.msra.mxu0 %v11007_v31  ;;  %v3313_v31 = vrot.slane %v12603_v3, %v12549_v58 }
 0x3f6   :  { %4544 = vmatprep.subr.bf16.mxu0 %v11012_v55  ;;  %4856 = vmatpush1.bf16.msra.mxu1 %v11103_v8  ;;  %v11141_v55 = vld [vmem:[#allocation12 + $0xcc] ss:$16 sps:$4 sm:$0xff]  }
 0x3f7   :  { %4857 = vmatprep.subr.bf16.mxu1 %v11108_v50  ;;  %v11060_v8 = vld [vmem:[#allocation9 + $0x134] ss:$8 sps:$4 sm:$0xff]   ;;  %v11058_v50 = vld [vmem:[#allocation9 + $0x130] ss:$8 sps:$4 sm:$0xff]  }
 0x3f9   :  { %4545 = vmatpush1.bf16.msra.mxu0 %v11010_v33  ;;  %v3317_v33 = vrot.slane %v12603_v3, %v12552_v60 }
 0x3fa   :  { %4546 = vmatprep.subr.bf16.mxu0 %v11015_v34  ;;  %4858 = vmatpush1.bf16.msra.mxu1 %v11106_v9  ;;  %v3325_v34 = vrot.slane %v12603_v3, %v12570_v32  ;;  %v11063_v9 = vld [vmem:[#allocation9 + $0x144] ss:$8 sps:$4 sm:$0xff]  }
 0x3fb   :  { %4859 = vmatprep.subr.bf16.mxu1 %v11111_v10  ;;  %v11061_v10 = vld [vmem:[#allocation9 + $0x140] ss:$8 sps:$4 sm:$0xff]  }
 0x3fd   :  { %4547 = vmatpush1.bf16.msra.mxu0 %v11013_v35 }
 0x3fe   :  { %4548 = vmatprep.subr.bf16.mxu0 %v11018_v36  ;;  %4860 = vmatpush1.bf16.msra.mxu1 %v11109_v11  ;;  %v11066_v11 = vld [vmem:[#allocation9 + $0x154] ss:$8 sps:$4 sm:$0xff]  }
 0x3ff   :  { %4861 = vmatprep.subr.bf16.mxu1 %v11114_v12  ;;  %v11064_v12 = vld [vmem:[#allocation9 + $0x150] ss:$8 sps:$4 sm:$0xff]  }
 0x401   :  { %4549 = vmatpush1.bf16.msra.mxu0 %v11016_v37  ;;  %v11139_v37 = vld [vmem:[#allocation12 + $0xc8] ss:$16 sps:$4 sm:$0xff]  }
 0x402   :  { %4550 = vmatprep.subr.bf16.mxu0 %v11021_v39  ;;  %4862 = vmatpush1.bf16.msra.mxu1 %v11112_v13  ;;  %v11069_v13 = vld [vmem:[#allocation9 + $0x164] ss:$8 sps:$4 sm:$0xff]  }
 0x403   :  { %4863 = vmatprep.subr.bf16.mxu1 %v11117_v14  ;;  %v11067_v14 = vld [vmem:[#allocation9 + $0x160] ss:$8 sps:$4 sm:$0xff]  }
 0x405   :  { %4551 = vmatpush1.bf16.msra.mxu0 %v11019_v15 }
 0x406   :  { %4552 = vmatprep.subr.bf16.mxu0 %v11024_v40  ;;  %4864 = vmatpush1.bf16.msra.mxu1 %v11115_v17  ;;  %v11072_v17 = vld [vmem:[#allocation9 + $0x174] ss:$8 sps:$4 sm:$0xff]  }
 0x407   :  { %4865 = vmatprep.subr.bf16.mxu1 %v11120_v18  ;;  %v11070_v18 = vld [vmem:[#allocation9 + $0x170] ss:$8 sps:$4 sm:$0xff]  }
 0x409   :  { %4553 = vmatpush1.bf16.msra.mxu0 %v11022_v41  ;;  %v11144_v41 = vld [vmem:[#allocation12 + $0xec] ss:$16 sps:$4 sm:$0xff]  }
 0x40a   :  { %4554 = vmatprep.subr.bf16.mxu0 %v11027_v42  ;;  %4866 = vmatpush1.bf16.msra.mxu1 %v11118_v19  ;;  %v11075_v19 = vld [vmem:[#allocation9 + $0x184] ss:$8 sps:$4 sm:$0xff]  }
 0x40b   :  { %4892 = vmatprep.subr.bf16.mxu1 %v11123_v16  ;;  %v11073_v16 = vld [vmem:[#allocation9 + $0x180] ss:$8 sps:$4 sm:$0xff]  }
 0x40d   :  { %4555 = vmatpush1.bf16.msra.mxu0 %v11025_v43  ;;  %4884 = vmatmul.mubr.bf16.vlgmr.msra.gmra.mrb[32].mxu1 %v12596_v22 }
 0x40e   :  { %4556 = vmatprep.subr.bf16.mxu0 %v11030_v44  ;;  %4893 = vmatpush1.bf16.msra.mxu1 %v11121_v20  ;;  %v11078_v20 = vld [vmem:[#allocation9 + $0x194] ss:$8 sps:$4 sm:$0xff]  }
 0x40f   :  { %4924 = vmatprep.mubr.bf16.mxu1 %v12176_v0  ;;  %4894 = vmatprep.subr.bf16.mxu1 %v11126_v21  ;;  %v11076_v21 = vld [vmem:[#allocation9 + $0x190] ss:$8 sps:$4 sm:$0xff]  }
 0x411   :  { %4557 = vmatpush1.bf16.msra.mxu0 %v11028_v45 }
 0x412   :  { %4558 = vmatprep.subr.bf16.mxu0 %v11033_v46  ;;  %4895 = vmatpush1.bf16.msra.mxu1 %v11124_v23  ;;  %v11079_v23 = vld [vmem:[#allocation9 + $0x1a0] ss:$8 sps:$4 sm:$0xff]  }
 0x413   :  { %4896 = vmatprep.subr.bf16.mxu1 %v11129_v24  ;;  %v11084_v24 = vld [vmem:[#allocation9 + $0x1b4] ss:$8 sps:$4 sm:$0xff]  }
 0x415   :  { %4559 = vmatpush1.bf16.msra.mxu0 %v11031_v47 }
 0x416   :  { %4560 = vmatprep.subr.bf16.mxu0 %v11036_v48  ;;  %4897 = vmatpush1.bf16.msra.mxu1 %v11127_v25  ;;  %v11082_v25 = vld [vmem:[#allocation9 + $0x1b0] ss:$8 sps:$4 sm:$0xff]  }
 0x417   :  { %4898 = vmatprep.subr.bf16.mxu1 %v11132_v26  ;;  %v11087_v26 = vld [vmem:[#allocation9 + $0x1c4] ss:$8 sps:$4 sm:$0xff]  }
 0x419   :  { %4561 = vmatpush1.bf16.msra.mxu0 %v11034_v49 }
 0x41a   :  { %4562 = vmatprep.subr.bf16.mxu0 %v11039_v52  ;;  %4899 = vmatpush1.bf16.msra.mxu1 %v11130_v57  ;;  %v11085_v57 = vld [vmem:[#allocation9 + $0x1c0] ss:$8 sps:$4 sm:$0xff]  }
 0x41b   :  { %4900 = vmatprep.subr.bf16.mxu1 %v11135_v27  ;;  %v11090_v27 = vld [vmem:[#allocation9 + $0x1d4] ss:$8 sps:$4 sm:$0xff]  }
 0x41d   :  { %4563 = vmatpush1.bf16.msra.mxu0 %v11037_v53  ;;  %v11142_v53 = vld [vmem:[#allocation12 + $0xe8] ss:$16 sps:$4 sm:$0xff]  }
 0x41e   :  { %4564 = vmatprep.subr.bf16.mxu0 %v11042_v54  ;;  %4901 = vmatpush1.bf16.msra.mxu1 %v11133_v28  ;;  %v11147_v54 = vld [vmem:[#allocation10 + $0x4] ss:$16 sps:$4 sm:$0xff]   ;;  %v11088_v28 = vld [vmem:[#allocation9 + $0x1d0] ss:$8 sps:$4 sm:$0xff]  }
 0x41f   :  { %4902 = vmatprep.subr.bf16.mxu1 %v11138_v29  ;;  %v3321_v29 = vrot.slane %v12603_v3, %v12567_v59  ;;  %v11156_v3 = vld [vmem:[#allocation10 + $0x64] ss:$16 sps:$4 sm:$0xff]  }
 0x421   :  { %4565 = vmatpush1.bf16.msra.mxu0 %v11040_v61 }
 0x422   :  { %4566 = vmatprep.subr.bf16.mxu0 %v11045_v62  ;;  %4903 = vmatpush1.bf16.msra.mxu1 %v11136_v30  ;;  %v11049_v62 = vld [vmem:[#allocation9 + $0x100] ss:$8 sps:$4 sm:$0xff]   ;;  %v11093_v30 = vld [vmem:[#allocation9 + $0x1e4] ss:$8 sps:$4 sm:$0xff]  }
 0x423   :  { %4904 = vmatprep.subr.bf16.mxu1 %v11141_v55 }
 0x425   :  { %4567 = vmatpush1.bf16.msra.mxu0 %v11043_v63 }
 0x426   :  { %4568 = vmatprep.subr.bf16.mxu0 %v11048_v1  ;;  %4905 = vmatpush1.bf16.msra.mxu1 %v11139_v37  ;;  %v11054_v1 = vld [vmem:[#allocation9 + $0x114] ss:$8 sps:$4 sm:$0xff]  }
 0x427   :  { %4906 = vmatprep.subr.bf16.mxu1 %v11144_v41  ;;  %v11159_v41 = vld [vmem:[#allocation10 + $0x84] ss:$16 sps:$4 sm:$0xff]  }
 0x429   :  { %4569 = vmatpush1.bf16.msra.mxu0 %v11046_v2 }
 0x42a   :  { %4579 = vmatprep.subr.bf16.mxu0 %v11051_v51  ;;  %4907 = vmatpush1.bf16.msra.mxu1 %v11142_v53  ;;  %v11145_v51 = vld [vmem:[#allocation10] ss:$16 sps:$4 sm:$0xff]   ;;  %v11195_v53 = vld [vmem:[#allocation13 + $0x4] ss:$16 sps:$4 sm:$0xff]  }
 0x42b   :  { %5093 = vmatprep.subr.bf16.mxu1 %v11147_v54 }
 0x42d   :  { %4925 = vmatmul.mubr.bf16.vlgmr.msra.gmra.mrb[36].mxu1 %v12596_v22  ;;  %v11081_v22 = vld [vmem:[#allocation9 + $0x1a4] ss:$8 sps:$4 sm:$0xff]  }
 0x42e   :  { %5094 = vmatpush1.bf16.msra.mxu1 %v11145_v51  ;;  %5125 = vmatprep.mubr.bf16.mxu1 %v12176_v0  ;;  %v11205_v51 = vld [vmem:[#allocation13 + $0x40] ss:$16 sps:$4 sm:$0xff]  }
 0x42f   :  { %5095 = vmatprep.subr.bf16.mxu1 %v11150_v4  ;;  %v11213_v4 = vld [vmem:[#allocation13 + $0x64] ss:$16 sps:$4 sm:$0xff]  }
 0x432   :  { %5096 = vmatpush1.bf16.msra.mxu1 %v11148_v6  ;;  %v11217_v6 = vld [vmem:[#allocation13 + $0x80] ss:$16 sps:$4 sm:$0xff]  }
 0x4bf   :  { %v4045_v35 = vpop.f32.mrb[20].mxu0  ;;  %v12611_v36 = vpop.f32.mrb[28].mxu1 }
 0x4c0   :  { %v10141_v39 = vadd.f32 %v4045_v35, %v3313_v31  ;;  %v4047_v15 = vpop.f32.mrb[21].mxu0  ;;  %v4129_v40 = vpop.f32.mrb[29].mxu1  ;;  %v11091_v31 = vld [vmem:[#allocation9 + $0x1e0] ss:$8 sps:$4 sm:$0xff]   ;;  %v10143_v55 = vadd.f32 %v12611_v36, %v3321_v29  ;;  %v11162_v36 = vld [vmem:[#allocation10 + $0xa4] ss:$16 sps:$4 sm:$0xff]  }
 0x4c1   :  { %v10142_v42 = vadd.f32 %v4047_v15, %v3317_v33  ;;  %v10144_v43 = vadd.f32 %v4129_v40, %v3325_v34  ;;  %v4049_v44 = vpop.f32.mrb[22].mxu0  ;;  %v4131_v45 = vpop.f32.mrb[30].mxu1  ;;  %v11096_v33 = vld [vmem:[#allocation9 + $0x1f4] ss:$8 sps:$4 sm:$0xff]   ;;  %v11094_v34 = vld [vmem:[#allocation9 + $0x1f0] ss:$8 sps:$4 sm:$0xff]  }
 0x4c2   :  { %v4134_v46 = vmax.f32 %v10141_v39, 0.0  ;;  %v4050_v47 = vpop.f32.mrb[23].mxu0  ;;  %v4132_v48 = vpop.f32.mrb[31].mxu1  ;;  %v4136_v35 = vmax.f32 %v10143_v55, 0.0  ;;  %v11153_v39 = vld [vmem:[#allocation10 + $0x44] ss:$16 sps:$4 sm:$0xff]  }
 0x4c3   :  { %v4135_v49 = vmax.f32 %v10142_v42, 0.0  ;;  %v4137_v52 = vmax.f32 %v10144_v43, 0.0  ;;  %v11151_v15 = vld [vmem:[#allocation10 + $0x40] ss:$16 sps:$4 sm:$0xff]   ;;  %5097 = vmatprep.subr.bf16.mxu1 %v11153_v39  ;;  %v11165_v44 = vld [vmem:[#allocation10 + $0xc4] ss:$16 sps:$4 sm:$0xff]  }
 0x4c4   :  { %v4138_v63 = vpack.c.bf16 %v4134_v46, %v4134_v46  ;;  %v4140_v37 = vpack.c.bf16 %v4136_v35, %v4136_v35  ;;  %5098 = vmatpush1.bf16.msra.mxu1 %v11151_v15  ;;  %v11154_v40 = vld [vmem:[#allocation10 + $0x60] ss:$16 sps:$4 sm:$0xff]   ;;  %v11168_v46 = vld [vmem:[#allocation10 + $0xe4] ss:$16 sps:$4 sm:$0xff]   ;;  %v11171_v48 = vld [vmem:[#allocation10 + $0xc] ss:$16 sps:$4 sm:$0xff]  }
 0x4c5   :  { %v4139_v61 = vpack.c.bf16 %v4135_v49, %v4135_v49  ;;  %v4141_v2 = vpack.c.bf16 %v4137_v52, %v4137_v52  ;;  %5099 = vmatprep.subr.bf16.mxu1 %v11156_v3  ;;  %v11157_v42 = vld [vmem:[#allocation10 + $0x80] ss:$16 sps:$4 sm:$0xff]  }
 0x4c6   :  { %v11160_v43 = vld [vmem:[#allocation10 + $0xa0] ss:$16 sps:$4 sm:$0xff]  }
 0x4c7   :  { %4570 = vmatprep.mubr.bf16.mxu0 %v4139_v61  ;;  %v11163_v45 = vld [vmem:[#allocation10 + $0xc0] ss:$16 sps:$4 sm:$0xff]  }
 0x4c8   :  { %4571 = vmatmul.mubr.bf16.vlgmr.msra.gmra.mrb[24].mxu0 %v4138_v63  ;;  %5100 = vmatpush1.bf16.msra.mxu1 %v11154_v40  ;;  %v11166_v47 = vld [vmem:[#allocation10 + $0xe0] ss:$16 sps:$4 sm:$0xff]  }
 0x4c9   :  { %4580 = vmatpush1.bf16.msra.mxu0 %v11049_v62  ;;  %4611 = vmatprep.mubr.bf16.mxu0 %v4141_v2  ;;  %v11193_v52 = vld [vmem:[#allocation13] ss:$16 sps:$4 sm:$0xff]   ;;  %v11201_v62 = vld [vmem:[#allocation13 + $0x24] ss:$16 sps:$4 sm:$0xff]  }
 0x4ca   :  { %4581 = vmatprep.subr.bf16.mxu0 %v11054_v1  ;;  %5101 = vmatprep.subr.bf16.mxu1 %v11159_v41  ;;  %v11199_v1 = vld [vmem:[#allocation13 + $0x20] ss:$16 sps:$4 sm:$0xff]   ;;  %v11207_v2 = vld [vmem:[#allocation13 + $0x44] ss:$16 sps:$4 sm:$0xff]  }
 0x4cb   :  { %v4620_v3 = vld [vmem:[%s12803_s15] sm:$0xff] }
 0x4cc   :  { %5102 = vmatpush1.bf16.msra.mxu1 %v11157_v42 }
 0x4cd   :  { %4582 = vmatpush1.bf16.msra.mxu0 %v11052_v5  ;;  %5103 = vmatprep.subr.bf16.mxu1 %v11162_v36  ;;  %v11211_v5 = vld [vmem:[#allocation13 + $0x60] ss:$16 sps:$4 sm:$0xff]   ;;  %v11169_v36 = vld [vmem:[#allocation10 + $0x8] ss:$16 sps:$4 sm:$0xff]  }
 0x4ce   :  { %4583 = vmatprep.subr.bf16.mxu0 %v11057_v7  ;;  %v11219_v7 = vld [vmem:[#allocation13 + $0x84] ss:$16 sps:$4 sm:$0xff]  }
 0x4d0   :  { %5104 = vmatpush1.bf16.msra.mxu1 %v11160_v43 }
 0x4d1   :  { %4584 = vmatpush1.bf16.msra.mxu0 %v11055_v38  ;;  %5105 = vmatprep.subr.bf16.mxu1 %v11165_v44  ;;  %v11174_v44 = vld [vmem:[#allocation10 + $0x2c] ss:$16 sps:$4 sm:$0xff]  }
 0x4d2   :  { %4585 = vmatprep.subr.bf16.mxu0 %v11060_v8  ;;  %v11225_v8 = vld [vmem:[#allocation13 + $0xa4] ss:$16 sps:$4 sm:$0xff]  }
 0x4d4   :  { %5106 = vmatpush1.bf16.msra.mxu1 %v11163_v45  ;;  %v11172_v45 = vld [vmem:[#allocation10 + $0x28] ss:$16 sps:$4 sm:$0xff]  }
 0x4d5   :  { %4586 = vmatpush1.bf16.msra.mxu0 %v11058_v50  ;;  %5107 = vmatprep.subr.bf16.mxu1 %v11168_v46  ;;  %v11177_v46 = vld [vmem:[#allocation10 + $0x4c] ss:$16 sps:$4 sm:$0xff]  }
 0x4d6   :  { %4587 = vmatprep.subr.bf16.mxu0 %v11063_v9  ;;  %v11223_v9 = vld [vmem:[#allocation13 + $0xa0] ss:$16 sps:$4 sm:$0xff]  }
 0x4d8   :  { %5108 = vmatpush1.bf16.msra.mxu1 %v11166_v47  ;;  %v11175_v47 = vld [vmem:[#allocation10 + $0x48] ss:$16 sps:$4 sm:$0xff]  }
 0x4d9   :  { %4588 = vmatpush1.bf16.msra.mxu0 %v11061_v10  ;;  %5134 = vmatprep.subr.bf16.mxu1 %v11171_v48  ;;  %v11180_v48 = vld [vmem:[#allocation10 + $0x6c] ss:$16 sps:$4 sm:$0xff]  }
 0x4da   :  { %4589 = vmatprep.subr.bf16.mxu0 %v11066_v11 }
 0x4dd   :  { %4590 = vmatpush1.bf16.msra.mxu0 %v11064_v12  ;;  %v11231_v12 = vld [vmem:[#allocation13 + $0xc4] ss:$16 sps:$4 sm:$0xff]  }
 0x4de   :  { %4591 = vmatprep.subr.bf16.mxu0 %v11069_v13  ;;  %v11229_v13 = vld [vmem:[#allocation13 + $0xc0] ss:$16 sps:$4 sm:$0xff]  }
 0x4e0   :  { %v12618_v49 = vpop.f32.mrb[32].mxu1 }
 0x4e1   :  { %4592 = vmatpush1.bf16.msra.mxu0 %v11067_v14  ;;  %v12620_v54 = vpop.f32.mrb[33].mxu1  ;;  %v11237_v14 = vld [vmem:[#allocation13 + $0xe4] ss:$16 sps:$4 sm:$0xff]  }
 0x4e2   :  { %4593 = vmatprep.subr.bf16.mxu0 %v11072_v17  ;;  %v4889_v61 = vpop.f32.mrb[34].mxu1  ;;  %v11235_v17 = vld [vmem:[#allocation13 + $0xe0] ss:$16 sps:$4 sm:$0xff]  }
 0x4e3   :  { %v4890_v63 = vpop.f32.mrb[35].mxu1  ;;  %v11181_v61 = vld [vmem:[#allocation10 + $0x88] ss:$16 sps:$4 sm:$0xff]  }
 0x4e4   :  { %v11184_v63 = vld [vmem:[#allocation10 + $0xa8] ss:$16 sps:$4 sm:$0xff]  }
 0x4e5   :  { %4594 = vmatpush1.bf16.msra.mxu0 %v11070_v18  ;;  %v11243_v18 = vld [vmem:[#allocation13 + $0x104] ss:$16 sps:$4 sm:$0xff]  }
 0x4e6   :  { %4595 = vmatprep.subr.bf16.mxu0 %v11075_v19  ;;  %v11241_v19 = vld [vmem:[#allocation13 + $0x100] ss:$16 sps:$4 sm:$0xff]  }
 0x4e9   :  { %4596 = vmatpush1.bf16.msra.mxu0 %v11073_v16  ;;  %v11249_v16 = vld [vmem:[#allocation13 + $0x124] ss:$16 sps:$4 sm:$0xff]  }
 0x4ea   :  { %4597 = vmatprep.subr.bf16.mxu0 %v11078_v20  ;;  %v11247_v20 = vld [vmem:[#allocation13 + $0x120] ss:$16 sps:$4 sm:$0xff]  }
 0x4ed   :  { %4598 = vmatpush1.bf16.msra.mxu0 %v11076_v21  ;;  %v11255_v21 = vld [vmem:[#allocation13 + $0x144] ss:$16 sps:$4 sm:$0xff]  }
 0x4ee   :  { %4599 = vmatprep.subr.bf16.mxu0 %v11081_v22  ;;  %v11253_v22 = vld [vmem:[#allocation13 + $0x140] ss:$16 sps:$4 sm:$0xff]  }
 0x4f1   :  { %4600 = vmatpush1.bf16.msra.mxu0 %v11079_v23  ;;  %v11261_v23 = vld [vmem:[#allocation13 + $0x164] ss:$16 sps:$4 sm:$0xff]  }
 0x4f2   :  { %4601 = vmatprep.subr.bf16.mxu0 %v11084_v24  ;;  %v11259_v24 = vld [vmem:[#allocation13 + $0x160] ss:$16 sps:$4 sm:$0xff]  }
 0x4f5   :  { %4602 = vmatpush1.bf16.msra.mxu0 %v11082_v25  ;;  %v11267_v25 = vld [vmem:[#allocation13 + $0x184] ss:$16 sps:$4 sm:$0xff]  }
 0x4f6   :  { %4603 = vmatprep.subr.bf16.mxu0 %v11087_v26  ;;  %v11265_v26 = vld [vmem:[#allocation13 + $0x180] ss:$16 sps:$4 sm:$0xff]  }
 0x4f9   :  { %4604 = vmatpush1.bf16.msra.mxu0 %v11085_v57  ;;  %v11273_v57 = vld [vmem:[#allocation13 + $0x1a4] ss:$16 sps:$4 sm:$0xff]  }
 0x4fa   :  { %4605 = vmatprep.subr.bf16.mxu0 %v11090_v27  ;;  %v11271_v27 = vld [vmem:[#allocation13 + $0x1a0] ss:$16 sps:$4 sm:$0xff]  }
 0x4fd   :  { %4606 = vmatpush1.bf16.msra.mxu0 %v11088_v28  ;;  %v4206_v28 = vld [vmem:[%s12768_s11] sm:$0x3] }
 0x4fe   :  { %4607 = vmatprep.subr.bf16.mxu0 %v11093_v30  ;;  %v4211_v29 = vrot.slane %v4206_v28, %v12549_v58  ;;  %v4215_v30 = vrot.slane %v4206_v28, %v12552_v60  ;;  %v11270_v28 = vld [vmem:[#allocation13 + $0x18c] ss:$16 sps:$4 sm:$0xff]  }
 0x500   :  { %v12622_v38 = vpop.f32.mrb[36].mxu1 }
 0x501   :  { %4608 = vmatpush1.bf16.msra.mxu0 %v11091_v31  ;;  %v12624_v50 = vpop.f32.mrb[37].mxu1 }
 0x502   :  { %4609 = vmatprep.subr.bf16.mxu0 %v11096_v33  ;;  %v4930_v10 = vpop.f32.mrb[38].mxu1 }
 0x503   :  { %v4931_v11 = vpop.f32.mrb[39].mxu1  ;;  %v11216_v10 = vld [vmem:[#allocation13 + $0x6c] ss:$16 sps:$4 sm:$0xff]  }
 0x504   :  { %v11214_v11 = vld [vmem:[#allocation13 + $0x68] ss:$16 sps:$4 sm:$0xff]  }
 0x505   :  { %4610 = vmatpush1.bf16.msra.mxu0 %v11094_v34 }
 0x506   :  { %5999 = vmatprep.subr.bf16.mxu0 %v11195_v53  ;;  %v11183_v53 = vld [vmem:[#allocation10 + $0x8c] ss:$16 sps:$4 sm:$0xff]  }
 0x508   :  { %4612 = vmatmul.mubr.bf16.vlgmr.msra.gmra.mrb[24].mxu0 %v4140_v37 }
 0x509   :  { %6000 = vmatpush1.bf16.msra.mxu0 %v11193_v52  ;;  %v11178_v52 = vld [vmem:[#allocation10 + $0x68] ss:$16 sps:$4 sm:$0xff]  }
 0x50a   :  { %6001 = vmatprep.subr.bf16.mxu0 %v11201_v62  ;;  %v11186_v62 = vld [vmem:[#allocation10 + $0xac] ss:$16 sps:$4 sm:$0xff]  }
 0x50d   :  { %6002 = vmatpush1.bf16.msra.mxu0 %v11199_v1  ;;  %v11189_v1 = vld [vmem:[#allocation10 + $0xcc] ss:$16 sps:$4 sm:$0xff]  }
 0x50e   :  { %6003 = vmatprep.subr.bf16.mxu0 %v11207_v2  ;;  %v11192_v2 = vld [vmem:[#allocation10 + $0xec] ss:$16 sps:$4 sm:$0xff]  }
 0x511   :  { %6004 = vmatpush1.bf16.msra.mxu0 %v11205_v51  ;;  %v11190_v51 = vld [vmem:[#allocation10 + $0xe8] ss:$16 sps:$4 sm:$0xff]  }
 0x512   :  { %6005 = vmatprep.subr.bf16.mxu0 %v11213_v4  ;;  %v11198_v4 = vld [vmem:[#allocation13 + $0xc] ss:$16 sps:$4 sm:$0xff]  }
 0x515   :  { %6006 = vmatpush1.bf16.msra.mxu0 %v11211_v5  ;;  %v11196_v5 = vld [vmem:[#allocation13 + $0x8] ss:$16 sps:$4 sm:$0xff]  }
 0x516   :  { %6007 = vmatprep.subr.bf16.mxu0 %v11219_v7  ;;  %v11204_v7 = vld [vmem:[#allocation13 + $0x2c] ss:$16 sps:$4 sm:$0xff]  }
 0x519   :  { %6008 = vmatpush1.bf16.msra.mxu0 %v11217_v6  ;;  %v11202_v6 = vld [vmem:[#allocation13 + $0x28] ss:$16 sps:$4 sm:$0xff]  }
 0x51a   :  { %6009 = vmatprep.subr.bf16.mxu0 %v11225_v8  ;;  %v11210_v8 = vld [vmem:[#allocation13 + $0x4c] ss:$16 sps:$4 sm:$0xff]  }
 0x51d   :  { %6010 = vmatpush1.bf16.msra.mxu0 %v11223_v9  ;;  %v11208_v9 = vld [vmem:[#allocation13 + $0x48] ss:$16 sps:$4 sm:$0xff]  }
 0x51e   :  { %6011 = vmatprep.subr.bf16.mxu0 %v11231_v12  ;;  %v11222_v12 = vld [vmem:[#allocation13 + $0x8c] ss:$16 sps:$4 sm:$0xff]  }
 0x521   :  { %6012 = vmatpush1.bf16.msra.mxu0 %v11229_v13  ;;  %v11220_v13 = vld [vmem:[#allocation13 + $0x88] ss:$16 sps:$4 sm:$0xff]  }
 0x522   :  { %6013 = vmatprep.subr.bf16.mxu0 %v11237_v14  ;;  %v11228_v14 = vld [vmem:[#allocation13 + $0xac] ss:$16 sps:$4 sm:$0xff]  }
 0x525   :  { %6014 = vmatpush1.bf16.msra.mxu0 %v11235_v17  ;;  %v11226_v17 = vld [vmem:[#allocation13 + $0xa8] ss:$16 sps:$4 sm:$0xff]  }
 0x526   :  { %6015 = vmatprep.subr.bf16.mxu0 %v11243_v18  ;;  %v11234_v18 = vld [vmem:[#allocation13 + $0xcc] ss:$16 sps:$4 sm:$0xff]  }
 0x529   :  { %6016 = vmatpush1.bf16.msra.mxu0 %v11241_v19  ;;  %v11232_v19 = vld [vmem:[#allocation13 + $0xc8] ss:$16 sps:$4 sm:$0xff]  }
 0x52a   :  { %6017 = vmatprep.subr.bf16.mxu0 %v11249_v16  ;;  %v11240_v16 = vld [vmem:[#allocation13 + $0xec] ss:$16 sps:$4 sm:$0xff]  }
 0x52d   :  { %6018 = vmatpush1.bf16.msra.mxu0 %v11247_v20  ;;  %v11238_v20 = vld [vmem:[#allocation13 + $0xe8] ss:$16 sps:$4 sm:$0xff]  }
 0x52e   :  { %6019 = vmatprep.subr.bf16.mxu0 %v11255_v21  ;;  %v11246_v21 = vld [vmem:[#allocation13 + $0x10c] ss:$16 sps:$4 sm:$0xff]  }
 0x531   :  { %6020 = vmatpush1.bf16.msra.mxu0 %v11253_v22  ;;  %v11244_v22 = vld [vmem:[#allocation13 + $0x108] ss:$16 sps:$4 sm:$0xff]  }
 0x532   :  { %6021 = vmatprep.subr.bf16.mxu0 %v11261_v23  ;;  %v11252_v23 = vld [vmem:[#allocation13 + $0x12c] ss:$16 sps:$4 sm:$0xff]  }
 0x535   :  { %6022 = vmatpush1.bf16.msra.mxu0 %v11259_v24  ;;  %v11250_v24 = vld [vmem:[#allocation13 + $0x128] ss:$16 sps:$4 sm:$0xff]  }
 0x536   :  { %6023 = vmatprep.subr.bf16.mxu0 %v11267_v25  ;;  %v11258_v25 = vld [vmem:[#allocation13 + $0x14c] ss:$16 sps:$4 sm:$0xff]  }
 0x539   :  { %6024 = vmatpush1.bf16.msra.mxu0 %v11265_v26  ;;  %v11256_v26 = vld [vmem:[#allocation13 + $0x148] ss:$16 sps:$4 sm:$0xff]  }
 0x53a   :  { %6025 = vmatprep.subr.bf16.mxu0 %v11273_v57  ;;  %v11264_v57 = vld [vmem:[#allocation13 + $0x16c] ss:$16 sps:$4 sm:$0xff]  }
 0x53d   :  { %6026 = vmatpush1.bf16.msra.mxu0 %v11271_v27  ;;  %v11262_v27 = vld [vmem:[#allocation13 + $0x168] ss:$16 sps:$4 sm:$0xff]  }
 0x5db   :  { %v4613_v31 = vpop.f32.mrb[24].mxu0 }
 0x5dc   :  { %v10145_v55 = vadd.f32 %v4613_v31, %v4211_v29  ;;  %v4615_v33 = vpop.f32.mrb[25].mxu0  ;;  %v11268_v29 = vld [vmem:[#allocation13 + $0x188] ss:$16 sps:$4 sm:$0xff]  }
 0x5dd   :  { %v10146_v34 = vadd.f32 %v4615_v33, %v4215_v30  ;;  %v4617_v35 = vpop.f32.mrb[26].mxu0  ;;  %v11276_v30 = vld [vmem:[#allocation13 + $0x1ac] ss:$16 sps:$4 sm:$0xff]   ;;  %v11274_v31 = vld [vmem:[#allocation13 + $0x1a8] ss:$16 sps:$4 sm:$0xff]  }
 0x5de   :  { %8946 = vst [vmem:[%s12779_s22] sm:$0xff] %v10145_v55  ;;  %v4618_v37 = vpop.f32.mrb[27].mxu0  ;;  %v11282_v33 = vld [vmem:[#allocation13 + $0x1cc] ss:$16 sps:$4 sm:$0xff]   ;;  %v11280_v35 = vld [vmem:[#allocation13 + $0x1c8] ss:$16 sps:$4 sm:$0xff]  }
 0x5df   :  { %v4621_v39 = vmul.f32 0.5, %v10146_v34  ;;  %8947 = vst [vmem:[%s12780_s23] sm:$0xff] %v10146_v34  ;;  %v11277_v34 = vld [vmem:[#allocation13 + $0x1c0] ss:$16 sps:$4 sm:$0xff]   ;;  %v11285_v37 = vld [vmem:[#allocation13 + $0x1e4] ss:$16 sps:$4 sm:$0xff]  }
 0x5e1   :  { %v4622_v15 = vmul.f32 1.442695, %v4621_v39  ;;  %v11288_v39 = vld [vmem:[#allocation13 + $0x1ec] ss:$16 sps:$4 sm:$0xff]  }
 0x5e3   :  { %11897 = vpow2.f32 %v4622_v15  ;;  %v11283_v15 = vld [vmem:[#allocation13 + $0x1e0] ss:$16 sps:$4 sm:$0xff]  }
 0x5ed   :  { %v11898_v40 = vpop.eup %11897 }
 0x5ee   :  { %v4624_v41 = vmul.f32 %v11898_v40, %v4620_v3  ;;  %v11286_v3 = vld [vmem:[#allocation13 + $0x1e8] ss:$16 sps:$4 sm:$0xff]   ;;  %v11291_v40 = vld [vmem:[#allocation13 + $0x204] ss:$16 sps:$4 sm:$0xff]  }
 0x5f0   :  { %v4625_v42 = vadd.f32 %v10145_v55, %v4624_v41  ;;  %v11279_v55 = vld [vmem:[#allocation13 + $0x1c4] ss:$16 sps:$4 sm:$0xff]   ;;  %v11294_v41 = vld [vmem:[#allocation13 + $0x20c] ss:$16 sps:$4 sm:$0xff]  }
 0x5f1   :  { %6027 = vmatprep.subr.bf16.mxu0 %v11279_v55  ;;  %v11336_v55 = vld [vmem:[#allocation13 + $0x2ec] ss:$16 sps:$4 sm:$0xff]  }
 0x5f2   :  { %v4626_v43 = vpack.c.bf16 %v4625_v42, %v4625_v42  ;;  %6028 = vmatpush1.bf16.msra.mxu0 %v11277_v34  ;;  %v12644_v42 = vld [vmem:[%s12771_s14] sm:$0xf] }
 0x5f3   :  { %6029 = vmatprep.subr.bf16.mxu0 %v11285_v37 }
 0x5f4   :  { %5126 = vmatmul.mubr.bf16.vlgmr.msra.gmra.mrb[40].mxu1 %v4626_v43 }
 0x5f5   :  { %5135 = vmatpush1.bf16.msra.mxu1 %v11169_v36  ;;  %5166 = vmatprep.mubr.bf16.mxu1 %v12176_v0  ;;  %v11187_v0 = vld [vmem:[#allocation10 + $0xc8] ss:$16 sps:$4 sm:$0xff]   ;;  %v5180_v36 = vrot.slane %v12644_v42, %v12549_v58 }
 0x5f6   :  { %5136 = vmatprep.subr.bf16.mxu1 %v11174_v44  ;;  %6030 = vmatpush1.bf16.msra.mxu0 %v11283_v15  ;;  %v5184_v44 = vrot.slane %v12644_v42, %v12552_v60  ;;  %v11331_v15 = vld [vmem:[#allocation13 + $0x2e0] ss:$16 sps:$4 sm:$0xff]  }
 0x5f7   :  { %6040 = vmatprep.subr.bf16.mxu0 %v11291_v40  ;;  %v11339_v40 = vld [vmem:[#allocation13 + $0x304] ss:$16 sps:$4 sm:$0xff]  }
 0x5f9   :  { %5137 = vmatpush1.bf16.msra.mxu1 %v11172_v45 }
 0x5fa   :  { %5138 = vmatprep.subr.bf16.mxu1 %v11177_v46 }
 0x5fd   :  { %5139 = vmatpush1.bf16.msra.mxu1 %v11175_v47 }
 0x5fe   :  { %5140 = vmatprep.subr.bf16.mxu1 %v11180_v48 }
 0x601   :  { %5141 = vmatpush1.bf16.msra.mxu1 %v11178_v52 }
 0x602   :  { %5142 = vmatprep.subr.bf16.mxu1 %v11183_v53 }
 0x605   :  { %5143 = vmatpush1.bf16.msra.mxu1 %v11181_v61 }
 0x606   :  { %5144 = vmatprep.subr.bf16.mxu1 %v11186_v62 }
 0x609   :  { %5145 = vmatpush1.bf16.msra.mxu1 %v11184_v63 }
 0x60a   :  { %5146 = vmatprep.subr.bf16.mxu1 %v11189_v1 }
 0x60d   :  { %5147 = vmatpush1.bf16.msra.mxu1 %v11187_v0  ;;  %v11289_v0 = vld [vmem:[#allocation13 + $0x200] ss:$16 sps:$4 sm:$0xff]  }
 0x60e   :  { %5148 = vmatprep.subr.bf16.mxu1 %v11192_v2  ;;  %v11292_v2 = vld [vmem:[#allocation13 + $0x208] ss:$16 sps:$4 sm:$0xff]  }
 0x611   :  { %5149 = vmatpush1.bf16.msra.mxu1 %v11190_v51 }
 0x612   :  { %6081 = vmatprep.subr.bf16.mxu1 %v11198_v4  ;;  %v11297_v4 = vld [vmem:[#allocation13 + $0x224] ss:$16 sps:$4 sm:$0xff]  }
 0x614   :  { %5167 = vmatmul.mubr.bf16.vlgmr.msra.gmra.mrb[44].mxu1 %v4626_v43 }
 0x615   :  { %6082 = vmatpush1.bf16.msra.mxu1 %v11196_v5  ;;  %v11300_v5 = vld [vmem:[#allocation13 + $0x22c] ss:$16 sps:$4 sm:$0xff]  }
 0x616   :  { %6083 = vmatprep.subr.bf16.mxu1 %v11204_v7  ;;  %v11303_v7 = vld [vmem:[#allocation13 + $0x244] ss:$16 sps:$4 sm:$0xff]  }
 0x619   :  { %6084 = vmatpush1.bf16.msra.mxu1 %v11202_v6  ;;  %v11306_v6 = vld [vmem:[#allocation13 + $0x24c] ss:$16 sps:$4 sm:$0xff]  }
 0x61a   :  { %6085 = vmatprep.subr.bf16.mxu1 %v11210_v8  ;;  %v11301_v8 = vld [vmem:[#allocation13 + $0x240] ss:$16 sps:$4 sm:$0xff]  }
 0x61d   :  { %6086 = vmatpush1.bf16.msra.mxu1 %v11208_v9  ;;  %v11304_v9 = vld [vmem:[#allocation13 + $0x248] ss:$16 sps:$4 sm:$0xff]  }
 0x61e   :  { %6087 = vmatprep.subr.bf16.mxu1 %v11216_v10  ;;  %v11309_v10 = vld [vmem:[#allocation13 + $0x264] ss:$16 sps:$4 sm:$0xff]  }
 0x621   :  { %6088 = vmatpush1.bf16.msra.mxu1 %v11214_v11  ;;  %v11312_v11 = vld [vmem:[#allocation13 + $0x26c] ss:$16 sps:$4 sm:$0xff]  }
 0x622   :  { %6089 = vmatprep.subr.bf16.mxu1 %v11222_v12  ;;  %v11307_v12 = vld [vmem:[#allocation13 + $0x260] ss:$16 sps:$4 sm:$0xff]  }
 0x625   :  { %6090 = vmatpush1.bf16.msra.mxu1 %v11220_v13  ;;  %v11310_v13 = vld [vmem:[#allocation13 + $0x268] ss:$16 sps:$4 sm:$0xff]  }
 0x626   :  { %6091 = vmatprep.subr.bf16.mxu1 %v11228_v14  ;;  %v11315_v14 = vld [vmem:[#allocation13 + $0x284] ss:$16 sps:$4 sm:$0xff]  }
 0x629   :  { %6092 = vmatpush1.bf16.msra.mxu1 %v11226_v17  ;;  %v11318_v17 = vld [vmem:[#allocation13 + $0x28c] ss:$16 sps:$4 sm:$0xff]  }
 0x62a   :  { %6093 = vmatprep.subr.bf16.mxu1 %v11234_v18  ;;  %v11313_v18 = vld [vmem:[#allocation13 + $0x280] ss:$16 sps:$4 sm:$0xff]  }
 0x62d   :  { %6094 = vmatpush1.bf16.msra.mxu1 %v11232_v19  ;;  %v11316_v19 = vld [vmem:[#allocation13 + $0x288] ss:$16 sps:$4 sm:$0xff]  }
 0x62e   :  { %6095 = vmatprep.subr.bf16.mxu1 %v11240_v16  ;;  %v11321_v16 = vld [vmem:[#allocation13 + $0x2a4] ss:$16 sps:$4 sm:$0xff]  }
 0x631   :  { %6096 = vmatpush1.bf16.msra.mxu1 %v11238_v20  ;;  %v11324_v20 = vld [vmem:[#allocation13 + $0x2ac] ss:$16 sps:$4 sm:$0xff]  }
 0x632   :  { %6097 = vmatprep.subr.bf16.mxu1 %v11246_v21  ;;  %v11319_v21 = vld [vmem:[#allocation13 + $0x2a0] ss:$16 sps:$4 sm:$0xff]  }
 0x635   :  { %6098 = vmatpush1.bf16.msra.mxu1 %v11244_v22  ;;  %v11322_v22 = vld [vmem:[#allocation13 + $0x2a8] ss:$16 sps:$4 sm:$0xff]  }
 0x636   :  { %6099 = vmatprep.subr.bf16.mxu1 %v11252_v23  ;;  %v11327_v23 = vld [vmem:[#allocation13 + $0x2c4] ss:$16 sps:$4 sm:$0xff]  }
 0x639   :  { %6100 = vmatpush1.bf16.msra.mxu1 %v11250_v24  ;;  %v11330_v24 = vld [vmem:[#allocation13 + $0x2cc] ss:$16 sps:$4 sm:$0xff]  }
 0x63a   :  { %6101 = vmatprep.subr.bf16.mxu1 %v11258_v25  ;;  %v5188_v25 = vrot.slane %v12644_v42, %v12567_v59 }
 0x63d   :  { %6102 = vmatpush1.bf16.msra.mxu1 %v11256_v26 }
 0x63e   :  { %6103 = vmatprep.subr.bf16.mxu1 %v11264_v57  ;;  %v5192_v57 = vrot.slane %v12644_v42, %v12570_v32 }
 0x641   :  { %6104 = vmatpush1.bf16.msra.mxu1 %v11262_v27  ;;  %v11325_v27 = vld [vmem:[#allocation13 + $0x2c0] ss:$16 sps:$4 sm:$0xff]  }
 0x642   :  { %6105 = vmatprep.subr.bf16.mxu1 %v11270_v28  ;;  %v11328_v28 = vld [vmem:[#allocation13 + $0x2c8] ss:$16 sps:$4 sm:$0xff]  }
 0x645   :  { %6106 = vmatpush1.bf16.msra.mxu1 %v11268_v29 }
 0x646   :  { %6107 = vmatprep.subr.bf16.mxu1 %v11276_v30 }
 0x649   :  { %6108 = vmatpush1.bf16.msra.mxu1 %v11274_v31  ;;  %v11333_v31 = vld [vmem:[#allocation13 + $0x2e4] ss:$16 sps:$4 sm:$0xff]  }
 0x64a   :  { %6109 = vmatprep.subr.bf16.mxu1 %v11282_v33 }
 0x64d   :  { %6110 = vmatpush1.bf16.msra.mxu1 %v11280_v35 }
 0x64e   :  { %6111 = vmatprep.subr.bf16.mxu1 %v11288_v39 }
 0x651   :  { %6112 = vmatpush1.bf16.msra.mxu1 %v11286_v3  ;;  %v11334_v3 = vld [vmem:[#allocation13 + $0x2e8] ss:$16 sps:$4 sm:$0xff]  }
 0x652   :  { %6122 = vmatprep.subr.bf16.mxu1 %v11294_v41 }
 0x6c7   :  { %v5127_v43 = vpop.f32.mrb[40].mxu1 }
 0x6c8   :  { %v5128_v45 = vadd.f32 %v5127_v43, %v12618_v49  ;;  %v5129_v46 = vpop.f32.mrb[41].mxu1  ;;  %v11295_v49 = vld [vmem:[#allocation13 + $0x220] ss:$16 sps:$4 sm:$0xff]   ;;  %v11340_v43 = vld [vmem:[#allocation13 + $0x308] ss:$16 sps:$4 sm:$0xff]  }
 0x6c9   :  { %v5130_v47 = vadd.f32 %v5129_v46, %v12620_v54  ;;  %v5131_v48 = vpop.f32.mrb[42].mxu1  ;;  %v11298_v54 = vld [vmem:[#allocation13 + $0x228] ss:$16 sps:$4 sm:$0xff]  }
 0x6ca   :  { %v5197_v52 = vadd.f32 %v5180_v36, %v5128_v45  ;;  %v5132_v53 = vpop.f32.mrb[43].mxu1  ;;  %v11337_v36 = vld [vmem:[#allocation13 + $0x300] ss:$16 sps:$4 sm:$0xff]   ;;  %v11346_v46 = vld [vmem:[#allocation13 + $0x328] ss:$16 sps:$4 sm:$0xff]  }
 0x6cb   :  { %v5198_v61 = vadd.f32 %v5184_v44, %v5130_v47  ;;  %v11348_v44 = vld [vmem:[#allocation13 + $0x32c] ss:$16 sps:$4 sm:$0xff]   ;;  %v11343_v45 = vld [vmem:[#allocation13 + $0x320] ss:$16 sps:$4 sm:$0xff]   ;;  %v11351_v47 = vld [vmem:[#allocation13 + $0x344] ss:$16 sps:$4 sm:$0xff]  }
 0x6cc   :  { %v5201_v62 = vmax.f32 %v5197_v52, 0.0  ;;  %v11354_v48 = vld [vmem:[#allocation13 + $0x34c] ss:$16 sps:$4 sm:$0xff]   ;;  %v11349_v52 = vld [vmem:[#allocation13 + $0x340] ss:$16 sps:$4 sm:$0xff]  }
 0x6cd   :  { %v5202_v63 = vmax.f32 %v5198_v61, 0.0  ;;  %v11352_v53 = vld [vmem:[#allocation13 + $0x348] ss:$16 sps:$4 sm:$0xff]   ;;  %v11357_v61 = vld [vmem:[#allocation13 + $0x364] ss:$16 sps:$4 sm:$0xff]  }
 0x6ce   :  { %v5205_v51 = vpack.c.bf16 %v5201_v62, %v5201_v62  ;;  %v11360_v62 = vld [vmem:[#allocation13 + $0x36c] ss:$16 sps:$4 sm:$0xff]  }
 0x6cf   :  { %v5206_v1 = vpack.c.bf16 %v5202_v63, %v5202_v63  ;;  %v11355_v63 = vld [vmem:[#allocation13 + $0x360] ss:$16 sps:$4 sm:$0xff]  }
 0x6d1   :  { %6031 = vmatprep.mubr.bf16.mxu0 %v5206_v1  ;;  %6113 = vmatprep.mubr.bf16.mxu1 %v5206_v1  ;;  %v11358_v1 = vld [vmem:[#allocation13 + $0x368] ss:$16 sps:$4 sm:$0xff]  }
 0x6d2   :  { %6032 = vmatmul.mubr.bf16.vlgmr.msra.gmra.mrb[28].mxu0 %v5205_v51  ;;  %6114 = vmatmul.mubr.bf16.vlgmr.msra.gmra.mrb[48].mxu1 %v5205_v51  ;;  %v11361_v51 = vld [vmem:[#allocation13 + $0x380] ss:$16 sps:$4 sm:$0xff]  }
 0x6d3   :  { %6041 = vmatpush1.bf16.msra.mxu0 %v11289_v0  ;;  %6123 = vmatpush1.bf16.msra.mxu1 %v11292_v2  ;;  %v11363_v0 = vld [vmem:[#allocation13 + $0x384] ss:$16 sps:$4 sm:$0xff]   ;;  %v11366_v2 = vld [vmem:[#allocation13 + $0x38c] ss:$16 sps:$4 sm:$0xff]  }
 0x6d4   :  { %6042 = vmatprep.subr.bf16.mxu0 %v11297_v4  ;;  %6124 = vmatprep.subr.bf16.mxu1 %v11300_v5  ;;  %v11364_v4 = vld [vmem:[#allocation13 + $0x388] ss:$16 sps:$4 sm:$0xff]   ;;  %v11369_v5 = vld [vmem:[#allocation13 + $0x3a4] ss:$16 sps:$4 sm:$0xff]  }
 0x6d7   :  { %6043 = vmatpush1.bf16.msra.mxu0 %v11295_v49  ;;  %6125 = vmatpush1.bf16.msra.mxu1 %v11298_v54  ;;  %v11372_v49 = vld [vmem:[#allocation13 + $0x3ac] ss:$16 sps:$4 sm:$0xff]   ;;  %v11367_v54 = vld [vmem:[#allocation13 + $0x3a0] ss:$16 sps:$4 sm:$0xff]  }
 0x6d8   :  { %6044 = vmatprep.subr.bf16.mxu0 %v11303_v7  ;;  %6126 = vmatprep.subr.bf16.mxu1 %v11306_v6  ;;  %v11370_v7 = vld [vmem:[#allocation13 + $0x3a8] ss:$16 sps:$4 sm:$0xff]   ;;  %v11375_v6 = vld [vmem:[#allocation13 + $0x3c4] ss:$16 sps:$4 sm:$0xff]  }
 0x6db   :  { %6045 = vmatpush1.bf16.msra.mxu0 %v11301_v8  ;;  %6127 = vmatpush1.bf16.msra.mxu1 %v11304_v9  ;;  %v11378_v8 = vld [vmem:[#allocation13 + $0x3cc] ss:$16 sps:$4 sm:$0xff]   ;;  %v11373_v9 = vld [vmem:[#allocation13 + $0x3c0] ss:$16 sps:$4 sm:$0xff]  }
 0x6dc   :  { %6046 = vmatprep.subr.bf16.mxu0 %v11309_v10  ;;  %6128 = vmatprep.subr.bf16.mxu1 %v11312_v11  ;;  %v11376_v10 = vld [vmem:[#allocation13 + $0x3c8] ss:$16 sps:$4 sm:$0xff]   ;;  %v11381_v11 = vld [vmem:[#allocation13 + $0x3e4] ss:$16 sps:$4 sm:$0xff]  }
 0x6df   :  { %6047 = vmatpush1.bf16.msra.mxu0 %v11307_v12  ;;  %6129 = vmatpush1.bf16.msra.mxu1 %v11310_v13  ;;  %v11384_v12 = vld [vmem:[#allocation13 + $0x3ec] ss:$16 sps:$4 sm:$0xff]   ;;  %v11379_v13 = vld [vmem:[#allocation13 + $0x3e0] ss:$16 sps:$4 sm:$0xff]  }
 0x6e0   :  { %6048 = vmatprep.subr.bf16.mxu0 %v11315_v14  ;;  %6130 = vmatprep.subr.bf16.mxu1 %v11318_v17  ;;  %v11382_v14 = vld [vmem:[#allocation13 + $0x3e8] ss:$16 sps:$4 sm:$0xff]  }
 0x6e3   :  { %6049 = vmatpush1.bf16.msra.mxu0 %v11313_v18  ;;  %6131 = vmatpush1.bf16.msra.mxu1 %v11316_v19  ;;  %v11387_v18 = vld [vmem:[#allocation15 + $0x4] ss:$16 sps:$4 sm:$0xff]   ;;  %v11390_v19 = vld [vmem:[#allocation15 + $0xc] ss:$16 sps:$4 sm:$0xff]  }
 0x6e4   :  { %6050 = vmatprep.subr.bf16.mxu0 %v11321_v16  ;;  %6132 = vmatprep.subr.bf16.mxu1 %v11324_v20  ;;  %v11385_v16 = vld [vmem:[#allocation15] ss:$16 sps:$4 sm:$0xff]   ;;  %v11388_v20 = vld [vmem:[#allocation15 + $0x8] ss:$16 sps:$4 sm:$0xff]  }
 0x6e7   :  { %v5168_v26 = vpop.f32.mrb[44].mxu1  ;;  %6051 = vmatpush1.bf16.msra.mxu0 %v11319_v21  ;;  %6133 = vmatpush1.bf16.msra.mxu1 %v11322_v22  ;;  %v11393_v22 = vld [vmem:[#allocation15 + $0x24] ss:$16 sps:$4 sm:$0xff]  }
 0x6e8   :  { %v5169_v29 = vadd.f32 %v5168_v26, %v12622_v38  ;;  %v5170_v30 = vpop.f32.mrb[45].mxu1  ;;  %6052 = vmatprep.subr.bf16.mxu0 %v11327_v23  ;;  %6134 = vmatprep.subr.bf16.mxu1 %v11330_v24  ;;  %v11342_v38 = vld [vmem:[#allocation13 + $0x30c] ss:$16 sps:$4 sm:$0xff]   ;;  %v11391_v24 = vld [vmem:[#allocation15 + $0x20] ss:$16 sps:$4 sm:$0xff]  }
 0x6e9   :  { %v5171_v33 = vadd.f32 %v5170_v30, %v12624_v50  ;;  %v5172_v34 = vpop.f32.mrb[46].mxu1  ;;  %v11345_v50 = vld [vmem:[#allocation13 + $0x324] ss:$16 sps:$4 sm:$0xff]   ;;  %v11396_v23 = vld [vmem:[#allocation15 + $0x2c] ss:$16 sps:$4 sm:$0xff]  }
 0x6ea   :  { %v12658_v35 = vadd.f32 %v5188_v25, %v5169_v29  ;;  %v5173_v37 = vpop.f32.mrb[47].mxu1  ;;  %v11394_v25 = vld [vmem:[#allocation15 + $0x28] ss:$16 sps:$4 sm:$0xff]   ;;  %v11399_v26 = vld [vmem:[#allocation15 + $0x44] ss:$16 sps:$4 sm:$0xff]  }
 0x6eb   :  { %v5200_v39 = vadd.f32 %v5192_v57, %v5171_v33  ;;  %6053 = vmatpush1.bf16.msra.mxu0 %v11325_v27  ;;  %6135 = vmatpush1.bf16.msra.mxu1 %v11328_v28  ;;  %v11402_v57 = vld [vmem:[#allocation15 + $0x4c] ss:$16 sps:$4 sm:$0xff]   ;;  %v11397_v27 = vld [vmem:[#allocation15 + $0x40] ss:$16 sps:$4 sm:$0xff]   ;;  %v11400_v28 = vld [vmem:[#allocation15 + $0x48] ss:$16 sps:$4 sm:$0xff]  }
 0x6ec   :  { %6054 = vmatprep.subr.bf16.mxu0 %v11333_v31  ;;  %6136 = vmatprep.subr.bf16.mxu1 %v11336_v55  ;;  %v5203_v17 = vmax.f32 %v12658_v35, 0.0  ;;  %v11405_v29 = vld [vmem:[#allocation15 + $0x64] ss:$16 sps:$4 sm:$0xff]   ;;  %v11408_v30 = vld [vmem:[#allocation15 + $0x6c] ss:$16 sps:$4 sm:$0xff]  }
 0x6ed   :  { %v5204_v41 = vmax.f32 %v5200_v39, 0.0  ;;  %v11403_v31 = vld [vmem:[#allocation15 + $0x60] ss:$16 sps:$4 sm:$0xff]   ;;  %v11406_v55 = vld [vmem:[#allocation15 + $0x68] ss:$16 sps:$4 sm:$0xff]  }
 0x6ee   :  { %v5207_v21 = vpack.c.bf16 %v5203_v17, %v5203_v17  ;;  %v11411_v33 = vld [vmem:[#allocation15 + $0x84] ss:$16 sps:$4 sm:$0xff]   ;;  %v11414_v34 = vld [vmem:[#allocation15 + $0x8c] ss:$16 sps:$4 sm:$0xff]   ;;  %v11409_v35 = vld [vmem:[#allocation15 + $0x80] ss:$16 sps:$4 sm:$0xff]  }
 0x6ef   :  { %v5208_v42 = vpack.c.bf16 %v5204_v41, %v5204_v41  ;;  %6055 = vmatpush1.bf16.msra.mxu0 %v11331_v15  ;;  %6137 = vmatpush1.bf16.msra.mxu1 %v11334_v3  ;;  %v11412_v37 = vld [vmem:[#allocation15 + $0x88] ss:$16 sps:$4 sm:$0xff]   ;;  %v11417_v39 = vld [vmem:[#allocation15 + $0xa4] ss:$16 sps:$4 sm:$0xff]   ;;  %v11420_v15 = vld [vmem:[#allocation15 + $0xac] ss:$16 sps:$4 sm:$0xff]  }
 0x6f0   :  { %6056 = vmatprep.subr.bf16.mxu0 %v11339_v40  ;;  %6138 = vmatprep.subr.bf16.mxu1 %v11342_v38  ;;  %v11415_v3 = vld [vmem:[#allocation15 + $0xa0] ss:$16 sps:$4 sm:$0xff]   ;;  %v11418_v40 = vld [vmem:[#allocation15 + $0xa8] ss:$16 sps:$4 sm:$0xff]   ;;  %v11423_v38 = vld [vmem:[#allocation15 + $0xc4] ss:$16 sps:$4 sm:$0xff]  }
 0x6f1   :  { %6072 = vmatprep.mubr.bf16.mxu0 %v5208_v42  ;;  %6154 = vmatprep.mubr.bf16.mxu1 %v5208_v42  ;;  %v11426_v41 = vld [vmem:[#allocation15 + $0xcc] ss:$16 sps:$4 sm:$0xff]   ;;  %v11421_v42 = vld [vmem:[#allocation15 + $0xc0] ss:$16 sps:$4 sm:$0xff]  }
 0x6f2   :  { %v11474_v17 = vld [vmem:[#allocation15 + $0x1cc] ss:$16 sps:$4 sm:$0xff]  }
 0x6f3   :  { %6057 = vmatpush1.bf16.msra.mxu0 %v11337_v36  ;;  %6139 = vmatpush1.bf16.msra.mxu1 %v11340_v43  ;;  %v11424_v36 = vld [vmem:[#allocation15 + $0xc8] ss:$16 sps:$4 sm:$0xff]   ;;  %v11429_v43 = vld [vmem:[#allocation15 + $0xe4] ss:$16 sps:$4 sm:$0xff]  }
 0x6f4   :  { %6058 = vmatprep.subr.bf16.mxu0 %v11345_v50  ;;  %6140 = vmatprep.subr.bf16.mxu1 %v11348_v44  ;;  %v11432_v50 = vld [vmem:[#allocation15 + $0xec] ss:$16 sps:$4 sm:$0xff]   ;;  %v11427_v44 = vld [vmem:[#allocation15 + $0xe0] ss:$16 sps:$4 sm:$0xff]  }
 0x6f7   :  { %6059 = vmatpush1.bf16.msra.mxu0 %v11343_v45  ;;  %6141 = vmatpush1.bf16.msra.mxu1 %v11346_v46  ;;  %v11430_v45 = vld [vmem:[#allocation15 + $0xe8] ss:$16 sps:$4 sm:$0xff]   ;;  %v11435_v46 = vld [vmem:[#allocation15 + $0x104] ss:$16 sps:$4 sm:$0xff]  }
 0x6f8   :  { %6060 = vmatprep.subr.bf16.mxu0 %v11351_v47  ;;  %6142 = vmatprep.subr.bf16.mxu1 %v11354_v48  ;;  %v11438_v47 = vld [vmem:[#allocation15 + $0x10c] ss:$16 sps:$4 sm:$0xff]   ;;  %v11433_v48 = vld [vmem:[#allocation15 + $0x100] ss:$16 sps:$4 sm:$0xff]  }
 0x6fb   :  { %6061 = vmatpush1.bf16.msra.mxu0 %v11349_v52  ;;  %6143 = vmatpush1.bf16.msra.mxu1 %v11352_v53  ;;  %v11436_v52 = vld [vmem:[#allocation15 + $0x108] ss:$16 sps:$4 sm:$0xff]   ;;  %v11441_v53 = vld [vmem:[#allocation15 + $0x124] ss:$16 sps:$4 sm:$0xff]  }
 0x6fc   :  { %6062 = vmatprep.subr.bf16.mxu0 %v11357_v61  ;;  %6144 = vmatprep.subr.bf16.mxu1 %v11360_v62  ;;  %v11444_v61 = vld [vmem:[#allocation15 + $0x12c] ss:$16 sps:$4 sm:$0xff]   ;;  %v11439_v62 = vld [vmem:[#allocation15 + $0x120] ss:$16 sps:$4 sm:$0xff]  }
 0x6ff   :  { %6063 = vmatpush1.bf16.msra.mxu0 %v11355_v63  ;;  %6145 = vmatpush1.bf16.msra.mxu1 %v11358_v1  ;;  %v11442_v63 = vld [vmem:[#allocation15 + $0x128] ss:$16 sps:$4 sm:$0xff]   ;;  %v11447_v1 = vld [vmem:[#allocation15 + $0x144] ss:$16 sps:$4 sm:$0xff]  }
 0x700   :  { %6064 = vmatprep.subr.bf16.mxu0 %v11363_v0  ;;  %6146 = vmatprep.subr.bf16.mxu1 %v11366_v2  ;;  %v11450_v0 = vld [vmem:[#allocation15 + $0x14c] ss:$16 sps:$4 sm:$0xff]   ;;  %v11445_v2 = vld [vmem:[#allocation15 + $0x140] ss:$16 sps:$4 sm:$0xff]  }
 0x703   :  { %6065 = vmatpush1.bf16.msra.mxu0 %v11361_v51  ;;  %6147 = vmatpush1.bf16.msra.mxu1 %v11364_v4  ;;  %v11448_v51 = vld [vmem:[#allocation15 + $0x148] ss:$16 sps:$4 sm:$0xff]   ;;  %v11453_v4 = vld [vmem:[#allocation15 + $0x164] ss:$16 sps:$4 sm:$0xff]  }
 0x704   :  { %6066 = vmatprep.subr.bf16.mxu0 %v11369_v5  ;;  %6148 = vmatprep.subr.bf16.mxu1 %v11372_v49  ;;  %v11456_v5 = vld [vmem:[#allocation15 + $0x16c] ss:$16 sps:$4 sm:$0xff]   ;;  %v11451_v49 = vld [vmem:[#allocation15 + $0x160] ss:$16 sps:$4 sm:$0xff]  }
 0x707   :  { %6067 = vmatpush1.bf16.msra.mxu0 %v11367_v54  ;;  %6149 = vmatpush1.bf16.msra.mxu1 %v11370_v7  ;;  %v11454_v54 = vld [vmem:[#allocation15 + $0x168] ss:$16 sps:$4 sm:$0xff]   ;;  %v11459_v7 = vld [vmem:[#allocation15 + $0x184] ss:$16 sps:$4 sm:$0xff]  }
 0x708   :  { %6068 = vmatprep.subr.bf16.mxu0 %v11375_v6  ;;  %6150 = vmatprep.subr.bf16.mxu1 %v11378_v8  ;;  %v11462_v6 = vld [vmem:[#allocation15 + $0x18c] ss:$16 sps:$4 sm:$0xff]   ;;  %v11457_v8 = vld [vmem:[#allocation15 + $0x180] ss:$16 sps:$4 sm:$0xff]  }
 0x70b   :  { %6069 = vmatpush1.bf16.msra.mxu0 %v11373_v9  ;;  %6151 = vmatpush1.bf16.msra.mxu1 %v11376_v10  ;;  %v11460_v9 = vld [vmem:[#allocation15 + $0x188] ss:$16 sps:$4 sm:$0xff]   ;;  %v11465_v10 = vld [vmem:[#allocation15 + $0x1a4] ss:$16 sps:$4 sm:$0xff]  }
 0x70c   :  { %6070 = vmatprep.subr.bf16.mxu0 %v11381_v11  ;;  %6152 = vmatprep.subr.bf16.mxu1 %v11384_v12  ;;  %v11468_v11 = vld [vmem:[#allocation15 + $0x1ac] ss:$16 sps:$4 sm:$0xff]   ;;  %v11463_v12 = vld [vmem:[#allocation15 + $0x1a0] ss:$16 sps:$4 sm:$0xff]  }
 0x70f   :  { %6071 = vmatpush1.bf16.msra.mxu0 %v11379_v13  ;;  %6153 = vmatpush1.bf16.msra.mxu1 %v11382_v14  ;;  %v11466_v13 = vld [vmem:[#allocation15 + $0x1a8] ss:$16 sps:$4 sm:$0xff]   ;;  %v11471_v14 = vld [vmem:[#allocation15 + $0x1c4] ss:$16 sps:$4 sm:$0xff]  }
 0x710   :  { %6961 = vmatprep.subr.bf16.mxu0 %v11387_v18  ;;  %7043 = vmatprep.subr.bf16.mxu1 %v11390_v19  ;;  %v11469_v18 = vld [vmem:[#allocation15 + $0x1c0] ss:$16 sps:$4 sm:$0xff]   ;;  %v11472_v19 = vld [vmem:[#allocation15 + $0x1c8] ss:$16 sps:$4 sm:$0xff]  }
 0x712   :  { %6073 = vmatmul.mubr.bf16.vlgmr.msra.gmra.mrb[28].mxu0 %v5207_v21  ;;  %6155 = vmatmul.mubr.bf16.vlgmr.msra.gmra.mrb[48].mxu1 %v5207_v21  ;;  %v11475_v21 = vld [vmem:[#allocation15 + $0x1e0] ss:$16 sps:$4 sm:$0xff]  }
 0x713   :  { %6962 = vmatpush1.bf16.msra.mxu0 %v11385_v16  ;;  %7044 = vmatpush1.bf16.msra.mxu1 %v11388_v20  ;;  %v11477_v16 = vld [vmem:[#allocation15 + $0x1e4] ss:$16 sps:$4 sm:$0xff]   ;;  %v11480_v20 = vld [vmem:[#allocation15 + $0x1ec] ss:$16 sps:$4 sm:$0xff]  }
 0x714   :  { %6963 = vmatprep.subr.bf16.mxu0 %v11393_v22  ;;  %7045 = vmatprep.subr.bf16.mxu1 %v11396_v23  ;;  %v11478_v22 = vld [vmem:[#allocation15 + $0x1e8] ss:$16 sps:$4 sm:$0xff]   ;;  %v11483_v23 = vld [vmem:[#allocation15 + $0x204] ss:$16 sps:$4 sm:$0xff]  }
 0x717   :  { %6964 = vmatpush1.bf16.msra.mxu0 %v11391_v24  ;;  %7046 = vmatpush1.bf16.msra.mxu1 %v11394_v25  ;;  %v11486_v24 = vld [vmem:[#allocation15 + $0x20c] ss:$16 sps:$4 sm:$0xff]   ;;  %v12664_v25 = vld [vmem:[%s12773_s16] sm:$0xf] }
 0x718   :  { %6965 = vmatprep.subr.bf16.mxu0 %v11399_v26  ;;  %7047 = vmatprep.subr.bf16.mxu1 %v11402_v57  ;;  %v5342_v26 = vrot.slane %v12664_v25, %v12549_v58  ;;  %v5346_v57 = vrot.slane %v12664_v25, %v12552_v60 }
 0x71b   :  { %6966 = vmatpush1.bf16.msra.mxu0 %v11397_v27  ;;  %7048 = vmatpush1.bf16.msra.mxu1 %v11400_v28  ;;  %v5354_v27 = vrot.slane %v12664_v25, %v12570_v32 }
 0x71c   :  { %6967 = vmatprep.subr.bf16.mxu0 %v11405_v29  ;;  %7049 = vmatprep.subr.bf16.mxu1 %v11408_v30 }
 0x71f   :  { %6968 = vmatpush1.bf16.msra.mxu0 %v11403_v31  ;;  %7050 = vmatpush1.bf16.msra.mxu1 %v11406_v55 }
 0x720   :  { %6969 = vmatprep.subr.bf16.mxu0 %v11411_v33  ;;  %7051 = vmatprep.subr.bf16.mxu1 %v11414_v34 }
 0x723   :  { %6970 = vmatpush1.bf16.msra.mxu0 %v11409_v35  ;;  %7052 = vmatpush1.bf16.msra.mxu1 %v11412_v37 }
 0x724   :  { %6971 = vmatprep.subr.bf16.mxu0 %v11417_v39  ;;  %7053 = vmatprep.subr.bf16.mxu1 %v11420_v15 }
 0x727   :  { %6972 = vmatpush1.bf16.msra.mxu0 %v11415_v3  ;;  %7054 = vmatpush1.bf16.msra.mxu1 %v11418_v40 }
 0x728   :  { %6973 = vmatprep.subr.bf16.mxu0 %v11423_v38  ;;  %7055 = vmatprep.subr.bf16.mxu1 %v11426_v41 }
 0x72b   :  { %6974 = vmatpush1.bf16.msra.mxu0 %v11421_v42  ;;  %7056 = vmatpush1.bf16.msra.mxu1 %v11424_v36  ;;  %v11481_v42 = vld [vmem:[#allocation15 + $0x200] ss:$16 sps:$4 sm:$0xff]   ;;  %v11484_v36 = vld [vmem:[#allocation15 + $0x208] ss:$16 sps:$4 sm:$0xff]  }
 0x72c   :  { %6975 = vmatprep.subr.bf16.mxu0 %v11429_v43  ;;  %7057 = vmatprep.subr.bf16.mxu1 %v11432_v50  ;;  %v11489_v50 = vld [vmem:[#allocation15 + $0x224] ss:$16 sps:$4 sm:$0xff]  }
 0x72f   :  { %6976 = vmatpush1.bf16.msra.mxu0 %v11427_v44  ;;  %7058 = vmatpush1.bf16.msra.mxu1 %v11430_v45  ;;  %v11492_v44 = vld [vmem:[#allocation15 + $0x22c] ss:$16 sps:$4 sm:$0xff]  }
 0x730   :  { %6977 = vmatprep.subr.bf16.mxu0 %v11435_v46  ;;  %7059 = vmatprep.subr.bf16.mxu1 %v11438_v47  ;;  %v11487_v46 = vld [vmem:[#allocation15 + $0x220] ss:$16 sps:$4 sm:$0xff]   ;;  %v11490_v47 = vld [vmem:[#allocation15 + $0x228] ss:$16 sps:$4 sm:$0xff]  }
 0x733   :  { %6978 = vmatpush1.bf16.msra.mxu0 %v11433_v48  ;;  %7060 = vmatpush1.bf16.msra.mxu1 %v11436_v52  ;;  %v11495_v48 = vld [vmem:[#allocation15 + $0x244] ss:$16 sps:$4 sm:$0xff]   ;;  %v11498_v52 = vld [vmem:[#allocation15 + $0x24c] ss:$16 sps:$4 sm:$0xff]  }
 0x734   :  { %6979 = vmatprep.subr.bf16.mxu0 %v11441_v53  ;;  %7061 = vmatprep.subr.bf16.mxu1 %v11444_v61  ;;  %v11493_v53 = vld [vmem:[#allocation15 + $0x240] ss:$16 sps:$4 sm:$0xff]   ;;  %v11496_v61 = vld [vmem:[#allocation15 + $0x248] ss:$16 sps:$4 sm:$0xff]  }
 0x737   :  { %6980 = vmatpush1.bf16.msra.mxu0 %v11439_v62  ;;  %7062 = vmatpush1.bf16.msra.mxu1 %v11442_v63  ;;  %v11501_v62 = vld [vmem:[#allocation15 + $0x264] ss:$16 sps:$4 sm:$0xff]   ;;  %v11504_v63 = vld [vmem:[#allocation15 + $0x26c] ss:$16 sps:$4 sm:$0xff]  }
 0x738   :  { %6981 = vmatprep.subr.bf16.mxu0 %v11447_v1  ;;  %7063 = vmatprep.subr.bf16.mxu1 %v11450_v0  ;;  %v11499_v1 = vld [vmem:[#allocation15 + $0x260] ss:$16 sps:$4 sm:$0xff]   ;;  %v11502_v0 = vld [vmem:[#allocation15 + $0x268] ss:$16 sps:$4 sm:$0xff]  }
 0x73b   :  { %6982 = vmatpush1.bf16.msra.mxu0 %v11445_v2  ;;  %7064 = vmatpush1.bf16.msra.mxu1 %v11448_v51  ;;  %v11507_v2 = vld [vmem:[#allocation15 + $0x284] ss:$16 sps:$4 sm:$0xff]   ;;  %v11510_v51 = vld [vmem:[#allocation15 + $0x28c] ss:$16 sps:$4 sm:$0xff]  }
 0x73c   :  { %6983 = vmatprep.subr.bf16.mxu0 %v11453_v4  ;;  %7065 = vmatprep.subr.bf16.mxu1 %v11456_v5  ;;  %v11505_v4 = vld [vmem:[#allocation15 + $0x280] ss:$16 sps:$4 sm:$0xff]   ;;  %v11508_v5 = vld [vmem:[#allocation15 + $0x288] ss:$16 sps:$4 sm:$0xff]  }
 0x73f   :  { %6984 = vmatpush1.bf16.msra.mxu0 %v11451_v49  ;;  %7066 = vmatpush1.bf16.msra.mxu1 %v11454_v54  ;;  %v11513_v49 = vld [vmem:[#allocation15 + $0x2a4] ss:$16 sps:$4 sm:$0xff]   ;;  %v11516_v54 = vld [vmem:[#allocation15 + $0x2ac] ss:$16 sps:$4 sm:$0xff]  }
 0x740   :  { %6985 = vmatprep.subr.bf16.mxu0 %v11459_v7  ;;  %7067 = vmatprep.subr.bf16.mxu1 %v11462_v6  ;;  %v11511_v7 = vld [vmem:[#allocation15 + $0x2a0] ss:$16 sps:$4 sm:$0xff]   ;;  %v11514_v6 = vld [vmem:[#allocation15 + $0x2a8] ss:$16 sps:$4 sm:$0xff]  }
 0x743   :  { %6986 = vmatpush1.bf16.msra.mxu0 %v11457_v8  ;;  %7068 = vmatpush1.bf16.msra.mxu1 %v11460_v9  ;;  %v11519_v8 = vld [vmem:[#allocation15 + $0x2c4] ss:$16 sps:$4 sm:$0xff]   ;;  %v11522_v9 = vld [vmem:[#allocation15 + $0x2cc] ss:$16 sps:$4 sm:$0xff]  }
 0x744   :  { %6987 = vmatprep.subr.bf16.mxu0 %v11465_v10  ;;  %7069 = vmatprep.subr.bf16.mxu1 %v11468_v11  ;;  %v11517_v10 = vld [vmem:[#allocation15 + $0x2c0] ss:$16 sps:$4 sm:$0xff]   ;;  %v11520_v11 = vld [vmem:[#allocation15 + $0x2c8] ss:$16 sps:$4 sm:$0xff]  }
 0x747   :  { %6988 = vmatpush1.bf16.msra.mxu0 %v11463_v12  ;;  %7070 = vmatpush1.bf16.msra.mxu1 %v11466_v13  ;;  %v11525_v12 = vld [vmem:[#allocation15 + $0x2e4] ss:$16 sps:$4 sm:$0xff]   ;;  %v11528_v13 = vld [vmem:[#allocation15 + $0x2ec] ss:$16 sps:$4 sm:$0xff]  }
 0x748   :  { %6989 = vmatprep.subr.bf16.mxu0 %v11471_v14  ;;  %7071 = vmatprep.subr.bf16.mxu1 %v11474_v17  ;;  %v11523_v14 = vld [vmem:[#allocation15 + $0x2e0] ss:$16 sps:$4 sm:$0xff]   ;;  %v11526_v17 = vld [vmem:[#allocation15 + $0x2e8] ss:$16 sps:$4 sm:$0xff]  }
 0x74b   :  { %6990 = vmatpush1.bf16.msra.mxu0 %v11469_v18  ;;  %7072 = vmatpush1.bf16.msra.mxu1 %v11472_v19  ;;  %v11531_v18 = vld [vmem:[#allocation15 + $0x304] ss:$16 sps:$4 sm:$0xff]   ;;  %v11534_v19 = vld [vmem:[#allocation15 + $0x30c] ss:$16 sps:$4 sm:$0xff]  }
 0x74c   :  { %6991 = vmatprep.subr.bf16.mxu0 %v11477_v16  ;;  %7073 = vmatprep.subr.bf16.mxu1 %v11480_v20  ;;  %v11529_v16 = vld [vmem:[#allocation15 + $0x300] ss:$16 sps:$4 sm:$0xff]   ;;  %v11532_v20 = vld [vmem:[#allocation15 + $0x308] ss:$16 sps:$4 sm:$0xff]  }
 0x74f   :  { %6992 = vmatpush1.bf16.msra.mxu0 %v11475_v21  ;;  %7074 = vmatpush1.bf16.msra.mxu1 %v11478_v22  ;;  %v11537_v21 = vld [vmem:[#allocation15 + $0x324] ss:$16 sps:$4 sm:$0xff]   ;;  %v11540_v22 = vld [vmem:[#allocation15 + $0x32c] ss:$16 sps:$4 sm:$0xff]  }
 0x750   :  { %7002 = vmatprep.subr.bf16.mxu0 %v11483_v23  ;;  %7084 = vmatprep.subr.bf16.mxu1 %v11486_v24  ;;  %v11535_v23 = vld [vmem:[#allocation15 + $0x320] ss:$16 sps:$4 sm:$0xff]   ;;  %v11538_v24 = vld [vmem:[#allocation15 + $0x328] ss:$16 sps:$4 sm:$0xff]  }
 0x7e5   :  { %v6074_v28 = vpop.f32.mrb[28].mxu0  ;;  %v12672_v29 = vpop.f32.mrb[48].mxu1 }
 0x7e6   :  { %v10147_v30 = vadd.f32 %v6074_v28, %v5342_v26  ;;  %v6076_v31 = vpop.f32.mrb[29].mxu0  ;;  %v6158_v55 = vpop.f32.mrb[49].mxu1  ;;  %v11543_v26 = vld [vmem:[#allocation15 + $0x344] ss:$16 sps:$4 sm:$0xff]   ;;  %v11544_v28 = vld [vmem:[#allocation15 + $0x348] ss:$16 sps:$4 sm:$0xff]  }
 0x7e7   :  { %v10148_v33 = vadd.f32 %v6076_v31, %v5346_v57  ;;  %v10150_v34 = vadd.f32 %v6158_v55, %v5354_v27  ;;  %v6078_v35 = vpop.f32.mrb[30].mxu0  ;;  %v6160_v37 = vpop.f32.mrb[50].mxu1  ;;  %v11546_v57 = vld [vmem:[#allocation15 + $0x34c] ss:$16 sps:$4 sm:$0xff]   ;;  %v11541_v27 = vld [vmem:[#allocation15 + $0x340] ss:$16 sps:$4 sm:$0xff]  }
 0x7e8   :  { %v6163_v39 = vmax.f32 %v10147_v30, 0.0  ;;  %v6079_v15 = vpop.f32.mrb[31].mxu0  ;;  %v6161_v3 = vpop.f32.mrb[51].mxu1  ;;  %v11549_v30 = vld [vmem:[#allocation15 + $0x364] ss:$16 sps:$4 sm:$0xff]  }
 0x7e9   :  { %v6164_v40 = vmax.f32 %v10148_v33, 0.0  ;;  %v6166_v38 = vmax.f32 %v10150_v34, 0.0  ;;  %v11552_v31 = vld [vmem:[#allocation15 + $0x36c] ss:$16 sps:$4 sm:$0xff]   ;;  %v11547_v55 = vld [vmem:[#allocation15 + $0x360] ss:$16 sps:$4 sm:$0xff]  }
 0x7ea   :  { %v6167_v43 = vpack.c.bf16 %v6163_v39, %v6163_v39  ;;  %v11550_v33 = vld [vmem:[#allocation15 + $0x368] ss:$16 sps:$4 sm:$0xff]   ;;  %v11555_v34 = vld [vmem:[#allocation15 + $0x384] ss:$16 sps:$4 sm:$0xff]   ;;  %v11558_v35 = vld [vmem:[#allocation15 + $0x38c] ss:$16 sps:$4 sm:$0xff]  }
 0x7eb   :  { %v6168_v41 = vpack.c.bf16 %v6164_v40, %v6164_v40  ;;  %v6170_v45 = vpack.c.bf16 %v6166_v38, %v6166_v38  ;;  %v11553_v37 = vld [vmem:[#allocation15 + $0x380] ss:$16 sps:$4 sm:$0xff]   ;;  %v11556_v39 = vld [vmem:[#allocation15 + $0x388] ss:$16 sps:$4 sm:$0xff]   ;;  %v11561_v15 = vld [vmem:[#allocation15 + $0x3a4] ss:$16 sps:$4 sm:$0xff]  }
 0x7ec   :  { %v11564_v3 = vld [vmem:[#allocation15 + $0x3ac] ss:$16 sps:$4 sm:$0xff]   ;;  %v11559_v40 = vld [vmem:[#allocation15 + $0x3a0] ss:$16 sps:$4 sm:$0xff]   ;;  %v11562_v38 = vld [vmem:[#allocation15 + $0x3a8] ss:$16 sps:$4 sm:$0xff]  }
 0x7ed   :  { %6993 = vmatprep.mubr.bf16.mxu0 %v6168_v41  ;;  %7075 = vmatprep.mubr.bf16.mxu1 %v6168_v41  ;;  %v5350_v41 = vrot.slane %v12664_v25, %v12567_v59  ;;  %v11579_v25 = vld [vmem:[#allocation16 + $0x4] ss:$28 sps:$4 sm:$0xff]  }
 0x7ee   :  { %6994 = vmatmul.mubr.bf16.vlgmr.msra.gmra.mrb[32].mxu0 %v6167_v43  ;;  %7076 = vmatmul.mubr.bf16.vlgmr.msra.gmra.mrb[52].mxu1 %v6167_v43  ;;  %v11565_v43 = vld [vmem:[#allocation15 + $0x3c0] ss:$16 sps:$4 sm:$0xff]  }
 0x7ef   :  { %7003 = vmatpush1.bf16.msra.mxu0 %v11481_v42  ;;  %7085 = vmatpush1.bf16.msra.mxu1 %v11484_v36  ;;  %v11567_v42 = vld [vmem:[#allocation15 + $0x3c4] ss:$16 sps:$4 sm:$0xff]   ;;  %v11570_v36 = vld [vmem:[#allocation15 + $0x3cc] ss:$16 sps:$4 sm:$0xff]  }
 0x7f0   :  { %7034 = vmatprep.mubr.bf16.mxu0 %v6170_v45  ;;  %7116 = vmatprep.mubr.bf16.mxu1 %v6170_v45  ;;  %v11573_v45 = vld [vmem:[#allocation15 + $0x3e4] ss:$16 sps:$4 sm:$0xff]  }
 0x7f1   :  { %7004 = vmatprep.subr.bf16.mxu0 %v11489_v50  ;;  %7086 = vmatprep.subr.bf16.mxu1 %v11492_v44  ;;  %v11568_v50 = vld [vmem:[#allocation15 + $0x3c8] ss:$16 sps:$4 sm:$0xff]   ;;  %v10149_v44 = vadd.f32 %v12672_v29, %v5350_v41  ;;  %v11646_v41 = vld [vmem:[#allocation16 + $0x270] ss:$28 sps:$4 sm:$0xff]  }
 0x7f2   :  { %v11585_v29 = vld [vmem:[#allocation16 + $0x3c] ss:$28 sps:$4 sm:$0xff]  }
 0x7f3   :  { %7005 = vmatpush1.bf16.msra.mxu0 %v11487_v46  ;;  %7087 = vmatpush1.bf16.msra.mxu1 %v11490_v47  ;;  %v11576_v46 = vld [vmem:[#allocation15 + $0x3ec] ss:$16 sps:$4 sm:$0xff]   ;;  %v11571_v47 = vld [vmem:[#allocation15 + $0x3e0] ss:$16 sps:$4 sm:$0xff]  }
 0x7f4   :  { %7006 = vmatprep.subr.bf16.mxu0 %v11495_v48  ;;  %7088 = vmatprep.subr.bf16.mxu1 %v11498_v52  ;;  %v11574_v48 = vld [vmem:[#allocation15 + $0x3e8] ss:$16 sps:$4 sm:$0xff]   ;;  %v6165_v52 = vmax.f32 %v10149_v44, 0.0 }
 0x7f5   :  { %v11657_v44 = vld [vmem:[#allocation16 + $0x2dc] ss:$28 sps:$4 sm:$0xff]  }
 0x7f7   :  { %7007 = vmatpush1.bf16.msra.mxu0 %v11493_v53  ;;  %7089 = vmatpush1.bf16.msra.mxu1 %v11496_v61  ;;  %v11582_v53 = vld [vmem:[#allocation16 + $0xc] ss:$28 sps:$4 sm:$0xff]   ;;  %v11577_v61 = vld [vmem:[#allocation16] ss:$28 sps:$4 sm:$0xff]  }
 0x7f8   :  { %7008 = vmatprep.subr.bf16.mxu0 %v11501_v62  ;;  %7090 = vmatprep.subr.bf16.mxu1 %v11504_v63  ;;  %v11580_v62 = vld [vmem:[#allocation16 + $0x8] ss:$28 sps:$4 sm:$0xff]   ;;  %v6169_v63 = vpack.c.bf16 %v6165_v52, %v6165_v52  ;;  %v11666_v52 = vld [vmem:[#allocation16 + $0x31c] ss:$28 sps:$4 sm:$0xff]  }
 0x7fb   :  { %7009 = vmatpush1.bf16.msra.mxu0 %v11499_v1  ;;  %7091 = vmatpush1.bf16.msra.mxu1 %v11502_v0  ;;  %v11588_v1 = vld [vmem:[#allocation16 + $0x44] ss:$28 sps:$4 sm:$0xff]   ;;  %v11583_v0 = vld [vmem:[#allocation16 + $0x38] ss:$28 sps:$4 sm:$0xff]  }
 0x7fc   :  { %7010 = vmatprep.subr.bf16.mxu0 %v11507_v2  ;;  %7092 = vmatprep.subr.bf16.mxu1 %v11510_v51  ;;  %v11586_v2 = vld [vmem:[#allocation16 + $0x40] ss:$28 sps:$4 sm:$0xff]   ;;  %v11591_v51 = vld [vmem:[#allocation16 + $0x74] ss:$28 sps:$4 sm:$0xff]  }
 0x7ff   :  { %7011 = vmatpush1.bf16.msra.mxu0 %v11505_v4  ;;  %7093 = vmatpush1.bf16.msra.mxu1 %v11508_v5  ;;  %v11594_v4 = vld [vmem:[#allocation16 + $0x7c] ss:$28 sps:$4 sm:$0xff]   ;;  %v11589_v5 = vld [vmem:[#allocation16 + $0x70] ss:$28 sps:$4 sm:$0xff]  }
 0x800   :  { %7012 = vmatprep.subr.bf16.mxu0 %v11513_v49  ;;  %7094 = vmatprep.subr.bf16.mxu1 %v11516_v54  ;;  %v11592_v49 = vld [vmem:[#allocation16 + $0x78] ss:$28 sps:$4 sm:$0xff]   ;;  %v11597_v54 = vld [vmem:[#allocation16 + $0xac] ss:$28 sps:$4 sm:$0xff]  }
 0x803   :  { %7013 = vmatpush1.bf16.msra.mxu0 %v11511_v7  ;;  %7095 = vmatpush1.bf16.msra.mxu1 %v11514_v6  ;;  %v11600_v7 = vld [vmem:[#allocation16 + $0xb4] ss:$28 sps:$4 sm:$0xff]   ;;  %v11595_v6 = vld [vmem:[#allocation16 + $0xa8] ss:$28 sps:$4 sm:$0xff]  }
 0x804   :  { %7014 = vmatprep.subr.bf16.mxu0 %v11519_v8  ;;  %7096 = vmatprep.subr.bf16.mxu1 %v11522_v9  ;;  %v11598_v8 = vld [vmem:[#allocation16 + $0xb0] ss:$28 sps:$4 sm:$0xff]   ;;  %v11603_v9 = vld [vmem:[#allocation16 + $0xe4] ss:$28 sps:$4 sm:$0xff]  }
 0x807   :  { %7015 = vmatpush1.bf16.msra.mxu0 %v11517_v10  ;;  %7097 = vmatpush1.bf16.msra.mxu1 %v11520_v11  ;;  %v11606_v10 = vld [vmem:[#allocation16 + $0xec] ss:$28 sps:$4 sm:$0xff]   ;;  %v11601_v11 = vld [vmem:[#allocation16 + $0xe0] ss:$28 sps:$4 sm:$0xff]  }
 0x808   :  { %7016 = vmatprep.subr.bf16.mxu0 %v11525_v12  ;;  %7098 = vmatprep.subr.bf16.mxu1 %v11528_v13  ;;  %v11604_v12 = vld [vmem:[#allocation16 + $0xe8] ss:$28 sps:$4 sm:$0xff]   ;;  %v11609_v13 = vld [vmem:[#allocation16 + $0x11c] ss:$28 sps:$4 sm:$0xff]  }
 0x80b   :  { %7017 = vmatpush1.bf16.msra.mxu0 %v11523_v14  ;;  %7099 = vmatpush1.bf16.msra.mxu1 %v11526_v17  ;;  %v11612_v14 = vld [vmem:[#allocation16 + $0x124] ss:$28 sps:$4 sm:$0xff]   ;;  %v11607_v17 = vld [vmem:[#allocation16 + $0x118] ss:$28 sps:$4 sm:$0xff]  }
 0x80c   :  { %7018 = vmatprep.subr.bf16.mxu0 %v11531_v18  ;;  %7100 = vmatprep.subr.bf16.mxu1 %v11534_v19  ;;  %v11610_v18 = vld [vmem:[#allocation16 + $0x120] ss:$28 sps:$4 sm:$0xff]   ;;  %v11615_v19 = vld [vmem:[#allocation16 + $0x154] ss:$28 sps:$4 sm:$0xff]  }
 0x80f   :  { %7019 = vmatpush1.bf16.msra.mxu0 %v11529_v16  ;;  %7101 = vmatpush1.bf16.msra.mxu1 %v11532_v20  ;;  %v11618_v16 = vld [vmem:[#allocation16 + $0x15c] ss:$28 sps:$4 sm:$0xff]   ;;  %v11613_v20 = vld [vmem:[#allocation16 + $0x150] ss:$28 sps:$4 sm:$0xff]  }
 0x810   :  { %7020 = vmatprep.subr.bf16.mxu0 %v11537_v21  ;;  %7102 = vmatprep.subr.bf16.mxu1 %v11540_v22  ;;  %v11616_v21 = vld [vmem:[#allocation16 + $0x158] ss:$28 sps:$4 sm:$0xff]   ;;  %v11621_v22 = vld [vmem:[#allocation16 + $0x18c] ss:$28 sps:$4 sm:$0xff]  }
 0x813   :  { %7021 = vmatpush1.bf16.msra.mxu0 %v11535_v23  ;;  %7103 = vmatpush1.bf16.msra.mxu1 %v11538_v24  ;;  %v11624_v23 = vld [vmem:[#allocation16 + $0x194] ss:$28 sps:$4 sm:$0xff]   ;;  %v11619_v24 = vld [vmem:[#allocation16 + $0x188] ss:$28 sps:$4 sm:$0xff]  }
 0x814   :  { %7022 = vmatprep.subr.bf16.mxu0 %v11543_v26  ;;  %7104 = vmatprep.subr.bf16.mxu1 %v11546_v57  ;;  %v11622_v26 = vld [vmem:[#allocation16 + $0x190] ss:$28 sps:$4 sm:$0xff]   ;;  %v11627_v57 = vld [vmem:[#allocation16 + $0x1c4] ss:$28 sps:$4 sm:$0xff]  }
 0x817   :  { %7023 = vmatpush1.bf16.msra.mxu0 %v11541_v27  ;;  %7105 = vmatpush1.bf16.msra.mxu1 %v11544_v28  ;;  %v11630_v27 = vld [vmem:[#allocation16 + $0x1cc] ss:$28 sps:$4 sm:$0xff]   ;;  %v11625_v28 = vld [vmem:[#allocation16 + $0x1c0] ss:$28 sps:$4 sm:$0xff]  }
 0x818   :  { %7024 = vmatprep.subr.bf16.mxu0 %v11549_v30  ;;  %7106 = vmatprep.subr.bf16.mxu1 %v11552_v31  ;;  %v11628_v30 = vld [vmem:[#allocation16 + $0x1c8] ss:$28 sps:$4 sm:$0xff]   ;;  %v11633_v31 = vld [vmem:[#allocation16 + $0x1fc] ss:$28 sps:$4 sm:$0xff]  }
 0x81b   :  { %7025 = vmatpush1.bf16.msra.mxu0 %v11547_v55  ;;  %7107 = vmatpush1.bf16.msra.mxu1 %v11550_v33  ;;  %v11636_v55 = vld [vmem:[#allocation16 + $0x204] ss:$28 sps:$4 sm:$0xff]   ;;  %v11631_v33 = vld [vmem:[#allocation16 + $0x1f8] ss:$28 sps:$4 sm:$0xff]  }
 0x81c   :  { %7026 = vmatprep.subr.bf16.mxu0 %v11555_v34  ;;  %7108 = vmatprep.subr.bf16.mxu1 %v11558_v35  ;;  %v11634_v34 = vld [vmem:[#allocation16 + $0x200] ss:$28 sps:$4 sm:$0xff]   ;;  %v11639_v35 = vld [vmem:[#allocation16 + $0x234] ss:$28 sps:$4 sm:$0xff]  }
 0x81f   :  { %7027 = vmatpush1.bf16.msra.mxu0 %v11553_v37  ;;  %7109 = vmatpush1.bf16.msra.mxu1 %v11556_v39  ;;  %v11642_v37 = vld [vmem:[#allocation16 + $0x23c] ss:$28 sps:$4 sm:$0xff]   ;;  %v11637_v39 = vld [vmem:[#allocation16 + $0x230] ss:$28 sps:$4 sm:$0xff]  }
 0x820   :  { %7028 = vmatprep.subr.bf16.mxu0 %v11561_v15  ;;  %7110 = vmatprep.subr.bf16.mxu1 %v11564_v3  ;;  %v11640_v15 = vld [vmem:[#allocation16 + $0x238] ss:$28 sps:$4 sm:$0xff]   ;;  %v11645_v3 = vld [vmem:[#allocation16 + $0x26c] ss:$28 sps:$4 sm:$0xff]  }
 0x823   :  { %7029 = vmatpush1.bf16.msra.mxu0 %v11559_v40  ;;  %7111 = vmatpush1.bf16.msra.mxu1 %v11562_v38  ;;  %v11648_v40 = vld [vmem:[#allocation16 + $0x274] ss:$28 sps:$4 sm:$0xff]   ;;  %v11643_v38 = vld [vmem:[#allocation16 + $0x268] ss:$28 sps:$4 sm:$0xff]  }
 0x824   :  { %7030 = vmatprep.subr.bf16.mxu0 %v11567_v42  ;;  %7112 = vmatprep.subr.bf16.mxu1 %v11570_v36  ;;  %v11651_v42 = vld [vmem:[#allocation16 + $0x2a4] ss:$28 sps:$4 sm:$0xff]   ;;  %v11654_v36 = vld [vmem:[#allocation16 + $0x2ac] ss:$28 sps:$4 sm:$0xff]  }
 0x827   :  { %7031 = vmatpush1.bf16.msra.mxu0 %v11565_v43  ;;  %7113 = vmatpush1.bf16.msra.mxu1 %v11568_v50  ;;  %v11649_v43 = vld [vmem:[#allocation16 + $0x2a0] ss:$28 sps:$4 sm:$0xff]   ;;  %v11652_v50 = vld [vmem:[#allocation16 + $0x2a8] ss:$28 sps:$4 sm:$0xff]  }
 0x828   :  { %7032 = vmatprep.subr.bf16.mxu0 %v11573_v45  ;;  %7114 = vmatprep.subr.bf16.mxu1 %v11576_v46  ;;  %v11660_v45 = vld [vmem:[#allocation16 + $0x2e4] ss:$28 sps:$4 sm:$0xff]   ;;  %v11655_v46 = vld [vmem:[#allocation16 + $0x2d8] ss:$28 sps:$4 sm:$0xff]  }
 0x82b   :  { %7033 = vmatpush1.bf16.msra.mxu0 %v11571_v47  ;;  %7115 = vmatpush1.bf16.msra.mxu1 %v11574_v48  ;;  %v11658_v47 = vld [vmem:[#allocation16 + $0x2e0] ss:$28 sps:$4 sm:$0xff]   ;;  %v11663_v48 = vld [vmem:[#allocation16 + $0x314] ss:$28 sps:$4 sm:$0xff]  }
 0x82c   :  { %8578 = vmatprep.subr.bf16.mxu0 %v11579_v25  ;;  %8660 = vmatprep.subr.bf16.mxu1 %v11582_v53  ;;  %v11661_v25 = vld [vmem:[#allocation16 + $0x310] ss:$28 sps:$4 sm:$0xff]   ;;  %v11664_v53 = vld [vmem:[#allocation16 + $0x318] ss:$28 sps:$4 sm:$0xff]  }
 0x82e   :  { %7035 = vmatmul.mubr.bf16.vlgmr.msra.gmra.mrb[32].mxu0 %v6169_v63  ;;  %7117 = vmatmul.mubr.bf16.vlgmr.msra.gmra.mrb[52].mxu1 %v6169_v63  ;;  %v11667_v63 = vld [vmem:[#allocation16 + $0x348] ss:$28 sps:$4 sm:$0xff]  }
 0x82f   :  { %8579 = vmatpush1.bf16.msra.mxu0 %v11577_v61  ;;  %8661 = vmatpush1.bf16.msra.mxu1 %v11580_v62  ;;  %v11669_v61 = vld [vmem:[#allocation16 + $0x34c] ss:$28 sps:$4 sm:$0xff]   ;;  %v11672_v62 = vld [vmem:[#allocation16 + $0x354] ss:$28 sps:$4 sm:$0xff]  }
 0x830   :  { %8580 = vmatprep.subr.bf16.mxu0 %v11585_v29  ;;  %8662 = vmatprep.subr.bf16.mxu1 %v11588_v1  ;;  %v11670_v29 = vld [vmem:[#allocation16 + $0x350] ss:$28 sps:$4 sm:$0xff]   ;;  %v11675_v1 = vld [vmem:[#allocation16 + $0x384] ss:$28 sps:$4 sm:$0xff]  }
 0x833   :  { %8581 = vmatpush1.bf16.msra.mxu0 %v11583_v0  ;;  %8663 = vmatpush1.bf16.msra.mxu1 %v11586_v2  ;;  %v11678_v0 = vld [vmem:[#allocation16 + $0x38c] ss:$28 sps:$4 sm:$0xff]   ;;  %v12680_v2 = vld [vmem:[%s12775_s18] sm:$0xf] }
 0x834   :  { %8582 = vmatprep.subr.bf16.mxu0 %v11591_v51  ;;  %8664 = vmatprep.subr.bf16.mxu1 %v11594_v4  ;;  %v6304_v51 = vrot.slane %v12680_v2, %v12549_v58  ;;  %v6308_v4 = vrot.slane %v12680_v2, %v12552_v60 }
 0x837   :  { %8583 = vmatpush1.bf16.msra.mxu0 %v11589_v5  ;;  %8665 = vmatpush1.bf16.msra.mxu1 %v11592_v49  ;;  %v6316_v5 = vrot.slane %v12680_v2, %v12570_v32 }
 0x838   :  { %8584 = vmatprep.subr.bf16.mxu0 %v11597_v54  ;;  %8666 = vmatprep.subr.bf16.mxu1 %v11600_v7 }
 0x83b   :  { %8585 = vmatpush1.bf16.msra.mxu0 %v11595_v6  ;;  %8667 = vmatpush1.bf16.msra.mxu1 %v11598_v8 }
 0x83c   :  { %8586 = vmatprep.subr.bf16.mxu0 %v11603_v9  ;;  %8668 = vmatprep.subr.bf16.mxu1 %v11606_v10 }
 0x83f   :  { %8587 = vmatpush1.bf16.msra.mxu0 %v11601_v11  ;;  %8669 = vmatpush1.bf16.msra.mxu1 %v11604_v12 }
 0x840   :  { %8588 = vmatprep.subr.bf16.mxu0 %v11609_v13  ;;  %8670 = vmatprep.subr.bf16.mxu1 %v11612_v14 }
 0x843   :  { %8589 = vmatpush1.bf16.msra.mxu0 %v11607_v17  ;;  %8671 = vmatpush1.bf16.msra.mxu1 %v11610_v18 }
 0x844   :  { %8590 = vmatprep.subr.bf16.mxu0 %v11615_v19  ;;  %8672 = vmatprep.subr.bf16.mxu1 %v11618_v16 }
 0x847   :  { %8591 = vmatpush1.bf16.msra.mxu0 %v11613_v20  ;;  %8673 = vmatpush1.bf16.msra.mxu1 %v11616_v21  ;;  %v11673_v20 = vld [vmem:[#allocation16 + $0x380] ss:$28 sps:$4 sm:$0xff]   ;;  %v11676_v21 = vld [vmem:[#allocation16 + $0x388] ss:$28 sps:$4 sm:$0xff]  }
 0x848   :  { %8592 = vmatprep.subr.bf16.mxu0 %v11621_v22  ;;  %8674 = vmatprep.subr.bf16.mxu1 %v11624_v23  ;;  %v11681_v23 = vld [vmem:[#allocation16 + $0x3bc] ss:$28 sps:$4 sm:$0xff]  }
 0x84b   :  { %8593 = vmatpush1.bf16.msra.mxu0 %v11619_v24  ;;  %8675 = vmatpush1.bf16.msra.mxu1 %v11622_v26  ;;  %v11684_v24 = vld [vmem:[#allocation16 + $0x3c4] ss:$28 sps:$4 sm:$0xff]  }
 0x84c   :  { %8594 = vmatprep.subr.bf16.mxu0 %v11627_v57  ;;  %8676 = vmatprep.subr.bf16.mxu1 %v11630_v27  ;;  %v11679_v57 = vld [vmem:[#allocation16 + $0x3b8] ss:$28 sps:$4 sm:$0xff]   ;;  %v11682_v27 = vld [vmem:[#allocation16 + $0x3c0] ss:$28 sps:$4 sm:$0xff]  }
 0x84f   :  { %8595 = vmatpush1.bf16.msra.mxu0 %v11625_v28  ;;  %8677 = vmatpush1.bf16.msra.mxu1 %v11628_v30  ;;  %v11687_v28 = vld [vmem:[#allocation16 + $0x3f4] ss:$28 sps:$4 sm:$0xff]   ;;  %v11690_v30 = vld [vmem:[#allocation16 + $0x3fc] ss:$28 sps:$4 sm:$0xff]  }
 0x850   :  { %8596 = vmatprep.subr.bf16.mxu0 %v11633_v31  ;;  %8678 = vmatprep.subr.bf16.mxu1 %v11636_v55  ;;  %v11685_v31 = vld [vmem:[#allocation16 + $0x3f0] ss:$28 sps:$4 sm:$0xff]   ;;  %v11688_v55 = vld [vmem:[#allocation16 + $0x3f8] ss:$28 sps:$4 sm:$0xff]  }
 0x853   :  { %8597 = vmatpush1.bf16.msra.mxu0 %v11631_v33  ;;  %8679 = vmatpush1.bf16.msra.mxu1 %v11634_v34  ;;  %v11693_v33 = vld [vmem:[#allocation16 + $0x42c] ss:$28 sps:$4 sm:$0xff]   ;;  %v11696_v34 = vld [vmem:[#allocation16 + $0x434] ss:$28 sps:$4 sm:$0xff]  }
 0x854   :  { %8598 = vmatprep.subr.bf16.mxu0 %v11639_v35  ;;  %8680 = vmatprep.subr.bf16.mxu1 %v11642_v37  ;;  %v11691_v35 = vld [vmem:[#allocation16 + $0x428] ss:$28 sps:$4 sm:$0xff]   ;;  %v11694_v37 = vld [vmem:[#allocation16 + $0x430] ss:$28 sps:$4 sm:$0xff]  }
 0x857   :  { %8599 = vmatpush1.bf16.msra.mxu0 %v11637_v39  ;;  %8681 = vmatpush1.bf16.msra.mxu1 %v11640_v15  ;;  %v11699_v39 = vld [vmem:[#allocation16 + $0x464] ss:$28 sps:$4 sm:$0xff]   ;;  %v11702_v15 = vld [vmem:[#allocation16 + $0x46c] ss:$28 sps:$4 sm:$0xff]  }
 0x858   :  { %8600 = vmatprep.subr.bf16.mxu0 %v11645_v3  ;;  %8682 = vmatprep.subr.bf16.mxu1 %v11648_v40  ;;  %v11697_v3 = vld [vmem:[#allocation16 + $0x460] ss:$28 sps:$4 sm:$0xff]   ;;  %v11700_v40 = vld [vmem:[#allocation16 + $0x468] ss:$28 sps:$4 sm:$0xff]  }
 0x85b   :  { %8601 = vmatpush1.bf16.msra.mxu0 %v11643_v38  ;;  %8683 = vmatpush1.bf16.msra.mxu1 %v11646_v41  ;;  %v11705_v38 = vld [vmem:[#allocation16 + $0x49c] ss:$28 sps:$4 sm:$0xff]   ;;  %v11708_v41 = vld [vmem:[#allocation16 + $0x4a4] ss:$28 sps:$4 sm:$0xff]  }
 0x85c   :  { %8602 = vmatprep.subr.bf16.mxu0 %v11651_v42  ;;  %8684 = vmatprep.subr.bf16.mxu1 %v11654_v36  ;;  %v11703_v42 = vld [vmem:[#allocation16 + $0x498] ss:$28 sps:$4 sm:$0xff]   ;;  %v11706_v36 = vld [vmem:[#allocation16 + $0x4a0] ss:$28 sps:$4 sm:$0xff]  }
 0x85f   :  { %8603 = vmatpush1.bf16.msra.mxu0 %v11649_v43  ;;  %8685 = vmatpush1.bf16.msra.mxu1 %v11652_v50  ;;  %v11711_v43 = vld [vmem:[#allocation16 + $0x4d4] ss:$28 sps:$4 sm:$0xff]   ;;  %v11714_v50 = vld [vmem:[#allocation16 + $0x4dc] ss:$28 sps:$4 sm:$0xff]  }
 0x860   :  { %8604 = vmatprep.subr.bf16.mxu0 %v11657_v44  ;;  %8686 = vmatprep.subr.bf16.mxu1 %v11660_v45  ;;  %v11709_v44 = vld [vmem:[#allocation16 + $0x4d0] ss:$28 sps:$4 sm:$0xff]   ;;  %v11712_v45 = vld [vmem:[#allocation16 + $0x4d8] ss:$28 sps:$4 sm:$0xff]  }
 0x863   :  { %8605 = vmatpush1.bf16.msra.mxu0 %v11655_v46  ;;  %8687 = vmatpush1.bf16.msra.mxu1 %v11658_v47  ;;  %v11717_v46 = vld [vmem:[#allocation16 + $0x50c] ss:$28 sps:$4 sm:$0xff]   ;;  %v11720_v47 = vld [vmem:[#allocation16 + $0x514] ss:$28 sps:$4 sm:$0xff]  }
 0x864   :  { %8606 = vmatprep.subr.bf16.mxu0 %v11663_v48  ;;  %8688 = vmatprep.subr.bf16.mxu1 %v11666_v52  ;;  %v11715_v48 = vld [vmem:[#allocation16 + $0x508] ss:$28 sps:$4 sm:$0xff]   ;;  %v11718_v52 = vld [vmem:[#allocation16 + $0x510] ss:$28 sps:$4 sm:$0xff]  }
 0x867   :  { %8607 = vmatpush1.bf16.msra.mxu0 %v11661_v25  ;;  %8689 = vmatpush1.bf16.msra.mxu1 %v11664_v53  ;;  %v11723_v25 = vld [vmem:[#allocation16 + $0x544] ss:$28 sps:$4 sm:$0xff]   ;;  %v11726_v53 = vld [vmem:[#allocation16 + $0x54c] ss:$28 sps:$4 sm:$0xff]  }
 0x868   :  { %8608 = vmatprep.subr.bf16.mxu0 %v11669_v61  ;;  %8690 = vmatprep.subr.bf16.mxu1 %v11672_v62  ;;  %v11721_v61 = vld [vmem:[#allocation16 + $0x540] ss:$28 sps:$4 sm:$0xff]   ;;  %v11724_v62 = vld [vmem:[#allocation16 + $0x548] ss:$28 sps:$4 sm:$0xff]  }
 0x86b   :  { %8609 = vmatpush1.bf16.msra.mxu0 %v11667_v63  ;;  %8691 = vmatpush1.bf16.msra.mxu1 %v11670_v29  ;;  %v11729_v63 = vld [vmem:[#allocation16 + $0x57c] ss:$28 sps:$4 sm:$0xff]   ;;  %v11732_v29 = vld [vmem:[#allocation16 + $0x584] ss:$28 sps:$4 sm:$0xff]  }
 0x86c   :  { %8619 = vmatprep.subr.bf16.mxu0 %v11675_v1  ;;  %8701 = vmatprep.subr.bf16.mxu1 %v11678_v0  ;;  %v11727_v1 = vld [vmem:[#allocation16 + $0x578] ss:$28 sps:$4 sm:$0xff]   ;;  %v11730_v0 = vld [vmem:[#allocation16 + $0x580] ss:$28 sps:$4 sm:$0xff]  }
 0x901   :  { %v7036_v49 = vpop.f32.mrb[32].mxu0  ;;  %v12688_v54 = vpop.f32.mrb[52].mxu1 }
 0x902   :  { %v10151_v7 = vadd.f32 %v7036_v49, %v6304_v51  ;;  %v7038_v6 = vpop.f32.mrb[33].mxu0  ;;  %v7120_v8 = vpop.f32.mrb[53].mxu1  ;;  %v11735_v51 = vld [vmem:[#allocation16 + $0x5b4] ss:$28 sps:$4 sm:$0xff]  }
 0x903   :  { %v10152_v9 = vadd.f32 %v7038_v6, %v6308_v4  ;;  %v10154_v10 = vadd.f32 %v7120_v8, %v6316_v5  ;;  %v7040_v11 = vpop.f32.mrb[34].mxu0  ;;  %v7122_v12 = vpop.f32.mrb[54].mxu1  ;;  %v11738_v4 = vld [vmem:[#allocation16 + $0x5bc] ss:$28 sps:$4 sm:$0xff]   ;;  %v11733_v5 = vld [vmem:[#allocation16 + $0x5b0] ss:$28 sps:$4 sm:$0xff]  }
 0x904   :  { %v7125_v13 = vmax.f32 %v10151_v7, 0.0  ;;  %v7041_v14 = vpop.f32.mrb[35].mxu0  ;;  %v7123_v17 = vpop.f32.mrb[55].mxu1  ;;  %v11736_v49 = vld [vmem:[#allocation16 + $0x5b8] ss:$28 sps:$4 sm:$0xff]  }
 0x905   :  { %v7126_v18 = vmax.f32 %v10152_v9, 0.0  ;;  %v7128_v19 = vmax.f32 %v10154_v10, 0.0  ;;  %v11741_v7 = vld [vmem:[#allocation16 + $0x5ec] ss:$28 sps:$4 sm:$0xff]   ;;  %v11744_v6 = vld [vmem:[#allocation16 + $0x5f4] ss:$28 sps:$4 sm:$0xff]  }
 0x906   :  { %v12692_v22 = vpack.c.bf16 %v7125_v13, %v7125_v13  ;;  %v11739_v8 = vld [vmem:[#allocation16 + $0x5e8] ss:$28 sps:$4 sm:$0xff]   ;;  %v11742_v9 = vld [vmem:[#allocation16 + $0x5f0] ss:$28 sps:$4 sm:$0xff]   ;;  %v11745_v12 = vld [vmem:[#allocation16 + $0x620] ss:$28 sps:$4 sm:$0xff]  }
 0x907   :  { %v12690_v16 = vpack.c.bf16 %v7126_v18, %v7126_v18  ;;  %v12696_v26 = vpack.c.bf16 %v7128_v19, %v7128_v19  ;;  %v11747_v10 = vld [vmem:[#allocation16 + $0x624] ss:$28 sps:$4 sm:$0xff]   ;;  %v11750_v11 = vld [vmem:[#allocation16 + $0x62c] ss:$28 sps:$4 sm:$0xff]   ;;  %v11753_v14 = vld [vmem:[#allocation16 + $0x65c] ss:$28 sps:$4 sm:$0xff]  }
 0x908   :  { %v11748_v13 = vld [vmem:[#allocation16 + $0x628] ss:$28 sps:$4 sm:$0xff]   ;;  %v11751_v18 = vld [vmem:[#allocation16 + $0x658] ss:$28 sps:$4 sm:$0xff]   ;;  %v11754_v19 = vld [vmem:[#allocation16 + $0x660] ss:$28 sps:$4 sm:$0xff]  }
 0x909   :  { %8610 = vmatprep.mubr.bf16.mxu0 %v12690_v16  ;;  %8692 = vmatprep.mubr.bf16.mxu1 %v12690_v16  ;;  %v11756_v17 = vld [vmem:[#allocation16 + $0x664] ss:$28 sps:$4 sm:$0xff]  }
 0x90a   :  { %8611 = vmatmul.mubr.bf16.vlgmr.msra.gmra.mrb[36].mxu0 %v12692_v22  ;;  %8693 = vmatmul.mubr.bf16.vlgmr.msra.gmra.mrb[56].mxu1 %v12692_v22 }
 0x90b   :  { %8620 = vmatpush1.bf16.msra.mxu0 %v11673_v20  ;;  %8702 = vmatpush1.bf16.msra.mxu1 %v11676_v21  ;;  %v6312_v20 = vrot.slane %v12680_v2, %v12567_v59  ;;  %v11759_v21 = vld [vmem:[#allocation16 + $0x694] ss:$28 sps:$4 sm:$0xff]  }
 0x90c   :  { %8651 = vmatprep.mubr.bf16.mxu0 %v12696_v26  ;;  %8733 = vmatprep.mubr.bf16.mxu1 %v12696_v26  ;;  %v11771_v2 = vld [vmem:[#allocation16 + $0x14] ss:$28 sps:$4 sm:$0xff]  }
 0x90d   :  { %8621 = vmatprep.subr.bf16.mxu0 %v11681_v23  ;;  %8703 = vmatprep.subr.bf16.mxu1 %v11684_v24  ;;  %v11762_v23 = vld [vmem:[#allocation16 + $0x69c] ss:$28 sps:$4 sm:$0xff]   ;;  %v11757_v24 = vld [vmem:[#allocation16 + $0x690] ss:$28 sps:$4 sm:$0xff]  }
 0x90f   :  { %8622 = vmatpush1.bf16.msra.mxu0 %v11679_v57  ;;  %8704 = vmatpush1.bf16.msra.mxu1 %v11682_v27  ;;  %v11760_v57 = vld [vmem:[#allocation16 + $0x698] ss:$28 sps:$4 sm:$0xff]   ;;  %v10153_v27 = vadd.f32 %v12688_v54, %v6312_v20  ;;  %v11827_v20 = vld [vmem:[#allocation16 + $0x600] ss:$28 sps:$4 sm:$0xff]  }
 0x910   :  { %8623 = vmatprep.subr.bf16.mxu0 %v11687_v28  ;;  %8705 = vmatprep.subr.bf16.mxu1 %v11690_v30  ;;  %v11765_v28 = vld [vmem:[#allocation16 + $0x6cc] ss:$28 sps:$4 sm:$0xff]   ;;  %v11768_v30 = vld [vmem:[#allocation16 + $0x6d4] ss:$28 sps:$4 sm:$0xff]  }
 0x911   :  { %v11773_v54 = vld [vmem:[#allocation16 + $0x18] ss:$28 sps:$4 sm:$0xff]  }
 0x913   :  { %8624 = vmatpush1.bf16.msra.mxu0 %v11685_v31  ;;  %8706 = vmatpush1.bf16.msra.mxu1 %v11688_v55  ;;  %v11763_v31 = vld [vmem:[#allocation16 + $0x6c8] ss:$28 sps:$4 sm:$0xff]   ;;  %v11766_v55 = vld [vmem:[#allocation16 + $0x6d0] ss:$28 sps:$4 sm:$0xff]  }
 0x914   :  { %8625 = vmatprep.subr.bf16.mxu0 %v11693_v33  ;;  %8707 = vmatprep.subr.bf16.mxu1 %v11696_v34  ;;  %v7127_v33 = vmax.f32 %v10153_v27, 0.0  ;;  %v11772_v34 = vld [vmem:[#allocation16 + $0x1d8] ss:$28 sps:$4 sm:$0xff]   ;;  %v11829_v27 = vld [vmem:[#allocation16 + $0x2b0] ss:$28 sps:$4 sm:$0xff]  }
 0x917   :  { %8626 = vmatpush1.bf16.msra.mxu0 %v11691_v35  ;;  %8708 = vmatpush1.bf16.msra.mxu1 %v11694_v37  ;;  %v11769_v35 = vld [vmem:[#allocation16 + $0x10] ss:$28 sps:$4 sm:$0xff]   ;;  %v12705_v37 = vpack.c.bf16 %v7127_v33, %v7127_v33 }
 0x918   :  { %8627 = vmatprep.subr.bf16.mxu0 %v11699_v39  ;;  %8709 = vmatprep.subr.bf16.mxu1 %v11702_v15  ;;  %v11776_v39 = vld [vmem:[#allocation16 + $0x4c] ss:$28 sps:$4 sm:$0xff]  }
 0x919   :  { %v11777_v15 = vld [vmem:[#allocation16 + $0x210] ss:$28 sps:$4 sm:$0xff]  }
 0x91a   :  { %v11838_v33 = vld [vmem:[#allocation16 + $0x4b0] ss:$28 sps:$4 sm:$0xff]  }
 0x91b   :  { %8628 = vmatpush1.bf16.msra.mxu0 %v11697_v3  ;;  %8710 = vmatpush1.bf16.msra.mxu1 %v11700_v40  ;;  %v11774_v3 = vld [vmem:[#allocation16 + $0x48] ss:$28 sps:$4 sm:$0xff]   ;;  %v11778_v40 = vld [vmem:[#allocation16 + $0x50] ss:$28 sps:$4 sm:$0xff]  }
 0x91c   :  { %8629 = vmatprep.subr.bf16.mxu0 %v11705_v38  ;;  %8711 = vmatprep.subr.bf16.mxu1 %v11708_v41  ;;  %v11781_v38 = vld [vmem:[#allocation16 + $0x84] ss:$28 sps:$4 sm:$0xff]  }
 0x91d   :  { %v11782_v41 = vld [vmem:[#allocation16 + $0x248] ss:$28 sps:$4 sm:$0xff]  }
 0x91f   :  { %8630 = vmatpush1.bf16.msra.mxu0 %v11703_v42  ;;  %8712 = vmatpush1.bf16.msra.mxu1 %v11706_v36  ;;  %v11779_v42 = vld [vmem:[#allocation16 + $0x80] ss:$28 sps:$4 sm:$0xff]   ;;  %v11783_v36 = vld [vmem:[#allocation16 + $0x88] ss:$28 sps:$4 sm:$0xff]  }
 0x920   :  { %8631 = vmatprep.subr.bf16.mxu0 %v11711_v43  ;;  %8713 = vmatprep.subr.bf16.mxu1 %v11714_v50  ;;  %v11786_v43 = vld [vmem:[#allocation16 + $0xbc] ss:$28 sps:$4 sm:$0xff]  }
 0x921   :  { %v11787_v50 = vld [vmem:[#allocation16 + $0x280] ss:$28 sps:$4 sm:$0xff]  }
 0x923   :  { %8632 = vmatpush1.bf16.msra.mxu0 %v11709_v44  ;;  %8714 = vmatpush1.bf16.msra.mxu1 %v11712_v45  ;;  %v11784_v44 = vld [vmem:[#allocation16 + $0xb8] ss:$28 sps:$4 sm:$0xff]   ;;  %v11788_v45 = vld [vmem:[#allocation16 + $0xc0] ss:$28 sps:$4 sm:$0xff]  }
 0x924   :  { %8633 = vmatprep.subr.bf16.mxu0 %v11717_v46  ;;  %8715 = vmatprep.subr.bf16.mxu1 %v11720_v47  ;;  %v11791_v46 = vld [vmem:[#allocation16 + $0xf4] ss:$28 sps:$4 sm:$0xff]  }
 0x925   :  { %v11789_v47 = vld [vmem:[#allocation16 + $0xf0] ss:$28 sps:$4 sm:$0xff]  }
 0x927   :  { %8634 = vmatpush1.bf16.msra.mxu0 %v11715_v48  ;;  %8716 = vmatpush1.bf16.msra.mxu1 %v11718_v52  ;;  %v11793_v48 = vld [vmem:[#allocation16 + $0xf8] ss:$28 sps:$4 sm:$0xff]   ;;  %v11796_v52 = vld [vmem:[#allocation16 + $0x12c] ss:$28 sps:$4 sm:$0xff]  }
 0x928   :  { %8635 = vmatprep.subr.bf16.mxu0 %v11723_v25  ;;  %8717 = vmatprep.subr.bf16.mxu1 %v11726_v53  ;;  %v11797_v25 = vld [vmem:[#allocation16 + $0x2f0] ss:$28 sps:$4 sm:$0xff]   ;;  %v11794_v53 = vld [vmem:[#allocation16 + $0x128] ss:$28 sps:$4 sm:$0xff]  }
 0x92b   :  { %8636 = vmatpush1.bf16.msra.mxu0 %v11721_v61  ;;  %8718 = vmatpush1.bf16.msra.mxu1 %v11724_v62  ;;  %v11798_v61 = vld [vmem:[#allocation16 + $0x130] ss:$28 sps:$4 sm:$0xff]   ;;  %v11801_v62 = vld [vmem:[#allocation16 + $0x164] ss:$28 sps:$4 sm:$0xff]  }
 0x92c   :  { %8637 = vmatprep.subr.bf16.mxu0 %v11729_v63  ;;  %8719 = vmatprep.subr.bf16.mxu1 %v11732_v29  ;;  %v11802_v63 = vld [vmem:[#allocation16 + $0x328] ss:$28 sps:$4 sm:$0xff]   ;;  %v11799_v29 = vld [vmem:[#allocation16 + $0x160] ss:$28 sps:$4 sm:$0xff]  }
 0x92f   :  { %8638 = vmatpush1.bf16.msra.mxu0 %v11727_v1  ;;  %8720 = vmatpush1.bf16.msra.mxu1 %v11730_v0  ;;  %v11803_v1 = vld [vmem:[#allocation16 + $0x168] ss:$28 sps:$4 sm:$0xff]   ;;  %v11806_v0 = vld [vmem:[#allocation16 + $0x19c] ss:$28 sps:$4 sm:$0xff]  }
 0x930   :  { %8639 = vmatprep.subr.bf16.mxu0 %v11735_v51  ;;  %8721 = vmatprep.subr.bf16.mxu1 %v11738_v4  ;;  %v11807_v51 = vld [vmem:[#allocation16 + $0x360] ss:$28 sps:$4 sm:$0xff]   ;;  %v11804_v4 = vld [vmem:[#allocation16 + $0x198] ss:$28 sps:$4 sm:$0xff]  }
 0x933   :  { %8640 = vmatpush1.bf16.msra.mxu0 %v11733_v5  ;;  %8722 = vmatpush1.bf16.msra.mxu1 %v11736_v49  ;;  %v11808_v5 = vld [vmem:[#allocation16 + $0x1a0] ss:$28 sps:$4 sm:$0xff]   ;;  %v11811_v49 = vld [vmem:[#allocation16 + $0x1d4] ss:$28 sps:$4 sm:$0xff]  }
 0x934   :  { %8641 = vmatprep.subr.bf16.mxu0 %v11741_v7  ;;  %8723 = vmatprep.subr.bf16.mxu1 %v11744_v6  ;;  %v11812_v7 = vld [vmem:[#allocation16 + $0x558] ss:$28 sps:$4 sm:$0xff]   ;;  %v11809_v6 = vld [vmem:[#allocation16 + $0x1d0] ss:$28 sps:$4 sm:$0xff]  }
 0x937   :  { %8642 = vmatpush1.bf16.msra.mxu0 %v11739_v8  ;;  %8724 = vmatpush1.bf16.msra.mxu1 %v11742_v9  ;;  %v11813_v8 = vld [vmem:[#allocation16 + $0x398] ss:$28 sps:$4 sm:$0xff]   ;;  %v11816_v9 = vld [vmem:[#allocation16 + $0x20c] ss:$28 sps:$4 sm:$0xff]  }
 0x938   :  { %8643 = vmatprep.subr.bf16.mxu0 %v11747_v10  ;;  %8725 = vmatprep.subr.bf16.mxu1 %v11750_v11  ;;  %v11817_v10 = vld [vmem:[#allocation16 + $0x590] ss:$28 sps:$4 sm:$0xff]   ;;  %v11814_v11 = vld [vmem:[#allocation16 + $0x208] ss:$28 sps:$4 sm:$0xff]  }
 0x93b   :  { %8644 = vmatpush1.bf16.msra.mxu0 %v11745_v12  ;;  %8726 = vmatpush1.bf16.msra.mxu1 %v11748_v13  ;;  %v11818_v12 = vld [vmem:[#allocation16 + $0x3d0] ss:$28 sps:$4 sm:$0xff]   ;;  %v11821_v13 = vld [vmem:[#allocation16 + $0x244] ss:$28 sps:$4 sm:$0xff]  }
 0x93c   :  { %8645 = vmatprep.subr.bf16.mxu0 %v11753_v14  ;;  %8727 = vmatprep.subr.bf16.mxu1 %v11756_v17  ;;  %v11822_v14 = vld [vmem:[#allocation16 + $0x5c8] ss:$28 sps:$4 sm:$0xff]   ;;  %v11819_v17 = vld [vmem:[#allocation16 + $0x240] ss:$28 sps:$4 sm:$0xff]  }
 0x93f   :  { %8646 = vmatpush1.bf16.msra.mxu0 %v11751_v18  ;;  %8728 = vmatpush1.bf16.msra.mxu1 %v11754_v19  ;;  %v11823_v18 = vld [vmem:[#allocation16 + $0x408] ss:$28 sps:$4 sm:$0xff]   ;;  %v11826_v19 = vld [vmem:[#allocation16 + $0x27c] ss:$28 sps:$4 sm:$0xff]  }
 0x940   :  { %8647 = vmatprep.subr.bf16.mxu0 %v11759_v21  ;;  %8729 = vmatprep.subr.bf16.mxu1 %v11762_v23  ;;  %v11824_v21 = vld [vmem:[#allocation16 + $0x278] ss:$28 sps:$4 sm:$0xff]   ;;  %v11828_v23 = vld [vmem:[#allocation16 + $0x440] ss:$28 sps:$4 sm:$0xff]  }
 0x943   :  { %8648 = vmatpush1.bf16.msra.mxu0 %v11757_v24  ;;  %8730 = vmatpush1.bf16.msra.mxu1 %v11760_v57  ;;  %v11831_v24 = vld [vmem:[#allocation16 + $0x2b4] ss:$28 sps:$4 sm:$0xff]  }
 0x944   :  { %8649 = vmatprep.subr.bf16.mxu0 %v11765_v28  ;;  %8731 = vmatprep.subr.bf16.mxu1 %v11768_v30  ;;  %v11832_v57 = vld [vmem:[#allocation16 + $0x638] ss:$28 sps:$4 sm:$0xff]   ;;  %v11836_v30 = vld [vmem:[#allocation16 + $0x2ec] ss:$28 sps:$4 sm:$0xff]  }
 0x945   :  { %v11833_v28 = vld [vmem:[#allocation16 + $0x478] ss:$28 sps:$4 sm:$0xff]  }
 0x947   :  { %8650 = vmatpush1.bf16.msra.mxu0 %v11763_v31  ;;  %8732 = vmatpush1.bf16.msra.mxu1 %v11766_v55  ;;  %v11837_v31 = vld [vmem:[#allocation16 + $0x670] ss:$28 sps:$4 sm:$0xff]   ;;  %v11834_v55 = vld [vmem:[#allocation16 + $0x2e8] ss:$28 sps:$4 sm:$0xff]  }
 0x948   :  { %8742 = vmatprep.subr.bf16.mxu0 %v11771_v2  ;;  %10093 = vmatprep.subr.bf16.mxu1 %v11772_v34  ;;  %v11841_v2 = vld [vmem:[#allocation16 + $0x324] ss:$28 sps:$4 sm:$0xff]  }
 0x949   :  { %v11842_v34 = vld [vmem:[#allocation16 + $0x6a8] ss:$28 sps:$4 sm:$0xff]  }
 0x94a   :  { %8652 = vmatmul.mubr.bf16.vlgmr.msra.gmra.mrb[36].mxu0 %v12705_v37  ;;  %8734 = vmatmul.mubr.bf16.vlgmr.msra.gmra.mrb[56].mxu1 %v12705_v37 }
 0x94b   :  { %8743 = vmatpush1.bf16.msra.mxu0 %v11769_v35  ;;  %8774 = vmatprep.mubr.bf16.mxu0 %v12690_v16  ;;  %v11839_v35 = vld [vmem:[#allocation16 + $0x320] ss:$28 sps:$4 sm:$0xff]  }
 0x94c   :  { %10094 = vmatpush3.bf16.msra.mxu1 %v11773_v54  ;;  %8856 = vmatprep.mubr.bf16.mxu1 %v12690_v16  ;;  %v11792_v16 = vld [vmem:[#allocation16 + $0x2b8] ss:$28 sps:$4 sm:$0xff]   ;;  %v11843_v54 = vld [vmem:[#allocation16 + $0x4e8] ss:$28 sps:$4 sm:$0xff]  }
 0x94d   :  { %8744 = vmatprep.subr.bf16.mxu0 %v11776_v39  ;;  %10095 = vmatprep.subr.bf16.mxu1 %v11777_v15  ;;  %v11846_v39 = vld [vmem:[#allocation16 + $0x35c] ss:$28 sps:$4 sm:$0xff]  }
 0x94e   :  { %v11847_v15 = vld [vmem:[#allocation16 + $0x6e0] ss:$28 sps:$4 sm:$0xff]  }
 0x94f   :  { %8745 = vmatpush1.bf16.msra.mxu0 %v11774_v3  ;;  %v11844_v3 = vld [vmem:[#allocation16 + $0x358] ss:$28 sps:$4 sm:$0xff]  }
 0x950   :  { %10096 = vmatpush3.bf16.msra.mxu1 %v11778_v40  ;;  %8746 = vmatprep.subr.bf16.mxu0 %v11781_v38  ;;  %v11848_v40 = vld [vmem:[#allocation16 + $0x520] ss:$28 sps:$4 sm:$0xff]   ;;  %v11851_v38 = vld [vmem:[#allocation16 + $0x394] ss:$28 sps:$4 sm:$0xff]  }
 0x951   :  { %10097 = vmatprep.subr.bf16.mxu1 %v11782_v41  ;;  %v11849_v41 = vld [vmem:[#allocation16 + $0x390] ss:$28 sps:$4 sm:$0xff]  }
 0x953   :  { %8747 = vmatpush1.bf16.msra.mxu0 %v11779_v42  ;;  %v11854_v42 = vld [vmem:[#allocation16 + $0x3cc] ss:$28 sps:$4 sm:$0xff]  }
 0x954   :  { %10098 = vmatpush3.bf16.msra.mxu1 %v11783_v36  ;;  %8748 = vmatprep.subr.bf16.mxu0 %v11786_v43  ;;  %v11852_v36 = vld [vmem:[#allocation16 + $0x3c8] ss:$28 sps:$4 sm:$0xff]  }
 0x955   :  { %10099 = vmatprep.subr.bf16.mxu1 %v11787_v50  ;;  %v11857_v43 = vld [vmem:[#allocation16 + $0x404] ss:$28 sps:$4 sm:$0xff]  }
 0x956   :  { %v11855_v50 = vld [vmem:[#allocation16 + $0x400] ss:$28 sps:$4 sm:$0xff]  }
 0x957   :  { %8749 = vmatpush1.bf16.msra.mxu0 %v11784_v44  ;;  %v11860_v44 = vld [vmem:[#allocation16 + $0x43c] ss:$28 sps:$4 sm:$0xff]  }
 0x958   :  { %10100 = vmatpush3.bf16.msra.mxu1 %v11788_v45  ;;  %8750 = vmatprep.subr.bf16.mxu0 %v11791_v46  ;;  %v11858_v45 = vld [vmem:[#allocation16 + $0x438] ss:$28 sps:$4 sm:$0xff]  }
 0x959   :  { %10101 = vmatprep.subr.bf16.mxu1 %v11792_v16  ;;  %v11863_v46 = vld [vmem:[#allocation16 + $0x474] ss:$28 sps:$4 sm:$0xff]  }
 0x95a   :  { %v11861_v16 = vld [vmem:[#allocation16 + $0x470] ss:$28 sps:$4 sm:$0xff]  }
 0x95b   :  { %8751 = vmatpush1.bf16.msra.mxu0 %v11789_v47  ;;  %v11864_v47 = vld [vmem:[#allocation16 + $0x4a8] ss:$28 sps:$4 sm:$0xff]  }
 0x95c   :  { %10102 = vmatpush3.bf16.msra.mxu1 %v11793_v48  ;;  %8752 = vmatprep.subr.bf16.mxu0 %v11796_v52  ;;  %v11869_v48 = vld [vmem:[#allocation16 + $0x4e4] ss:$28 sps:$4 sm:$0xff]   ;;  %v11872_v52 = vld [vmem:[#allocation16 + $0x51c] ss:$28 sps:$4 sm:$0xff]  }
 0x95d   :  { %10103 = vmatprep.subr.bf16.mxu1 %v11797_v25  ;;  %v11870_v25 = vld [vmem:[#allocation16 + $0x518] ss:$28 sps:$4 sm:$0xff]  }
 0x95f   :  { %8753 = vmatpush1.bf16.msra.mxu0 %v11794_v53  ;;  %v11875_v53 = vld [vmem:[#allocation16 + $0x554] ss:$28 sps:$4 sm:$0xff]  }
 0x960   :  { %10104 = vmatpush3.bf16.msra.mxu1 %v11798_v61  ;;  %8754 = vmatprep.subr.bf16.mxu0 %v11801_v62  ;;  %v11873_v61 = vld [vmem:[#allocation16 + $0x550] ss:$28 sps:$4 sm:$0xff]  }
 0x961   :  { %10105 = vmatprep.subr.bf16.mxu1 %v11802_v63  ;;  %v11878_v62 = vld [vmem:[#allocation16 + $0x58c] ss:$28 sps:$4 sm:$0xff]  }
 0x962   :  { %v11876_v63 = vld [vmem:[#allocation16 + $0x588] ss:$28 sps:$4 sm:$0xff]  }
 0x963   :  { %8755 = vmatpush1.bf16.msra.mxu0 %v11799_v29  ;;  %v11881_v29 = vld [vmem:[#allocation16 + $0x5c4] ss:$28 sps:$4 sm:$0xff]  }
 0x964   :  { %10106 = vmatpush3.bf16.msra.mxu1 %v11803_v1  ;;  %8756 = vmatprep.subr.bf16.mxu0 %v11806_v0  ;;  %v11879_v1 = vld [vmem:[#allocation16 + $0x5c0] ss:$28 sps:$4 sm:$0xff]  }
 0x965   :  { %10107 = vmatprep.subr.bf16.mxu1 %v11807_v51  ;;  %v11884_v0 = vld [vmem:[#allocation16 + $0x5fc] ss:$28 sps:$4 sm:$0xff]  }
 0x966   :  { %v11882_v51 = vld [vmem:[#allocation16 + $0x5f8] ss:$28 sps:$4 sm:$0xff]  }
 0x967   :  { %8757 = vmatpush1.bf16.msra.mxu0 %v11804_v4  ;;  %v11887_v4 = vld [vmem:[#allocation16 + $0x634] ss:$28 sps:$4 sm:$0xff]  }
 0x968   :  { %10108 = vmatpush3.bf16.msra.mxu1 %v11808_v5  ;;  %8758 = vmatprep.subr.bf16.mxu0 %v11811_v49  ;;  %v11885_v5 = vld [vmem:[#allocation16 + $0x630] ss:$28 sps:$4 sm:$0xff]  }
 0x969   :  { %10115 = vmatprep.subr.bf16.mxu1 %v11812_v7  ;;  %v11890_v49 = vld [vmem:[#allocation16 + $0x66c] ss:$28 sps:$4 sm:$0xff]  }
 0x96a   :  { %v11888_v7 = vld [vmem:[#allocation16 + $0x668] ss:$28 sps:$4 sm:$0xff]  }
 0x96b   :  { %8857 = vmatmul.mubr.bf16.vlgmr.msra.gmra.mrb[60].mxu1 %v12692_v22  ;;  %8759 = vmatpush1.bf16.msra.mxu0 %v11809_v6  ;;  %v11893_v6 = vld [vmem:[#allocation16 + $0x6a4] ss:$28 sps:$4 sm:$0xff]  }
 0x96c   :  { %10116 = vmatpush3.bf16.msra.mxu1 %v11813_v8  ;;  %8896 = vmatprep.mubr.bf16.mxu1 %v12696_v26  ;;  %v11891_v8 = vld [vmem:[#allocation16 + $0x6a0] ss:$28 sps:$4 sm:$0xff]  }
 0x96d   :  { %8760 = vmatprep.subr.bf16.mxu0 %v11816_v9  ;;  %10117 = vmatprep.subr.bf16.mxu1 %v11817_v10  ;;  %v11896_v9 = vld [vmem:[#allocation16 + $0x6dc] ss:$28 sps:$4 sm:$0xff]  }
 0x96e   :  { %v11894_v10 = vld [vmem:[#allocation16 + $0x6d8] ss:$28 sps:$4 sm:$0xff]  }
 0x96f   :  { %8761 = vmatpush1.bf16.msra.mxu0 %v11814_v11  ;;  %v12720_v11 = vld [vmem:[%s12777_s20] sm:$0xff] }
 0x970   :  { %10118 = vmatpush3.bf16.msra.mxu1 %v11818_v12  ;;  %8762 = vmatprep.subr.bf16.mxu0 %v11821_v13  ;;  %v7394_v12 = vrot.slane %v12720_v11, %v12549_v58  ;;  %v7402_v13 = vrot.slane %v12720_v11, %v12567_v59 }
 0x971   :  { %10119 = vmatprep.subr.bf16.mxu1 %v11822_v14  ;;  %v7398_v14 = vrot.slane %v12720_v11, %v12552_v60 }
 0x973   :  { %8763 = vmatpush1.bf16.msra.mxu0 %v11819_v17  ;;  %v7406_v17 = vrot.slane %v12720_v11, %v12570_v32 }
 0x974   :  { %10120 = vmatpush3.bf16.msra.mxu1 %v11823_v18  ;;  %8764 = vmatprep.subr.bf16.mxu0 %v11826_v19 }
 0x975   :  { %10121 = vmatprep.subr.bf16.mxu1 %v11827_v20 }
 0x977   :  { %8765 = vmatpush1.bf16.msra.mxu0 %v11824_v21 }
 0x978   :  { %10122 = vmatpush3.bf16.msra.mxu1 %v11828_v23  ;;  %8766 = vmatprep.subr.bf16.mxu0 %v11831_v24 }
 0x979   :  { %10123 = vmatprep.subr.bf16.mxu1 %v11832_v57 }
 0x97b   :  { %8767 = vmatpush1.bf16.msra.mxu0 %v11829_v27 }
 0x97c   :  { %10124 = vmatpush3.bf16.msra.mxu1 %v11833_v28  ;;  %8768 = vmatprep.subr.bf16.mxu0 %v11836_v30 }
 0x97d   :  { %10125 = vmatprep.subr.bf16.mxu1 %v11837_v31 }
 0x97f   :  { %8769 = vmatpush1.bf16.msra.mxu0 %v11834_v55 }
 0x980   :  { %10126 = vmatpush3.bf16.msra.mxu1 %v11838_v33  ;;  %8770 = vmatprep.subr.bf16.mxu0 %v11841_v2 }
 0x981   :  { %10127 = vmatprep.subr.bf16.mxu1 %v11842_v34 }
 0x983   :  { %8771 = vmatpush1.bf16.msra.mxu0 %v11839_v35 }
 0x984   :  { %10128 = vmatpush3.bf16.msra.mxu1 %v11843_v54  ;;  %8772 = vmatprep.subr.bf16.mxu0 %v11846_v39 }
 0x985   :  { %10129 = vmatprep.subr.bf16.mxu1 %v11847_v15 }
 0x987   :  { %8773 = vmatpush1.bf16.msra.mxu0 %v11844_v3 }
 0x988   :  { %10130 = vmatpush3.bf16.msra.mxu1 %v11848_v40  ;;  %8783 = vmatprep.subr.bf16.mxu0 %v11851_v38 }
 0x98a   :  { %8775 = vmatmul.mubr.bf16.vlgmr.msra.gmra.mrb[40].mxu0 %v12692_v22  ;;  %v11866_v22 = vld [vmem:[#allocation16 + $0x4ac] ss:$28 sps:$4 sm:$0xff]  }
 0x98b   :  { %8897 = vmatmul.mubr.bf16.vlgmr.msra.gmra.mrb[64].mxu1 %v12705_v37  ;;  %8784 = vmatpush1.bf16.msra.mxu0 %v11849_v41 }
 0x98c   :  { %8815 = vmatprep.mubr.bf16.mxu0 %v12696_v26  ;;  %8785 = vmatprep.subr.bf16.mxu0 %v11854_v42  ;;  %v11867_v26 = vld [vmem:[#allocation16 + $0x4e0] ss:$28 sps:$4 sm:$0xff]  }
 0x98f   :  { %8786 = vmatpush1.bf16.msra.mxu0 %v11852_v36 }
 0x990   :  { %8787 = vmatprep.subr.bf16.mxu0 %v11857_v43 }
 0x993   :  { %8788 = vmatpush1.bf16.msra.mxu0 %v11855_v50 }
 0x994   :  { %8789 = vmatprep.subr.bf16.mxu0 %v11860_v44 }
 0x997   :  { %8790 = vmatpush1.bf16.msra.mxu0 %v11858_v45 }
 0x998   :  { %8791 = vmatprep.subr.bf16.mxu0 %v11863_v46 }
 0x99b   :  { %8792 = vmatpush1.bf16.msra.mxu0 %v11861_v16 }
 0x99c   :  { %8793 = vmatprep.subr.bf16.mxu0 %v11866_v22 }
 0x99f   :  { %8794 = vmatpush1.bf16.msra.mxu0 %v11864_v47  ;;  %v7417_v47 = vsub.s32 6, %v12541_v56 }
 0x9a0   :  { %8795 = vmatprep.subr.bf16.mxu0 %v11869_v48 }
 0x9a1   :  { %v7418_v48 = vrot.slane %v12720_v11, %v7417_v47 }
 0x9a3   :  { %8796 = vmatpush1.bf16.msra.mxu0 %v11867_v26 }
 0x9a4   :  { %8797 = vmatprep.subr.bf16.mxu0 %v11872_v52 }
 0x9a7   :  { %8798 = vmatpush1.bf16.msra.mxu0 %v11870_v25 }
 0x9a8   :  { %8799 = vmatprep.subr.bf16.mxu0 %v11875_v53 }
 0x9ab   :  { %8800 = vmatpush1.bf16.msra.mxu0 %v11873_v61 }
 0x9ac   :  { %8801 = vmatprep.subr.bf16.mxu0 %v11878_v62 }
 0x9af   :  { %8802 = vmatpush1.bf16.msra.mxu0 %v11876_v63 }
 0x9b0   :  { %8803 = vmatprep.subr.bf16.mxu0 %v11881_v29 }
 0x9b3   :  { %8804 = vmatpush1.bf16.msra.mxu0 %v11879_v1 }
 0x9b4   :  { %8805 = vmatprep.subr.bf16.mxu0 %v11884_v0 }
 0x9b7   :  { %8806 = vmatpush1.bf16.msra.mxu0 %v11882_v51 }
 0x9b8   :  { %8807 = vmatprep.subr.bf16.mxu0 %v11887_v4 }
 0x9bb   :  { %8808 = vmatpush1.bf16.msra.mxu0 %v11885_v5  ;;  %v7409_v5 = vsub.s32 4, %v12541_v56 }
 0x9bc   :  { %8809 = vmatprep.subr.bf16.mxu0 %v11890_v49  ;;  %v7413_v49 = vsub.s32 5, %v12541_v56 }
 0x9bf   :  { %8810 = vmatpush1.bf16.msra.mxu0 %v11888_v7  ;;  %v7410_v7 = vrot.slane %v12720_v11, %v7409_v5 }
 0x9c0   :  { %8811 = vmatprep.subr.bf16.mxu0 %v11893_v6  ;;  %v7414_v6 = vrot.slane %v12720_v11, %v7413_v49 }
 0x9c3   :  { %8812 = vmatpush1.bf16.msra.mxu0 %v11891_v8 }
 0x9c4   :  { %8813 = vmatprep.subr.bf16.mxu0 %v11896_v9 }
 0x9c7   :  { %8814 = vmatpush1.bf16.msra.mxu0 %v11894_v10 }
 0x9ca   :  { %8816 = vmatmul.mubr.bf16.vlgmr.msra.gmra.mrb[40].mxu0 %v12705_v37 }
 0xa1d   :  { %v8653_v18 = vpop.f32.mrb[36].mxu0  ;;  %v8735_v19 = vpop.f32.mrb[56].mxu1 }
 0xa1e   :  { %v10155_v37 = vadd.f32 %v8653_v18, %v7394_v12  ;;  %v10157_v20 = vadd.f32 %v8735_v19, %v7402_v13  ;;  %v8655_v21 = vpop.f32.mrb[37].mxu0  ;;  %v8737_v23 = vpop.f32.mrb[57].mxu1 }
 0xa1f   :  { %v10156_v24 = vadd.f32 %v8655_v21, %v7398_v14  ;;  %v10158_v57 = vadd.f32 %v8737_v23, %v7406_v17  ;;  %v8657_v27 = vpop.f32.mrb[38].mxu0  ;;  %v8739_v28 = vpop.f32.mrb[58].mxu1 }
 0xa20   :  { %v8904_v58 = vsub.f32 0.0, %v10155_v37  ;;  %v8906_v30 = vsub.f32 0.0, %v10157_v20  ;;  %v8658_v31 = vpop.f32.mrb[39].mxu0  ;;  %v8740_v59 = vpop.f32.mrb[59].mxu1 }
 0xa21   :  { %v8905_v55 = vsub.f32 0.0, %v10156_v24  ;;  %v8907_v33 = vsub.f32 0.0, %v10158_v57 }
 0xa22   :  { %v8911_v60 = vmul.f32 1.442695, %v8904_v58  ;;  %v8915_v2 = vmul.f32 1.442695, %v8906_v30 }
 0xa23   :  { %v8913_v34 = vmul.f32 1.442695, %v8905_v55  ;;  %v8917_v32 = vmul.f32 1.442695, %v8907_v33 }
 0xa24   :  { %11899 = vpow2.f32 %v8911_v60 }
 0xa25   :  { %11901 = vpow2.f32 %v8915_v2 }
 0xa26   :  { %11903 = vpow2.f32 %v8913_v34 }
 0xa27   :  { %11905 = vpow2.f32 %v8917_v32 }
 0xa2e   :  { %v11900_v35 = vpop.eup %11899 }
 0xa2f   :  { %v11902_v54 = vpop.eup %11901  ;;  %v8925_v39 = vadd.f32 1.0, %v11900_v35 }
 0xa30   :  { %v11904_v15 = vpop.eup %11903  ;;  %v8927_v3 = vadd.f32 1.0, %v11902_v54 }
 0xa31   :  { %v11906_v40 = vpop.eup %11905  ;;  %11907 = vrcp.f32 %v8925_v39  ;;  %v8926_v38 = vadd.f32 1.0, %v11904_v15 }
 0xa32   :  { %11909 = vrcp.f32 %v8927_v3  ;;  %v8928_v41 = vadd.f32 1.0, %v11906_v40 }
 0xa33   :  { %11911 = vrcp.f32 %v8926_v38 }
 0xa34   :  { %11913 = vrcp.f32 %v8928_v41 }
 0xa3b   :  { %v11908_v42 = vpop.eup %11907 }
 0xa3c   :  { %v11910_v36 = vpop.eup %11909  ;;  %8939 = vst [vmem:[%s12804_s12] sm:$0xff] %v11908_v42 }
 0xa3d   :  { %v11912_v43 = vpop.eup %11911  ;;  %8941 = vst [vmem:[%s12804_s12 + $0x10] sm:$0xff] %v11910_v36 }
 0xa3e   :  { %v11914_v50 = vpop.eup %11913  ;;  %8940 = vst [vmem:[%s12804_s12 + $0x8] sm:$0xff] %v11912_v43  ;;  %v10109_v44 = vpop.f32.mrb[60].mxu1 }
 0xa3f   :  { %8942 = vst [vmem:[%s12804_s12 + $0x18] sm:$0xff] %v11914_v50  ;;  %v10110_v45 = vpop.f32.mrb[61].mxu1 }
 0xa40   :  { %v10111_v46 = vadd.f32 %v10110_v45, %v10109_v44  ;;  %v10112_v16 = vpop.f32.mrb[62].mxu1 }
 0xa41   :  { %v10113_v22 = vpop.f32.mrb[63].mxu1 }
 0xa42   :  { %v8859_v25 = vadd.f32 %v10111_v46, %v7418_v48 }
 0xa5e   :  { %v10131_v26 = vpop.f32.mrb[64].mxu1 }
 0xa5f   :  { %v10132_v52 = vpop.f32.mrb[65].mxu1 }
 0xa60   :  { %v10133_v53 = vadd.f32 %v10132_v52, %v10131_v26  ;;  %v10134_v61 = vpop.f32.mrb[66].mxu1 }
 0xa61   :  { %v10135_v62 = vpop.f32.mrb[67].mxu1 }
 0xa62   :  { %v8899_v63 = vadd.f32 %v10133_v53, %v8859_v25 }
 0xa64   :  { %v8910_v29 = vsub.f32 0.0, %v8899_v63 }
 0xa66   :  { %v8923_v1 = vmul.f32 1.442695, %v8910_v29 }
 0xa68   :  { %11915 = vpow2.f32 %v8923_v1 }
 0xa72   :  { %v11916_v0 = vpop.eup %11915 }
 0xa73   :  { %v8931_v51 = vadd.f32 1.0, %v11916_v0 }
 0xa75   :  { %11917 = vrcp.f32 %v8931_v51 }
 0xa7f   :  { %v11918_v4 = vpop.eup %11917 }
 0xa80   :  { %8945 = vst [vmem:[%s12804_s12 + $0x30] sm:$0xff] %v11918_v4 }
 0xa9d   :  { %v8817_v8 = vpop.f32.mrb[40].mxu0 }
 0xa9e   :  { %v10159_v9 = vadd.f32 %v8817_v8, %v7410_v7  ;;  %v8819_v10 = vpop.f32.mrb[41].mxu0 }
 0xa9f   :  { %v10160_v12 = vadd.f32 %v8819_v10, %v7414_v6  ;;  %v8821_v13 = vpop.f32.mrb[42].mxu0 }
 0xaa0   :  { %v8908_v14 = vsub.f32 0.0, %v10159_v9  ;;  %v8822_v17 = vpop.f32.mrb[43].mxu0 }
 0xaa1   :  { %v8909_v18 = vsub.f32 0.0, %v10160_v12 }
 0xaa2   :  { %v8919_v19 = vmul.f32 1.442695, %v8908_v14 }
 0xaa3   :  { %v8921_v37 = vmul.f32 1.442695, %v8909_v18 }
 0xaa4   :  { %11919 = vpow2.f32 %v8919_v19 }
 0xaa5   :  { %11921 = vpow2.f32 %v8921_v37 }
 0xaae   :  { %v11920_v20 = vpop.eup %11919 }
 0xaaf   :  { %v11922_v21 = vpop.eup %11921  ;;  %v8929_v23 = vadd.f32 1.0, %v11920_v20 }
 0xab0   :  { %v8930_v56 = vadd.f32 1.0, %v11922_v21 }
 0xab1   :  { %11923 = vrcp.f32 %v8929_v23 }
 0xab2   :  { %11925 = vrcp.f32 %v8930_v56 }
 0xabb   :  { %v11924_v24 = vpop.eup %11923 }
 0xabc   :  { %v11926_v11 = vpop.eup %11925  ;;  %8943 = vst [vmem:[%s12804_s12 + $0x20] sm:$0xff] %v11924_v24 }
 0xabd   :  { %8944 = vst [vmem:[%s12804_s12 + $0x28] sm:$0xff] %v11926_v11 }
 0xabe   :  { %8960 = vsyncpa [#allocation3], 1 }
 0xabf   :  { %8961 = vsyncpa [#allocation5], 1 }
 0xac0   :  { %8962 = vsyncpa [#allocation8], 1 }
 0xac1   :  { %8963 = vsyncpa [#allocation11], 1 }
 0xac2   :  { %8964 = vsyncpa [#allocation14], 1 }
 0xac3   :  { %8965 = vsyncpa [#allocation17], 1 }

</bundles_post_ra>
